<compile_context>
chip_gen: v7x
topology: tpu7x:2x2x1
jax: 0.10.0
libtpu: 0.0.40
codegen_flags: <defaults>
</compile_context>

<pallas_src>
import numpy as np

import jax
import jax.numpy as jnp
from jax.experimental import pallas as pl
from jax.experimental.pallas import tpu as pltpu


# ------------------------------ fused kernel --------------------------------

def _lenet_kernel(x_ref, g1_ref, b1_ref, t1_ref, g2_ref, b2_ref, t2_ref,
                  f1w_ref, f1b_ref, f2w_ref, f2b_ref, f3w_ref, f3b_ref,
                  o_ref):
    """One image per grid step; everything stays resident on-chip.

    Layouts (rows = sublanes, cols = lanes):
      x                    (32, 32)   single input channel
      conv1 even/odd rows  (90, 30) = (6 ch * 15 rows, 30 cols)
      pool1                (90, 15)
      conv2 even/odd rows  (96, 12) = (16 ch * 6 rows, 12 cols)
      pool2                (96, 6)
      fc activations       column vectors (120,1) -> (84,1) -> (10,1)
    """
    f32 = jnp.float32
    x = x_ref[0]                                            # (32, 32)

    # ---- conv1 + ReLU + row-pair max of pool1 -------------------------------
    # g1[p, dj] @ x[:, dj:dj+30] accumulates the 3x3 conv for even (p=0) /
    # odd (p=1) output rows of all 6 output channels at once.
    pre_e = jnp.zeros((90, 30), f32)
    pre_o = jnp.zeros((90, 30), f32)
    for dj in range(3):
        xs = x[:, dj:dj + 30]                               # (32, 30)
        pre_e += jnp.dot(g1_ref[0, dj], xs, preferred_element_type=f32)
        pre_o += jnp.dot(g1_ref[1, dj], xs, preferred_element_type=f32)
    r1 = jnp.maximum(jnp.maximum(pre_e, pre_o) + b1_ref[...], 0.0)   # (90, 30)
    # column-pair max via 0/1 selection matmuls -> pool1 output (90, 15)
    p1 = jnp.maximum(jnp.dot(r1, t1_ref[0], preferred_element_type=f32),
                     jnp.dot(r1, t1_ref[1], preferred_element_type=f32))

    # ---- conv2 + ReLU + row-pair max of pool2 -------------------------------
    # (only the 12x12 region the floor-mode pool actually consumes is computed)
    pre_e = jnp.zeros((96, 12), f32)
    pre_o = jnp.zeros((96, 12), f32)
    for dj in range(3):
        ps = p1[:, dj:dj + 12]                              # (90, 12)
        pre_e += jnp.dot(g2_ref[0, dj], ps, preferred_element_type=f32)
        pre_o += jnp.dot(g2_ref[1, dj], ps, preferred_element_type=f32)
    r2 = jnp.maximum(jnp.maximum(pre_e, pre_o) + b2_ref[...], 0.0)   # (96, 12)
    p2 = jnp.maximum(jnp.dot(r2, t2_ref[0], preferred_element_type=f32),
                     jnp.dot(r2, t2_ref[1], preferred_element_type=f32))  # (96, 6)

    # ---- fc1 / fc2 / fc3 ----------------------------------------------------
    # PyTorch's NCHW flatten is folded into f1w: pooled column w multiplies the
    # fc1 weight slab f1w[w] (120, 96) -> no in-kernel reshape/transpose.
    y = f1b_ref[...]                                        # (120, 1)
    for w in range(6):
        y += jnp.dot(f1w_ref[w], p2[:, w:w + 1], preferred_element_type=f32)
    y = jnp.maximum(y, 0.0)
    y = jnp.maximum(
        jnp.dot(f2w_ref[...], y, preferred_element_type=f32) + f2b_ref[...], 0.0)
    y = jnp.dot(f3w_ref[...], y, preferred_element_type=f32) + f3b_ref[...]
    o_ref[0] = y                                            # (10, 1)


# ------------------------------- wrapper -------------------------------------

_PARAM_ORDER = ("g1", "b1", "t1", "g2", "b2", "t2",
                "f1w", "f1b", "f2w", "f2b", "f3w", "f3b")


def lenet_forward(kparams, x_nchw):
    """x_nchw: (N, 1, 32, 32) -> logits (N, 10)."""
    n = x_nchw.shape[0]
    # Cin == 1, so NCHW -> (N, 32, 32) is a pure metadata reshape (no transpose).
    x = x_nchw.reshape(n, 32, 32).astype(jnp.float32)
    weights = [kparams[k] for k in _PARAM_ORDER]

    in_specs = [pl.BlockSpec((1, 32, 32), lambda i: (i, 0, 0))]
    for wgt in weights:
        # Whole (tiny) weight resident in VMEM; constant block index so the
        # pipeline fetches it once and keeps it across grid steps.
        in_specs.append(pl.BlockSpec(wgt.shape, lambda i, _nd=wgt.ndim: (0,) * _nd))

    out = pl.pallas_call(
        _lenet_kernel,
        grid=(n,),
        in_specs=in_specs,
        out_specs=pl.BlockSpec((1, 10, 1), lambda i: (i, 0, 0)),
        out_shape=jax.ShapeDtypeStruct((n, 10, 1), jnp.float32),
        compiler_params=pltpu.CompilerParams(
            # batch axis is independent -> megacore-shardable on v7x,
            # harmless on single-TC v5e/v6e.
            dimension_semantics=("parallel",),
        ),
    )(x, *weights)
    return out[:, :, 0]                                     # (N, 10)


# ------------------------- parameter preparation -----------------------------

def init_params(key):
    """Random parameters in the original PyTorch layouts."""
    ks = jax.random.split(key, 10)
    return {
        "conv1_w": jax.random.normal(ks[0], (6, 1, 3, 3), jnp.float32) * 0.1,
        "conv1_b": jax.random.normal(ks[1], (6,), jnp.float32) * 0.1,
        "conv2_w": jax.random.normal(ks[2], (16, 6, 3, 3), jnp.float32) * 0.1,
        "conv2_b": jax.random.normal(ks[3], (16,), jnp.float32) * 0.1,
        "fc1_w": jax.random.normal(ks[4], (120, 16 * 6 * 6), jnp.float32) * 0.05,
        "fc1_b": jax.random.normal(ks[5], (120,), jnp.float32) * 0.05,
        "fc2_w": jax.random.normal(ks[6], (84, 120), jnp.float32) * 0.05,
        "fc2_b": jax.random.normal(ks[7], (84,), jnp.float32) * 0.05,
        "fc3_w": jax.random.normal(ks[8], (10, 84), jnp.float32) * 0.05,
        "fc3_b": jax.random.normal(ks[9], (10,), jnp.float32) * 0.05,
    }


def _shift_placement(rows_out, rows_in, parity):
    """P[r, di, s] = 1  iff  s == 2*r + parity + di
    (conv kernel-row di hitting pooled-output row r of the given parity)."""
    p = np.zeros((rows_out, 3, rows_in), np.float32)
    for r in range(rows_out):
        for di in range(3):
            p[r, di, 2 * r + parity + di] = 1.0
    return jnp.asarray(p)


def _col_select(cols_in, cols_out, parity):
    """T[i, c] = 1  iff  i == 2*c + parity  (even/odd column pick for pooling)."""
    t = np.zeros((cols_in, cols_out), np.float32)
    for c in range(cols_out):
        t[2 * c + parity, c] = 1.0
    return jnp.asarray(t)


def prepare_params(p):
    """One-time lowering of PyTorch-layout weights into the structured
    matrices the fused kernel consumes (runs outside the hot path)."""
    w1 = p["conv1_w"][:, 0].astype(jnp.float32)             # (6, 3, 3)   [co, di, dj]
    w2 = p["conv2_w"].astype(jnp.float32)                   # (16, 6, 3, 3)
    # conv1: per-dj shift matrices, even/odd output rows   -> (2, 3, 90, 32)
    g1 = jnp.stack([
        jnp.einsum("cij,rix->jcrx", w1, _shift_placement(15, 32, par))
           .reshape(3, 90, 32)
        for par in (0, 1)])
    # conv2: same idea over the 6 input channels           -> (2, 3, 96, 90)
    g2 = jnp.stack([
        jnp.einsum("ocij,ris->jorcs", w2, _shift_placement(6, 15, par))
           .reshape(3, 96, 90)
        for par in (0, 1)])
    t1 = jnp.stack([_col_select(30, 15, par) for par in (0, 1)])    # (2, 30, 15)
    t2 = jnp.stack([_col_select(12, 6, par) for par in (0, 1)])     # (2, 12, 6)
    b1 = jnp.repeat(p["conv1_b"], 15).reshape(90, 1).astype(jnp.float32)
    b2 = jnp.repeat(p["conv2_b"], 6).reshape(96, 1).astype(jnp.float32)
    # fc1: fold the NCHW flatten -> one (120, 96) slab per pooled column w.
    f1w = jnp.transpose(p["fc1_w"].reshape(120, 16, 6, 6),
                        (3, 0, 1, 2)).reshape(6, 120, 96)
    return {
        "g1": g1, "b1": b1, "t1": t1,
        "g2": g2, "b2": b2, "t2": t2,
        "f1w": f1w, "f1b": p["fc1_b"].reshape(120, 1),
        "f2w": p["fc2_w"], "f2b": p["fc2_b"].reshape(84, 1),
        "f3w": p["fc3_w"], "f3b": p["fc3_b"].reshape(10, 1),
    }


if __name__ == "__main__":
    key = jax.random.PRNGKey(0)
    k_x, k_p = jax.random.split(key)

    # Spatial size is fixed by the architecture (fc1 expects 16*6*6 features):
    # 32 -> conv3 -> 30 -> pool2 -> 15 -> conv3 -> 13 (only 12 used) -> pool2 -> 6.
    x = jax.random.normal(k_x, (2, 1, 32, 32), jnp.float32)
    params = init_params(k_p)
    kparams = prepare_params(params)        # one-time weight re-packing

    out = jax.jit(lenet_forward)(kparams, x)
    out = jax.block_until_ready(out)
    assert out.shape == (2, 10), out.shape
    print("KERNEL_OK")
</pallas_src>

<mosaic_0001>
module attributes {stable_mosaic.version = 11 : i64} {
  func.func @_lenet_kernel(%arg0: i32, %arg1: memref<1x32x32xf32, #tpu.memory_space<vmem>>, %arg2: memref<2x3x90x32xf32, #tpu.memory_space<vmem>>, %arg3: memref<90x1xf32, #tpu.memory_space<vmem>>, %arg4: memref<2x30x15xf32, #tpu.memory_space<vmem>>, %arg5: memref<2x3x96x90xf32, #tpu.memory_space<vmem>>, %arg6: memref<96x1xf32, #tpu.memory_space<vmem>>, %arg7: memref<2x12x6xf32, #tpu.memory_space<vmem>>, %arg8: memref<6x120x96xf32, #tpu.memory_space<vmem>>, %arg9: memref<120x1xf32, #tpu.memory_space<vmem>>, %arg10: memref<84x120xf32, #tpu.memory_space<vmem>>, %arg11: memref<84x1xf32, #tpu.memory_space<vmem>>, %arg12: memref<10x84xf32, #tpu.memory_space<vmem>>, %arg13: memref<10x1xf32, #tpu.memory_space<vmem>>, %arg14: memref<1x10x1xf32, #tpu.memory_space<vmem>>) attributes {dimension_semantics = [#tpu.dimension_semantics<parallel>], iteration_bounds = array<i64: 2>, scalar_prefetch = 0 : i64, scratch_operands = 0 : i64, tpu.core_type = #tpu.core_type<tc>, window_params = [{transform_indices = @transform_0, window_bounds = array<i64: 1, 32, 32>}, {pipeline_mode = #tpu.pipeline_mode<synchronous>, transform_indices = @transform_1, window_bounds = array<i64: 2, 3, 90, 32>}, {pipeline_mode = #tpu.pipeline_mode<synchronous>, transform_indices = @transform_2, window_bounds = array<i64: 90, 1>}, {pipeline_mode = #tpu.pipeline_mode<synchronous>, transform_indices = @transform_3, window_bounds = array<i64: 2, 30, 15>}, {pipeline_mode = #tpu.pipeline_mode<synchronous>, transform_indices = @transform_4, window_bounds = array<i64: 2, 3, 96, 90>}, {pipeline_mode = #tpu.pipeline_mode<synchronous>, transform_indices = @transform_5, window_bounds = array<i64: 96, 1>}, {pipeline_mode = #tpu.pipeline_mode<synchronous>, transform_indices = @transform_6, window_bounds = array<i64: 2, 12, 6>}, {pipeline_mode = #tpu.pipeline_mode<synchronous>, transform_indices = @transform_7, window_bounds = array<i64: 6, 120, 96>}, {pipeline_mode = #tpu.pipeline_mode<synchronous>, transform_indices = @transform_8, window_bounds = array<i64: 120, 1>}, {pipeline_mode = #tpu.pipeline_mode<synchronous>, transform_indices = @transform_9, window_bounds = array<i64: 84, 120>}, {pipeline_mode = #tpu.pipeline_mode<synchronous>, transform_indices = @transform_10, window_bounds = array<i64: 84, 1>}, {pipeline_mode = #tpu.pipeline_mode<synchronous>, transform_indices = @transform_11, window_bounds = array<i64: 10, 84>}, {pipeline_mode = #tpu.pipeline_mode<synchronous>, transform_indices = @transform_12, window_bounds = array<i64: 10, 1>}, {transform_indices = @transform_13, window_bounds = array<i64: 1, 10, 1>}]} {
    %c0 = arith.constant 0 : index
    %c0_0 = arith.constant 0 : index
    %c0_1 = arith.constant 0 : index
    %0 = vector.load %arg1[%c0, %c0_0, %c0_1] : memref<1x32x32xf32, #tpu.memory_space<vmem>>, vector<1x32x32xf32>
    %1 = vector.shape_cast %0 : vector<1x32x32xf32> to vector<32x32xf32>
    %cst = arith.constant 0.000000e+00 : f32
    %2 = vector.broadcast %cst : f32 to vector<90x30xf32>
    %cst_2 = arith.constant 0.000000e+00 : f32
    %3 = vector.broadcast %cst_2 : f32 to vector<90x30xf32>
    %4 = vector.extract_strided_slice %1 {offsets = [0, 0], sizes = [32, 30], strides = [1, 1]} : vector<32x32xf32> to vector<32x30xf32>
    %c0_3 = arith.constant 0 : index
    %c0_4 = arith.constant 0 : index
    %c0_5 = arith.constant 0 : index
    %c0_6 = arith.constant 0 : index
    %5 = vector.load %arg2[%c0_3, %c0_4, %c0_5, %c0_6] : memref<2x3x90x32xf32, #tpu.memory_space<vmem>>, vector<1x1x90x32xf32>
    %6 = vector.shape_cast %5 : vector<1x1x90x32xf32> to vector<90x32xf32>
    %cst_7 = arith.constant dense<0.000000e+00> : vector<90x30xf32>
    %7 = tpu.matmul %6, %4, %cst_7 {dimension_numbers = #tpu.dot_dimension_numbers<[1], [0], [0], [1], [0, 0, 1, 1], [], []>} : vector<90x32xf32>, vector<32x30xf32>, vector<90x30xf32> -> vector<90x30xf32>
    %8 = arith.addf %2, %7 : vector<90x30xf32>
    %c1 = arith.constant 1 : index
    %c0_8 = arith.constant 0 : index
    %c0_9 = arith.constant 0 : index
    %c0_10 = arith.constant 0 : index
    %9 = vector.load %arg2[%c1, %c0_8, %c0_9, %c0_10] : memref<2x3x90x32xf32, #tpu.memory_space<vmem>>, vector<1x1x90x32xf32>
    %10 = vector.shape_cast %9 : vector<1x1x90x32xf32> to vector<90x32xf32>
    %cst_11 = arith.constant dense<0.000000e+00> : vector<90x30xf32>
    %11 = tpu.matmul %10, %4, %cst_11 {dimension_numbers = #tpu.dot_dimension_numbers<[1], [0], [0], [1], [0, 0, 1, 1], [], []>} : vector<90x32xf32>, vector<32x30xf32>, vector<90x30xf32> -> vector<90x30xf32>
    %12 = arith.addf %3, %11 : vector<90x30xf32>
    %13 = vector.extract_strided_slice %1 {offsets = [0, 1], sizes = [32, 30], strides = [1, 1]} : vector<32x32xf32> to vector<32x30xf32>
    %c0_12 = arith.constant 0 : index
    %c1_13 = arith.constant 1 : index
    %c0_14 = arith.constant 0 : index
    %c0_15 = arith.constant 0 : index
    %14 = vector.load %arg2[%c0_12, %c1_13, %c0_14, %c0_15] : memref<2x3x90x32xf32, #tpu.memory_space<vmem>>, vector<1x1x90x32xf32>
    %15 = vector.shape_cast %14 : vector<1x1x90x32xf32> to vector<90x32xf32>
    %cst_16 = arith.constant dense<0.000000e+00> : vector<90x30xf32>
    %16 = tpu.matmul %15, %13, %cst_16 {dimension_numbers = #tpu.dot_dimension_numbers<[1], [0], [0], [1], [0, 0, 1, 1], [], []>} : vector<90x32xf32>, vector<32x30xf32>, vector<90x30xf32> -> vector<90x30xf32>
    %17 = arith.addf %8, %16 : vector<90x30xf32>
    %c1_17 = arith.constant 1 : index
    %c1_18 = arith.constant 1 : index
    %c0_19 = arith.constant 0 : index
    %c0_20 = arith.constant 0 : index
    %18 = vector.load %arg2[%c1_17, %c1_18, %c0_19, %c0_20] : memref<2x3x90x32xf32, #tpu.memory_space<vmem>>, vector<1x1x90x32xf32>
    %19 = vector.shape_cast %18 : vector<1x1x90x32xf32> to vector<90x32xf32>
    %cst_21 = arith.constant dense<0.000000e+00> : vector<90x30xf32>
    %20 = tpu.matmul %19, %13, %cst_21 {dimension_numbers = #tpu.dot_dimension_numbers<[1], [0], [0], [1], [0, 0, 1, 1], [], []>} : vector<90x32xf32>, vector<32x30xf32>, vector<90x30xf32> -> vector<90x30xf32>
    %21 = arith.addf %12, %20 : vector<90x30xf32>
    %22 = vector.extract_strided_slice %1 {offsets = [0, 2], sizes = [32, 30], strides = [1, 1]} : vector<32x32xf32> to vector<32x30xf32>
    %c0_22 = arith.constant 0 : index
    %c2 = arith.constant 2 : index
    %c0_23 = arith.constant 0 : index
    %c0_24 = arith.constant 0 : index
    %23 = vector.load %arg2[%c0_22, %c2, %c0_23, %c0_24] : memref<2x3x90x32xf32, #tpu.memory_space<vmem>>, vector<1x1x90x32xf32>
    %24 = vector.shape_cast %23 : vector<1x1x90x32xf32> to vector<90x32xf32>
    %cst_25 = arith.constant dense<0.000000e+00> : vector<90x30xf32>
    %25 = tpu.matmul %24, %22, %cst_25 {dimension_numbers = #tpu.dot_dimension_numbers<[1], [0], [0], [1], [0, 0, 1, 1], [], []>} : vector<90x32xf32>, vector<32x30xf32>, vector<90x30xf32> -> vector<90x30xf32>
    %26 = arith.addf %17, %25 : vector<90x30xf32>
    %c1_26 = arith.constant 1 : index
    %c2_27 = arith.constant 2 : index
    %c0_28 = arith.constant 0 : index
    %c0_29 = arith.constant 0 : index
    %27 = vector.load %arg2[%c1_26, %c2_27, %c0_28, %c0_29] : memref<2x3x90x32xf32, #tpu.memory_space<vmem>>, vector<1x1x90x32xf32>
    %28 = vector.shape_cast %27 : vector<1x1x90x32xf32> to vector<90x32xf32>
    %cst_30 = arith.constant dense<0.000000e+00> : vector<90x30xf32>
    %29 = tpu.matmul %28, %22, %cst_30 {dimension_numbers = #tpu.dot_dimension_numbers<[1], [0], [0], [1], [0, 0, 1, 1], [], []>} : vector<90x32xf32>, vector<32x30xf32>, vector<90x30xf32> -> vector<90x30xf32>
    %30 = arith.addf %21, %29 : vector<90x30xf32>
    %31 = arith.maximumf %26, %30 : vector<90x30xf32>
    %c0_31 = arith.constant 0 : index
    %c0_32 = arith.constant 0 : index
    %32 = vector.load %arg3[%c0_31, %c0_32] : memref<90x1xf32, #tpu.memory_space<vmem>>, vector<90x1xf32>
    %33 = vector.broadcast %32 : vector<90x1xf32> to vector<90x30xf32>
    %34 = arith.addf %31, %33 : vector<90x30xf32>
    %cst_33 = arith.constant 0.000000e+00 : f32
    %35 = vector.broadcast %cst_33 : f32 to vector<90x30xf32>
    %36 = arith.maximumf %34, %35 : vector<90x30xf32>
    %c0_34 = arith.constant 0 : index
    %c0_35 = arith.constant 0 : index
    %c0_36 = arith.constant 0 : index
    %37 = vector.load %arg4[%c0_34, %c0_35, %c0_36] : memref<2x30x15xf32, #tpu.memory_space<vmem>>, vector<1x30x15xf32>
    %38 = vector.shape_cast %37 : vector<1x30x15xf32> to vector<30x15xf32>
    %cst_37 = arith.constant dense<0.000000e+00> : vector<90x15xf32>
    %39 = tpu.matmul %36, %38, %cst_37 {dimension_numbers = #tpu.dot_dimension_numbers<[1], [0], [0], [1], [0, 0, 1, 1], [], []>} : vector<90x30xf32>, vector<30x15xf32>, vector<90x15xf32> -> vector<90x15xf32>
    %c1_38 = arith.constant 1 : index
    %c0_39 = arith.constant 0 : index
    %c0_40 = arith.constant 0 : index
    %40 = vector.load %arg4[%c1_38, %c0_39, %c0_40] : memref<2x30x15xf32, #tpu.memory_space<vmem>>, vector<1x30x15xf32>
    %41 = vector.shape_cast %40 : vector<1x30x15xf32> to vector<30x15xf32>
    %cst_41 = arith.constant dense<0.000000e+00> : vector<90x15xf32>
    %42 = tpu.matmul %36, %41, %cst_41 {dimension_numbers = #tpu.dot_dimension_numbers<[1], [0], [0], [1], [0, 0, 1, 1], [], []>} : vector<90x30xf32>, vector<30x15xf32>, vector<90x15xf32> -> vector<90x15xf32>
    %43 = arith.maximumf %39, %42 : vector<90x15xf32>
    %cst_42 = arith.constant 0.000000e+00 : f32
    %44 = vector.broadcast %cst_42 : f32 to vector<96x12xf32>
    %cst_43 = arith.constant 0.000000e+00 : f32
    %45 = vector.broadcast %cst_43 : f32 to vector<96x12xf32>
    %46 = vector.extract_strided_slice %43 {offsets = [0, 0], sizes = [90, 12], strides = [1, 1]} : vector<90x15xf32> to vector<90x12xf32>
    %c0_44 = arith.constant 0 : index
    %c0_45 = arith.constant 0 : index
    %c0_46 = arith.constant 0 : index
    %c0_47 = arith.constant 0 : index
    %47 = vector.load %arg5[%c0_44, %c0_45, %c0_46, %c0_47] : memref<2x3x96x90xf32, #tpu.memory_space<vmem>>, vector<1x1x96x90xf32>
    %48 = vector.shape_cast %47 : vector<1x1x96x90xf32> to vector<96x90xf32>
    %cst_48 = arith.constant dense<0.000000e+00> : vector<96x12xf32>
    %49 = tpu.matmul %48, %46, %cst_48 {dimension_numbers = #tpu.dot_dimension_numbers<[1], [0], [0], [1], [0, 0, 1, 1], [], []>} : vector<96x90xf32>, vector<90x12xf32>, vector<96x12xf32> -> vector<96x12xf32>
    %50 = arith.addf %44, %49 : vector<96x12xf32>
    %c1_49 = arith.constant 1 : index
    %c0_50 = arith.constant 0 : index
    %c0_51 = arith.constant 0 : index
    %c0_52 = arith.constant 0 : index
    %51 = vector.load %arg5[%c1_49, %c0_50, %c0_51, %c0_52] : memref<2x3x96x90xf32, #tpu.memory_space<vmem>>, vector<1x1x96x90xf32>
    %52 = vector.shape_cast %51 : vector<1x1x96x90xf32> to vector<96x90xf32>
    %cst_53 = arith.constant dense<0.000000e+00> : vector<96x12xf32>
    %53 = tpu.matmul %52, %46, %cst_53 {dimension_numbers = #tpu.dot_dimension_numbers<[1], [0], [0], [1], [0, 0, 1, 1], [], []>} : vector<96x90xf32>, vector<90x12xf32>, vector<96x12xf32> -> vector<96x12xf32>
    %54 = arith.addf %45, %53 : vector<96x12xf32>
    %55 = vector.extract_strided_slice %43 {offsets = [0, 1], sizes = [90, 12], strides = [1, 1]} : vector<90x15xf32> to vector<90x12xf32>
    %c0_54 = arith.constant 0 : index
    %c1_55 = arith.constant 1 : index
    %c0_56 = arith.constant 0 : index
    %c0_57 = arith.constant 0 : index
    %56 = vector.load %arg5[%c0_54, %c1_55, %c0_56, %c0_57] : memref<2x3x96x90xf32, #tpu.memory_space<vmem>>, vector<1x1x96x90xf32>
    %57 = vector.shape_cast %56 : vector<1x1x96x90xf32> to vector<96x90xf32>
    %cst_58 = arith.constant dense<0.000000e+00> : vector<96x12xf32>
    %58 = tpu.matmul %57, %55, %cst_58 {dimension_numbers = #tpu.dot_dimension_numbers<[1], [0], [0], [1], [0, 0, 1, 1], [], []>} : vector<96x90xf32>, vector<90x12xf32>, vector<96x12xf32> -> vector<96x12xf32>
    %59 = arith.addf %50, %58 : vector<96x12xf32>
    %c1_59 = arith.constant 1 : index
    %c1_60 = arith.constant 1 : index
    %c0_61 = arith.constant 0 : index
    %c0_62 = arith.constant 0 : index
    %60 = vector.load %arg5[%c1_59, %c1_60, %c0_61, %c0_62] : memref<2x3x96x90xf32, #tpu.memory_space<vmem>>, vector<1x1x96x90xf32>
    %61 = vector.shape_cast %60 : vector<1x1x96x90xf32> to vector<96x90xf32>
    %cst_63 = arith.constant dense<0.000000e+00> : vector<96x12xf32>
    %62 = tpu.matmul %61, %55, %cst_63 {dimension_numbers = #tpu.dot_dimension_numbers<[1], [0], [0], [1], [0, 0, 1, 1], [], []>} : vector<96x90xf32>, vector<90x12xf32>, vector<96x12xf32> -> vector<96x12xf32>
    %63 = arith.addf %54, %62 : vector<96x12xf32>
    %64 = vector.extract_strided_slice %43 {offsets = [0, 2], sizes = [90, 12], strides = [1, 1]} : vector<90x15xf32> to vector<90x12xf32>
    %c0_64 = arith.constant 0 : index
    %c2_65 = arith.constant 2 : index
    %c0_66 = arith.constant 0 : index
    %c0_67 = arith.constant 0 : index
    %65 = vector.load %arg5[%c0_64, %c2_65, %c0_66, %c0_67] : memref<2x3x96x90xf32, #tpu.memory_space<vmem>>, vector<1x1x96x90xf32>
    %66 = vector.shape_cast %65 : vector<1x1x96x90xf32> to vector<96x90xf32>
    %cst_68 = arith.constant dense<0.000000e+00> : vector<96x12xf32>
    %67 = tpu.matmul %66, %64, %cst_68 {dimension_numbers = #tpu.dot_dimension_numbers<[1], [0], [0], [1], [0, 0, 1, 1], [], []>} : vector<96x90xf32>, vector<90x12xf32>, vector<96x12xf32> -> vector<96x12xf32>
    %68 = arith.addf %59, %67 : vector<96x12xf32>
    %c1_69 = arith.constant 1 : index
    %c2_70 = arith.constant 2 : index
    %c0_71 = arith.constant 0 : index
    %c0_72 = arith.constant 0 : index
    %69 = vector.load %arg5[%c1_69, %c2_70, %c0_71, %c0_72] : memref<2x3x96x90xf32, #tpu.memory_space<vmem>>, vector<1x1x96x90xf32>
    %70 = vector.shape_cast %69 : vector<1x1x96x90xf32> to vector<96x90xf32>
    %cst_73 = arith.constant dense<0.000000e+00> : vector<96x12xf32>
    %71 = tpu.matmul %70, %64, %cst_73 {dimension_numbers = #tpu.dot_dimension_numbers<[1], [0], [0], [1], [0, 0, 1, 1], [], []>} : vector<96x90xf32>, vector<90x12xf32>, vector<96x12xf32> -> vector<96x12xf32>
    %72 = arith.addf %63, %71 : vector<96x12xf32>
    %73 = arith.maximumf %68, %72 : vector<96x12xf32>
    %c0_74 = arith.constant 0 : index
    %c0_75 = arith.constant 0 : index
    %74 = vector.load %arg6[%c0_74, %c0_75] : memref<96x1xf32, #tpu.memory_space<vmem>>, vector<96x1xf32>
    %75 = vector.broadcast %74 : vector<96x1xf32> to vector<96x12xf32>
    %76 = arith.addf %73, %75 : vector<96x12xf32>
    %cst_76 = arith.constant 0.000000e+00 : f32
    %77 = vector.broadcast %cst_76 : f32 to vector<96x12xf32>
    %78 = arith.maximumf %76, %77 : vector<96x12xf32>
    %c0_77 = arith.constant 0 : index
    %c0_78 = arith.constant 0 : index
    %c0_79 = arith.constant 0 : index
    %79 = vector.load %arg7[%c0_77, %c0_78, %c0_79] : memref<2x12x6xf32, #tpu.memory_space<vmem>>, vector<1x12x6xf32>
    %80 = vector.shape_cast %79 : vector<1x12x6xf32> to vector<12x6xf32>
    %cst_80 = arith.constant dense<0.000000e+00> : vector<96x6xf32>
    %81 = tpu.matmul %78, %80, %cst_80 {dimension_numbers = #tpu.dot_dimension_numbers<[1], [0], [0], [1], [0, 0, 1, 1], [], []>} : vector<96x12xf32>, vector<12x6xf32>, vector<96x6xf32> -> vector<96x6xf32>
    %c1_81 = arith.constant 1 : index
    %c0_82 = arith.constant 0 : index
    %c0_83 = arith.constant 0 : index
    %82 = vector.load %arg7[%c1_81, %c0_82, %c0_83] : memref<2x12x6xf32, #tpu.memory_space<vmem>>, vector<1x12x6xf32>
    %83 = vector.shape_cast %82 : vector<1x12x6xf32> to vector<12x6xf32>
    %cst_84 = arith.constant dense<0.000000e+00> : vector<96x6xf32>
    %84 = tpu.matmul %78, %83, %cst_84 {dimension_numbers = #tpu.dot_dimension_numbers<[1], [0], [0], [1], [0, 0, 1, 1], [], []>} : vector<96x12xf32>, vector<12x6xf32>, vector<96x6xf32> -> vector<96x6xf32>
    %85 = arith.maximumf %81, %84 : vector<96x6xf32>
    %c0_85 = arith.constant 0 : index
    %c0_86 = arith.constant 0 : index
    %86 = vector.load %arg9[%c0_85, %c0_86] : memref<120x1xf32, #tpu.memory_space<vmem>>, vector<120x1xf32>
    %c0_87 = arith.constant 0 : index
    %c0_88 = arith.constant 0 : index
    %c0_89 = arith.constant 0 : index
    %87 = vector.load %arg8[%c0_87, %c0_88, %c0_89] : memref<6x120x96xf32, #tpu.memory_space<vmem>>, vector<1x120x96xf32>
    %88 = vector.shape_cast %87 : vector<1x120x96xf32> to vector<120x96xf32>
    %89 = vector.extract_strided_slice %85 {offsets = [0, 0], sizes = [96, 1], strides = [1, 1]} : vector<96x6xf32> to vector<96x1xf32>
    %cst_90 = arith.constant dense<0.000000e+00> : vector<120x1xf32>
    %90 = tpu.matmul %88, %89, %cst_90 {dimension_numbers = #tpu.dot_dimension_numbers<[1], [0], [0], [1], [0, 0, 1, 1], [], []>} : vector<120x96xf32>, vector<96x1xf32>, vector<120x1xf32> -> vector<120x1xf32>
    %91 = arith.addf %86, %90 : vector<120x1xf32>
    %c1_91 = arith.constant 1 : index
    %c0_92 = arith.constant 0 : index
    %c0_93 = arith.constant 0 : index
    %92 = vector.load %arg8[%c1_91, %c0_92, %c0_93] : memref<6x120x96xf32, #tpu.memory_space<vmem>>, vector<1x120x96xf32>
    %93 = vector.shape_cast %92 : vector<1x120x96xf32> to vector<120x96xf32>
    %94 = vector.extract_strided_slice %85 {offsets = [0, 1], sizes = [96, 1], strides = [1, 1]} : vector<96x6xf32> to vector<96x1xf32>
    %cst_94 = arith.constant dense<0.000000e+00> : vector<120x1xf32>
    %95 = tpu.matmul %93, %94, %cst_94 {dimension_numbers = #tpu.dot_dimension_numbers<[1], [0], [0], [1], [0, 0, 1, 1], [], []>} : vector<120x96xf32>, vector<96x1xf32>, vector<120x1xf32> -> vector<120x1xf32>
    %96 = arith.addf %91, %95 : vector<120x1xf32>
    %c2_95 = arith.constant 2 : index
    %c0_96 = arith.constant 0 : index
    %c0_97 = arith.constant 0 : index
    %97 = vector.load %arg8[%c2_95, %c0_96, %c0_97] : memref<6x120x96xf32, #tpu.memory_space<vmem>>, vector<1x120x96xf32>
    %98 = vector.shape_cast %97 : vector<1x120x96xf32> to vector<120x96xf32>
    %99 = vector.extract_strided_slice %85 {offsets = [0, 2], sizes = [96, 1], strides = [1, 1]} : vector<96x6xf32> to vector<96x1xf32>
    %cst_98 = arith.constant dense<0.000000e+00> : vector<120x1xf32>
    %100 = tpu.matmul %98, %99, %cst_98 {dimension_numbers = #tpu.dot_dimension_numbers<[1], [0], [0], [1], [0, 0, 1, 1], [], []>} : vector<120x96xf32>, vector<96x1xf32>, vector<120x1xf32> -> vector<120x1xf32>
    %101 = arith.addf %96, %100 : vector<120x1xf32>
    %c3 = arith.constant 3 : index
    %c0_99 = arith.constant 0 : index
    %c0_100 = arith.constant 0 : index
    %102 = vector.load %arg8[%c3, %c0_99, %c0_100] : memref<6x120x96xf32, #tpu.memory_space<vmem>>, vector<1x120x96xf32>
    %103 = vector.shape_cast %102 : vector<1x120x96xf32> to vector<120x96xf32>
    %104 = vector.extract_strided_slice %85 {offsets = [0, 3], sizes = [96, 1], strides = [1, 1]} : vector<96x6xf32> to vector<96x1xf32>
    %cst_101 = arith.constant dense<0.000000e+00> : vector<120x1xf32>
    %105 = tpu.matmul %103, %104, %cst_101 {dimension_numbers = #tpu.dot_dimension_numbers<[1], [0], [0], [1], [0, 0, 1, 1], [], []>} : vector<120x96xf32>, vector<96x1xf32>, vector<120x1xf32> -> vector<120x1xf32>
    %106 = arith.addf %101, %105 : vector<120x1xf32>
    %c4 = arith.constant 4 : index
    %c0_102 = arith.constant 0 : index
    %c0_103 = arith.constant 0 : index
    %107 = vector.load %arg8[%c4, %c0_102, %c0_103] : memref<6x120x96xf32, #tpu.memory_space<vmem>>, vector<1x120x96xf32>
    %108 = vector.shape_cast %107 : vector<1x120x96xf32> to vector<120x96xf32>
    %109 = vector.extract_strided_slice %85 {offsets = [0, 4], sizes = [96, 1], strides = [1, 1]} : vector<96x6xf32> to vector<96x1xf32>
    %cst_104 = arith.constant dense<0.000000e+00> : vector<120x1xf32>
    %110 = tpu.matmul %108, %109, %cst_104 {dimension_numbers = #tpu.dot_dimension_numbers<[1], [0], [0], [1], [0, 0, 1, 1], [], []>} : vector<120x96xf32>, vector<96x1xf32>, vector<120x1xf32> -> vector<120x1xf32>
    %111 = arith.addf %106, %110 : vector<120x1xf32>
    %c5 = arith.constant 5 : index
    %c0_105 = arith.constant 0 : index
    %c0_106 = arith.constant 0 : index
    %112 = vector.load %arg8[%c5, %c0_105, %c0_106] : memref<6x120x96xf32, #tpu.memory_space<vmem>>, vector<1x120x96xf32>
    %113 = vector.shape_cast %112 : vector<1x120x96xf32> to vector<120x96xf32>
    %114 = vector.extract_strided_slice %85 {offsets = [0, 5], sizes = [96, 1], strides = [1, 1]} : vector<96x6xf32> to vector<96x1xf32>
    %cst_107 = arith.constant dense<0.000000e+00> : vector<120x1xf32>
    %115 = tpu.matmul %113, %114, %cst_107 {dimension_numbers = #tpu.dot_dimension_numbers<[1], [0], [0], [1], [0, 0, 1, 1], [], []>} : vector<120x96xf32>, vector<96x1xf32>, vector<120x1xf32> -> vector<120x1xf32>
    %116 = arith.addf %111, %115 : vector<120x1xf32>
    %cst_108 = arith.constant 0.000000e+00 : f32
    %117 = vector.broadcast %cst_108 : f32 to vector<120x1xf32>
    %118 = arith.maximumf %116, %117 : vector<120x1xf32>
    %c0_109 = arith.constant 0 : index
    %c0_110 = arith.constant 0 : index
    %119 = vector.load %arg10[%c0_109, %c0_110] : memref<84x120xf32, #tpu.memory_space<vmem>>, vector<84x120xf32>
    %cst_111 = arith.constant dense<0.000000e+00> : vector<84x1xf32>
    %120 = tpu.matmul %119, %118, %cst_111 {dimension_numbers = #tpu.dot_dimension_numbers<[1], [0], [0], [1], [0, 0, 1, 1], [], []>} : vector<84x120xf32>, vector<120x1xf32>, vector<84x1xf32> -> vector<84x1xf32>
    %c0_112 = arith.constant 0 : index
    %c0_113 = arith.constant 0 : index
    %121 = vector.load %arg11[%c0_112, %c0_113] : memref<84x1xf32, #tpu.memory_space<vmem>>, vector<84x1xf32>
    %122 = arith.addf %120, %121 : vector<84x1xf32>
    %cst_114 = arith.constant 0.000000e+00 : f32
    %123 = vector.broadcast %cst_114 : f32 to vector<84x1xf32>
    %124 = arith.maximumf %122, %123 : vector<84x1xf32>
    %c0_115 = arith.constant 0 : index
    %c0_116 = arith.constant 0 : index
    %125 = vector.load %arg12[%c0_115, %c0_116] : memref<10x84xf32, #tpu.memory_space<vmem>>, vector<10x84xf32>
    %cst_117 = arith.constant dense<0.000000e+00> : vector<10x1xf32>
    %126 = tpu.matmul %125, %124, %cst_117 {dimension_numbers = #tpu.dot_dimension_numbers<[1], [0], [0], [1], [0, 0, 1, 1], [], []>} : vector<10x84xf32>, vector<84x1xf32>, vector<10x1xf32> -> vector<10x1xf32>
    %c0_118 = arith.constant 0 : index
    %c0_119 = arith.constant 0 : index
    %127 = vector.load %arg13[%c0_118, %c0_119] : memref<10x1xf32, #tpu.memory_space<vmem>>, vector<10x1xf32>
    %128 = arith.addf %126, %127 : vector<10x1xf32>
    %c0_120 = arith.constant 0 : index
    %c0_121 = arith.constant 0 : index
    %c0_122 = arith.constant 0 : index
    %129 = vector.load %arg14[%c0_120, %c0_121, %c0_122] : memref<1x10x1xf32, #tpu.memory_space<vmem>>, vector<1x10x1xf32>
    %130 = vector.shape_cast %129 : vector<1x10x1xf32> to vector<10x1xf32>
    %131 = vector.shape_cast %128 : vector<10x1xf32> to vector<1x10x1xf32>
    tpu.vector_store %arg14[%c0_120, %c0_121, %c0_122], %131 {strides = array<i32>} : memref<1x10x1xf32, #tpu.memory_space<vmem>>, vector<1x10x1xf32>,
    return
  }
  func.func @transform_0(%arg0: i32) -> (i32, i32, i32) {
    %c0_i32 = arith.constant 0 : i32
    %c0_i32_0 = arith.constant 0 : i32
    %c0_i32_1 = arith.constant 0 : i32
    return %arg0, %c0_i32, %c0_i32_0 : i32, i32, i32
  }
  func.func @transform_1(%arg0: i32) -> (i32, i32, i32, i32) {
    %c0_i32 = arith.constant 0 : i32
    %c0_i32_0 = arith.constant 0 : i32
    %c0_i32_1 = arith.constant 0 : i32
    %c0_i32_2 = arith.constant 0 : i32
    %c0_i32_3 = arith.constant 0 : i32
    return %c0_i32, %c0_i32_0, %c0_i32_1, %c0_i32_2 : i32, i32, i32, i32
  }
  func.func @transform_2(%arg0: i32) -> (i32, i32) {
    %c0_i32 = arith.constant 0 : i32
    %c0_i32_0 = arith.constant 0 : i32
    %c0_i32_1 = arith.constant 0 : i32
    return %c0_i32, %c0_i32_0 : i32, i32
  }
  func.func @transform_3(%arg0: i32) -> (i32, i32, i32) {
    %c0_i32 = arith.constant 0 : i32
    %c0_i32_0 = arith.constant 0 : i32
    %c0_i32_1 = arith.constant 0 : i32
    %c0_i32_2 = arith.constant 0 : i32
    return %c0_i32, %c0_i32_0, %c0_i32_1 : i32, i32, i32
  }
  func.func @transform_4(%arg0: i32) -> (i32, i32, i32, i32) {
    %c0_i32 = arith.constant 0 : i32
    %c0_i32_0 = arith.constant 0 : i32
    %c0_i32_1 = arith.constant 0 : i32
    %c0_i32_2 = arith.constant 0 : i32
    %c0_i32_3 = arith.constant 0 : i32
    return %c0_i32, %c0_i32_0, %c0_i32_1, %c0_i32_2 : i32, i32, i32, i32
  }
  func.func @transform_5(%arg0: i32) -> (i32, i32) {
    %c0_i32 = arith.constant 0 : i32
    %c0_i32_0 = arith.constant 0 : i32
    %c0_i32_1 = arith.constant 0 : i32
    return %c0_i32, %c0_i32_0 : i32, i32
  }
  func.func @transform_6(%arg0: i32) -> (i32, i32, i32) {
    %c0_i32 = arith.constant 0 : i32
    %c0_i32_0 = arith.constant 0 : i32
    %c0_i32_1 = arith.constant 0 : i32
    %c0_i32_2 = arith.constant 0 : i32
    return %c0_i32, %c0_i32_0, %c0_i32_1 : i32, i32, i32
  }
  func.func @transform_7(%arg0: i32) -> (i32, i32, i32) {
    %c0_i32 = arith.constant 0 : i32
    %c0_i32_0 = arith.constant 0 : i32
    %c0_i32_1 = arith.constant 0 : i32
    %c0_i32_2 = arith.constant 0 : i32
    return %c0_i32, %c0_i32_0, %c0_i32_1 : i32, i32, i32
  }
  func.func @transform_8(%arg0: i32) -> (i32, i32) {
    %c0_i32 = arith.constant 0 : i32
    %c0_i32_0 = arith.constant 0 : i32
    %c0_i32_1 = arith.constant 0 : i32
    return %c0_i32, %c0_i32_0 : i32, i32
  }
  func.func @transform_9(%arg0: i32) -> (i32, i32) {
    %c0_i32 = arith.constant 0 : i32
    %c0_i32_0 = arith.constant 0 : i32
    %c0_i32_1 = arith.constant 0 : i32
    return %c0_i32, %c0_i32_0 : i32, i32
  }
  func.func @transform_10(%arg0: i32) -> (i32, i32) {
    %c0_i32 = arith.constant 0 : i32
    %c0_i32_0 = arith.constant 0 : i32
    %c0_i32_1 = arith.constant 0 : i32
    return %c0_i32, %c0_i32_0 : i32, i32
  }
  func.func @transform_11(%arg0: i32) -> (i32, i32) {
    %c0_i32 = arith.constant 0 : i32
    %c0_i32_0 = arith.constant 0 : i32
    %c0_i32_1 = arith.constant 0 : i32
    return %c0_i32, %c0_i32_0 : i32, i32
  }
  func.func @transform_12(%arg0: i32) -> (i32, i32) {
    %c0_i32 = arith.constant 0 : i32
    %c0_i32_0 = arith.constant 0 : i32
    %c0_i32_1 = arith.constant 0 : i32
    return %c0_i32, %c0_i32_0 : i32, i32
  }
  func.func @transform_13(%arg0: i32) -> (i32, i32, i32) {
    %c0_i32 = arith.constant 0 : i32
    %c0_i32_0 = arith.constant 0 : i32
    %c0_i32_1 = arith.constant 0 : i32
    return %arg0, %c0_i32, %c0_i32_0 : i32, i32, i32
  }
}

</mosaic_0001>

<bundles_post_ra>
// kernel: lenet_forward.1
= control target key start
LH: loop header
LB: loop body
LE: loop exit
PB: predicated region body
PF: predicated region fallthrough
CT: control target
= control target key end

     0   :  { %s8401_s25 = smov 0   ;;  %s10130_s0 = inlined_call_operand.vmem [shape: f32[2,32,32], index: 0, kind: input, shape index: {}]   ;;  %s10131_s1 = inlined_call_operand.vmem [shape: f32[2,3,90,32], index: 1, kind: input, shape index: {}]   ;;  %s10132_s2 = inlined_call_operand.vmem [shape: f32[90,1], index: 2, kind: input, shape index: {}]   ;;  %s10133_s3 = inlined_call_operand.vmem [shape: f32[2,30,15], index: 3, kind: input, shape index: {}]   ;;  %s10134_s4 = inlined_call_operand.vmem [shape: f32[2,3,96,90], index: 4, kind: input, shape index: {}]   ;;  %s10135_s5 = inlined_call_operand.vmem [shape: f32[96,1], index: 5, kind: input, shape index: {}]   ;;  %s10136_s6 = inlined_call_operand.vmem [shape: f32[2,12,6], index: 6, kind: input, shape index: {}]   ;;  %s10137_s7 = inlined_call_operand.vmem [shape: f32[6,120,96], index: 7, kind: input, shape index: {}]   ;;  %s10138_s8 = inlined_call_operand.vmem [shape: f32[120,1], index: 8, kind: input, shape index: {}]   ;;  %s10139_s9 = inlined_call_operand.vmem [shape: f32[84,120], index: 9, kind: input, shape index: {}]   ;;  %s10140_s10 = inlined_call_operand.vmem [shape: f32[84,1], index: 10, kind: input, shape index: {}]   ;;  %s10141_s11 = inlined_call_operand.vmem [shape: f32[10,84], index: 11, kind: input, shape index: {}]   ;;  %s10142_s12 = inlined_call_operand.vmem [shape: f32[10,1], index: 12, kind: input, shape index: {}]   ;;  %s10143_s13 = inlined_call_operand.vmem [shape: f32[2,10,1], index: 13, kind: output, shape index: {}]  }
   0x1 LB: > { %s5393_s26 = sadd.s32 4294967295, %s8319_s25   ;;  %p5397_p0 = scmp.ge.s32.totalorder %s8319_s25, 1  ;;  %s8319_s25 = sphi %s8401_s25, %s23_s25  }
   0x2   : > { %p387_p1 = scmp.lt.s32.totalorder %s8319_s25, 3 }
   0x4   : > { %p388_p2 = pnand %p5397_p0, %p387_p1 }
   0x5   : > { %p431_p3 = scmp.lt.s32.totalorder (!%p388_p2), %s5393_s26, 1  ;;  %v5414_v0 = vld [vmem:[%s10131_s1 + $0x60] sm:$0xff] (!%p388_p2)  ;;  %vm499_vm0 = vcmask (!%p388_p2), 261120   ;;  %s8321_s18 = smov (!%p388_p2), 127   ;;  %v1554_v10 = vld [vmem:[%s10132_s2 + $0x8] sm:$0xff] (!%p388_p2)  ;;  %v8323_v12 = vmov (!%p388_p2), 0  }
   0x6   : > { %391 = sbr.rel (%p388_p2) target bundleno = 2296 (0x8f8), region = 72  ;;  %v5450_v1 = vld [vmem:[%s10131_s1 + $0x180] sm:$0xff] (!%p388_p2)  ;;  %6422 = vmatprep.mubr.msk.f32.mxu0 (!%p388_p2), %vm499_vm0, %v5414_v0  ;;  %s8322_s19 = smov (!%p388_p2), 126   ;;  %8102 = vset.pattern.permute.xlu1 (!%p388_p2), %v8323_v12  ;;  %v1555_v13 = vld [vmem:[%s10132_s2 + $0x10] sm:$0xff] (!%p388_p2)  ;;  %v1556_v14 = vld [vmem:[%s10132_s2 + $0x18] sm:$0xff] (!%p388_p2)  ;;  %vm1690_vm1 = vcmask (!%p388_p2), 1045504  }
   0x7   : > { %6474 = vmatprep.mubr.msk.f32.mxu1 (!%p388_p2), %vm499_vm0, %v5450_v1  ;;  %v1553_v11 = vld [vmem:[%s10132_s2] sm:$0xff] (!%p388_p2)  ;;  %8101 = vset.pattern.permute.xlu0 (!%p388_p2), %v8323_v12  ;;  %v1558_v16 = vld [vmem:[%s10132_s2 + $0x28] sm:$0xff] (!%p388_p2)  ;;  %v1559_v17 = vld [vmem:[%s10132_s2 + $0x30] sm:$0xff] (!%p388_p2)  ;;  %vm8324_vm2 = vmmov (!%p388_p2), 1   ;;  %vm1653_vm4 = vcmask (!%p388_p2), 244736   ;;  %vm2049_vm5 = vcmask (!%p388_p2), 736256  }
   0x8   : > { %v1557_v15 = vld [vmem:[%s10132_s2 + $0x20] sm:$0xff] (!%p388_p2)  ;;  %v1560_v18 = vld [vmem:[%s10132_s2 + $0x38] sm:$0xff] (!%p388_p2)  ;;  %v1562_v20 = vld [vmem:[%s10132_s2 + $0x48] sm:$0xff] (!%p388_p2)  ;;  %vm2086_vm6 = vcmask (!%p388_p2), 1041408   ;;  %vm3268_vm8 = vcmask (!%p388_p2), 1043456   ;;  %vm3231_vm10 = vcmask (!%p388_p2), 97280  }
   0x9   : > { %v1561_v19 = vld [vmem:[%s10132_s2 + $0x40] sm:$0xff] (!%p388_p2)  ;;  %v1563_v21 = vld [vmem:[%s10132_s2 + $0x50] sm:$0xff] (!%p388_p2)  ;;  %v1564_v22 = vld [vmem:[%s10132_s2 + $0x58] sm:$0x3] (!%p388_p2)  ;;  %vm8326_vm11 = vmmov (!%p388_p2), 0   ;;  %vm3570_vm12 = vcmask (!%p388_p2), 785408  }
   0xa   : > { %v5415_v32 = vld [vmem:[%s10131_s1 + $0x68] sm:$0xff] (!%p388_p2)  ;;  %v5416_v34 = vld [vmem:[%s10131_s1 + $0x70] sm:$0xff] (!%p388_p2)  ;;  %v5417_v38 = vld [vmem:[%s10131_s1 + $0x78] sm:$0xff] (!%p388_p2)  ;;  %s8329_s16 = smov (!%p388_p2), 124   ;;  %s8330_s15 = smov (!%p388_p2), 123   ;;  %vm5080_vm13 = vcmask (!%p388_p2), 982016  }
   0xb   : > { %v5451_v33 = vld [vmem:[%s10131_s1 + $0x188] sm:$0xff] (!%p388_p2)  ;;  %v5452_v35 = vld [vmem:[%s10131_s1 + $0x190] sm:$0xff] (!%p388_p2)  ;;  %v5453_v39 = vld [vmem:[%s10131_s1 + $0x198] sm:$0xff] (!%p388_p2)  ;;  %vm5249_vm14 = vcmask (!%p388_p2), 687104   ;;  %vm5336_vm15 = vcmask (!%p388_p2), 1024  }
   0xc   : > { %v5418_v40 = vld [vmem:[%s10131_s1 + $0x80] sm:$0xff] (!%p388_p2)  ;;  %v5419_v43 = vld [vmem:[%s10131_s1 + $0x88] sm:$0xff] (!%p388_p2)  ;;  %v5420_v45 = vld [vmem:[%s10131_s1 + $0x90] sm:$0xff] (!%p388_p2) }
   0xd   : > { %s10149_s26 = smov (!%p431_p3, %s5393_s26), 1  ;;  %v5454_v41 = vld [vmem:[%s10131_s1 + $0x1a0] sm:$0xff]  ;;  %v5455_v44 = vld [vmem:[%s10131_s1 + $0x1a8] sm:$0xff]  ;;  %v5456_v46 = vld [vmem:[%s10131_s1 + $0x1b0] sm:$0xff] }
   0xe   : > { %s5911_s27 = sshll.u32 %s10149_s26, 5  ;;  %v5421_v47 = vld [vmem:[%s10131_s1 + $0x98] sm:$0xff]  ;;  %v5422_v49 = vld [vmem:[%s10131_s1 + $0xa0] sm:$0xff]  ;;  %v5423_v51 = vld [vmem:[%s10131_s1 + $0xa8] sm:$0xff] }
   0xf   : > { %s435_s30 = scalar_lea.vmem %s10130_s0, %s5911_s27  ;;  %v5457_v48 = vld [vmem:[%s10131_s1 + $0x1b8] sm:$0xff]  ;;  %v5458_v50 = vld [vmem:[%s10131_s1 + $0x1c0] sm:$0xff]  ;;  %v5459_v52 = vld [vmem:[%s10131_s1 + $0x1c8] sm:$0xff]  ;;  %s8328_s27 = smov 125  }
  0x10   : > { %v441_v2 = vld [vmem:[%s435_s30] sm:$0xff]  ;;  %v442_v3 = vld [vmem:[%s435_s30 + $0x8] sm:$0xff]  ;;  %v443_v4 = vld [vmem:[%s435_s30 + $0x10] sm:$0xff] }
  0x11   : > { %v8081_v5 = vpack.i.bf16 %v442_v3, %v441_v2  ;;  %v8423_v6 = vpack.c.bf16 %v442_v3, %v441_v2  ;;  %v444_v7 = vld [vmem:[%s435_s30 + $0x18] sm:$0xff]  ;;  %v5424_v53 = vld [vmem:[%s10131_s1 + $0xb0] sm:$0xff]  ;;  %v445_v58 = vld [vmem:[%s10131_s1] sm:$0xff] }
  0x12   : > { %v8086_v8 = vpack.i.bf16 %v444_v7, %v443_v4  ;;  %v8429_v9 = vpack.c.bf16 %v444_v7, %v443_v4  ;;  %v5460_v54 = vld [vmem:[%s10131_s1 + $0x1d0] sm:$0xff]  ;;  %v5425_v56 = vld [vmem:[%s10131_s1 + $0xb8] sm:$0x3]  ;;  %v5402_v59 = vld [vmem:[%s10131_s1 + $0x120] sm:$0xff] }
  0x13   : > { %8082 = vrot.lane.b32.xlu0 %v8081_v5, %s8321_s18  ;;  %8092 = vrot.lane.b32.xlu1 %v8081_v5, %s8322_s19  ;;  %v5461_v57 = vld [vmem:[%s10131_s1 + $0x1d8] sm:$0x3]  ;;  %v446_v62 = vld [vmem:[%s10131_s1 + $0x8] sm:$0xff]  ;;  %vm7473_vm3 = vmpackc.low %vm1690_vm1, %vm8324_vm2 }
  0x14   : > { %v5403_v63 = vld [vmem:[%s10131_s1 + $0x128] sm:$0xff]  ;;  %v447_v0 = vld [vmem:[%s10131_s1 + $0x10] sm:$0xff]  ;;  %v1649_v3 = vld [vmem:[%s10133_s3] sm:$0xff] }
  0x15   : > { %v5404_v1 = vld [vmem:[%s10131_s1 + $0x130] sm:$0xff]  ;;  %v1650_v4 = vld [vmem:[%s10133_s3 + $0x8] sm:$0xff]  ;;  %v5547_v5 = vld [vmem:[%s10133_s3 + $0x20] sm:$0xff] }
  0x16   : > { %v448_v7 = vld [vmem:[%s10131_s1 + $0x18] sm:$0xff]  ;;  %vm8873_vm7 = vmpackc.low %vm2086_vm6, %vm8324_vm2 }
  0x17   : > { %8087 = vrot.lane.b32.xlu0 %v8086_v8, %s8321_s18  ;;  %8097 = vrot.lane.b32.xlu1 %v8086_v8, %s8322_s19  ;;  %v5405_v8 = vld [vmem:[%s10131_s1 + $0x138] sm:$0xff]  ;;  %vm9125_vm9 = vmpackc.low %vm3268_vm8, %vm8324_vm2 }
  0x1b   : > { %1572 = vperm.xlu1 %8102, %v1554_v10   ;;  %1567 = vperm.xlu0 %8101, %v1553_v11   ;;  %v5406_v10 = vld [vmem:[%s10131_s1 + $0x140] sm:$0xff]  ;;  %v7468_v11 = vpack.c.bf16 %v1650_v4, %v1649_v3 }
  0x1f   : > { %1577 = vperm.xlu1 %8102, %v1555_v13   ;;  %1582 = vperm.xlu0 %8101, %v1556_v14   ;;  %v450_v13 = vld [vmem:[%s10131_s1 + $0x28] sm:$0xff] }
  0x20   : > { %v5407_v14 = vld [vmem:[%s10131_s1 + $0x148] sm:$0xff] }
  0x23   : > { %1587 = vperm.xlu1 %8102, %v1557_v15   ;;  %1592 = vperm.xlu0 %8101, %v1558_v16   ;;  %v451_v15 = vld [vmem:[%s10131_s1 + $0x30] sm:$0xff] }
  0x24   : > { %v5408_v16 = vld [vmem:[%s10131_s1 + $0x150] sm:$0xff] }
  0x27   : > { %1597 = vperm.xlu1 %8102, %v1559_v17   ;;  %1602 = vperm.xlu0 %8101, %v1560_v18   ;;  %v452_v17 = vld [vmem:[%s10131_s1 + $0x38] sm:$0xff] }
  0x28   : > { %v5409_v18 = vld [vmem:[%s10131_s1 + $0x158] sm:$0xff] }
  0x2b   : > { %1607 = vperm.xlu1 %8102, %v1561_v19   ;;  %1612 = vperm.xlu0 %8101, %v1562_v20   ;;  %v453_v19 = vld [vmem:[%s10131_s1 + $0x40] sm:$0xff] }
  0x2c   : > { %v5410_v20 = vld [vmem:[%s10131_s1 + $0x160] sm:$0xff] }
  0x2f   : > { %1617 = vperm.xlu1 %8102, %v1563_v21   ;;  %1622 = vperm.xlu0 %8101, %v1564_v22   ;;  %v454_v21 = vld [vmem:[%s10131_s1 + $0x48] sm:$0xff] }
  0x30   : > { %v5411_v22 = vld [vmem:[%s10131_s1 + $0x168] sm:$0xff] }
  0x85   : > { %v8083_v23 = vpop.permute.xlu0 %8082  ;;  %v8093_v31 = vpop.permute.xlu1 %8092 }
  0x86   : > { %v8085_v24 = vunpack.i.h.bf16 %v8083_v23  ;;  %v8084_v25 = vunpack.i.l.bf16 %v8083_v23  ;;  %v8095_v36 = vunpack.i.h.bf16 %v8093_v31  ;;  %v8094_v37 = vunpack.i.l.bf16 %v8093_v31  ;;  %v455_v23 = vld [vmem:[%s10131_s1 + $0x50] sm:$0xff] }
  0x87   : > { %v5488_v31 = vld [vmem:[%s10131_s1 + $0xd0] sm:$0xff] }
  0x88   : > { %v7420_v26 = vpack.c.bf16 %v8085_v24, %v8084_v25  ;;  %v7452_v42 = vpack.c.bf16 %v8095_v36, %v8094_v37  ;;  %v5412_v24 = vld [vmem:[%s10131_s1 + $0x170] sm:$0xff]  ;;  %v456_v25 = vld [vmem:[%s10131_s1 + $0x58] sm:$0x3]  ;;  %v5514_v36 = vld [vmem:[%s10131_s1 + $0x200] sm:$0xff] }
  0x89   : > { %v8088_v27 = vpop.permute.xlu0 %8087  ;;  %v8098_v55 = vpop.permute.xlu1 %8097  ;;  %v5491_v37 = vld [vmem:[%s10131_s1 + $0xe8] sm:$0xff] }
  0x8a   : > { %v8090_v28 = vunpack.i.h.bf16 %v8088_v27  ;;  %v8089_v29 = vunpack.i.l.bf16 %v8088_v27  ;;  %7421 = vmatprep.subr.bf16.mxu0 %v7420_v26  ;;  %7437 = vmatprep.subr.bf16.mxu1 %v7420_v26  ;;  %v8100_v60 = vunpack.i.h.bf16 %v8098_v55  ;;  %v8099_v61 = vunpack.i.l.bf16 %v8098_v55  ;;  %v5486_v27 = vld [vmem:[%s10131_s1 + $0xc0] sm:$0xff]  ;;  %v5550_v55 = vld [vmem:[%s10133_s3 + $0x38] sm:$0x3f] }
  0x8b   : > { %7423 = vmatpush3.bf16.msra.mxu0 %v7420_v26  ;;  %7439 = vmatpush3.bf16.msra.mxu1 %v7420_v26  ;;  %v5413_v26 = vld [vmem:[%s10131_s1 + $0x178] sm:$0x3] }
  0x8c   : > { %v7424_v30 = vpack.c.bf16 %v8090_v28, %v8089_v29  ;;  %v7456_v2 = vpack.c.bf16 %v8100_v60, %v8099_v61  ;;  %v5510_v28 = vld [vmem:[%s10131_s1 + $0x1e0] sm:$0xff]  ;;  %v5487_v29 = vld [vmem:[%s10131_s1 + $0xc8] sm:$0xff] }
  0x8e   : > { %7425 = vmatprep.subr.bf16.mxu0 %v7424_v30  ;;  %7441 = vmatprep.subr.bf16.mxu1 %v7424_v30 }
  0x8f   : > { %7427 = vmatpush3.bf16.msra.mxu0 %v7424_v30  ;;  %7443 = vmatpush3.bf16.msra.mxu1 %v7424_v30  ;;  %v5511_v30 = vld [vmem:[%s10131_s1 + $0x1e8] sm:$0xff] }
  0x90   : > { %7429 = vmatprep.subr.bf16.mxu0 %v8423_v6  ;;  %7445 = vmatprep.subr.bf16.mxu1 %v8423_v6 }
  0x92   : > { %6423 = vmatmul.mubr.msk.f32.vlgmr.msra.gmra.mrb[0].mxu0 %vm499_vm0, %v5415_v32  ;;  %6475 = vmatmul.mubr.msk.f32.vlgmr.msra.gmra.mrb[0].mxu1 %vm499_vm0, %v5451_v33  ;;  %v5512_v32 = vld [vmem:[%s10131_s1 + $0x1f0] sm:$0xff]  ;;  %v5489_v33 = vld [vmem:[%s10131_s1 + $0xd8] sm:$0xff] }
  0x93   : > { %6425 = vmatprep.mubr.msk.f32.mxu0 %vm499_vm0, %v5416_v34  ;;  %6477 = vmatprep.mubr.msk.f32.mxu1 %vm499_vm0, %v5452_v35  ;;  %v5513_v34 = vld [vmem:[%s10131_s1 + $0x1f8] sm:$0xff]  ;;  %v5490_v35 = vld [vmem:[%s10131_s1 + $0xe0] sm:$0xff] }
  0x94   : > { %7431 = vmatpush3.bf16.msra.mxu0 %v8423_v6  ;;  %7447 = vmatpush3.bf16.msra.mxu1 %v8423_v6  ;;  %v5548_v6 = vld [vmem:[%s10133_s3 + $0x28] sm:$0xff] }
  0x95   : > { %7433 = vmatprep.subr.bf16.mxu0 %v8429_v9  ;;  %7449 = vmatprep.subr.bf16.mxu1 %v8429_v9  ;;  %v7478_v12 = vpack.c.bf16 %v5548_v6, %v5547_v5 }
  0x96   : > { %6426 = vmatmul.mubr.msk.f32.gmra.mrb[2].mxu0 %vm499_vm0, %v5417_v38  ;;  %6478 = vmatmul.mubr.msk.f32.gmra.mrb[2].mxu1 %vm499_vm0, %v5453_v39  ;;  %v5515_v38 = vld [vmem:[%s10131_s1 + $0x208] sm:$0xff]  ;;  %v5492_v39 = vld [vmem:[%s10131_s1 + $0xf0] sm:$0xff] }
  0x97   : > { %6428 = vmatprep.mubr.msk.f32.mxu0 %vm499_vm0, %v5418_v40  ;;  %6480 = vmatprep.mubr.msk.f32.mxu1 %vm499_vm0, %v5454_v41  ;;  %v5516_v40 = vld [vmem:[%s10131_s1 + $0x210] sm:$0xff]  ;;  %v5493_v41 = vld [vmem:[%s10131_s1 + $0xf8] sm:$0xff] }
  0x98   : > { %7435 = vmatpush3.bf16.msra.mxu0 %v8429_v9  ;;  %7451 = vmatpush3.bf16.msra.mxu1 %v8429_v9  ;;  %v449_v9 = vld [vmem:[%s10131_s1 + $0x20] sm:$0xff] }
  0x99   : > { %7453 = vmatprep.subr.bf16.mxu0 %v7452_v42  ;;  %7461 = vmatprep.subr.bf16.mxu1 %v7452_v42 }
  0x9a   : > { %6429 = vmatmul.mubr.msk.f32.gmra.mrb[4].mxu0 %vm499_vm0, %v5419_v43  ;;  %6481 = vmatmul.mubr.msk.f32.gmra.mrb[4].mxu1 %vm499_vm0, %v5455_v44  ;;  %v5494_v43 = vld [vmem:[%s10131_s1 + $0x100] sm:$0xff] }
  0x9b   : > { %6431 = vmatprep.mubr.msk.f32.mxu0 %vm499_vm0, %v5420_v45  ;;  %6483 = vmatprep.mubr.msk.f32.mxu1 %vm499_vm0, %v5456_v46  ;;  %v5518_v44 = vld [vmem:[%s10131_s1 + $0x220] sm:$0xff]  ;;  %v5495_v45 = vld [vmem:[%s10131_s1 + $0x108] sm:$0xff] }
  0x9c   : > { %v5519_v46 = vld [vmem:[%s10131_s1 + $0x228] sm:$0xff] }
  0x9e   : > { %6432 = vmatmul.mubr.msk.f32.gmra.mrb[6].mxu0 %vm499_vm0, %v5421_v47  ;;  %6484 = vmatmul.mubr.msk.f32.gmra.mrb[6].mxu1 %vm499_vm0, %v5457_v48  ;;  %v5496_v47 = vld [vmem:[%s10131_s1 + $0x110] sm:$0xff] }
  0x9f   : > { %6434 = vmatprep.mubr.msk.f32.mxu0 %vm499_vm0, %v5422_v49  ;;  %6486 = vmatprep.mubr.msk.f32.mxu1 %vm499_vm0, %v5458_v50  ;;  %v5520_v48 = vld [vmem:[%s10131_s1 + $0x230] sm:$0xff]  ;;  %v5497_v49 = vld [vmem:[%s10131_s1 + $0x118] sm:$0x3] }
  0xa0   : > { %v5521_v50 = vld [vmem:[%s10131_s1 + $0x238] sm:$0x3] }
  0xa2   : > { %6435 = vmatmul.mubr.msk.f32.gmra.mrb[8].mxu0 %vm499_vm0, %v5423_v51  ;;  %6487 = vmatmul.mubr.msk.f32.gmra.mrb[8].mxu1 %vm499_vm0, %v5459_v52  ;;  %v1651_v51 = vld [vmem:[%s10133_s3 + $0x10] sm:$0xff]  ;;  %v1652_v52 = vld [vmem:[%s10133_s3 + $0x18] sm:$0x3f] }
  0xa3   : > { %6437 = vmatprep.mubr.msk.f32.mxu0 %vm499_vm0, %v5424_v53  ;;  %6489 = vmatprep.mubr.msk.f32.mxu1 %vm499_vm0, %v5460_v54  ;;  %v5549_v53 = vld [vmem:[%s10133_s3 + $0x30] sm:$0xff]  ;;  %v7472_v54 = vpack.c.bf16 %v1652_v52, %v1651_v51 }
  0xa6   : > { %6438 = vmatmul.mubr.msk.f32.gmra.mrb[10].mxu0 %vm499_vm0, %v5425_v56  ;;  %6490 = vmatmul.mubr.msk.f32.gmra.mrb[10].mxu1 %vm499_vm0, %v5461_v57  ;;  %v7482_v56 = vpack.c.bf16 %v5550_v55, %v5549_v53  ;;  %v1573_v57 = vpop.permute.xlu1 %1572 }
  0xa7   : > { %6448 = vmatprep.mubr.msk.f32.mxu0 %vm499_vm0, %v445_v58  ;;  %6500 = vmatprep.mubr.msk.f32.mxu1 %vm499_vm0, %v5402_v59  ;;  %v1568_v58 = vpop.permute.xlu0 %1567 }
  0xaa   : > { %6449 = vmatmul.mubr.msk.f32.vlgmr.msra.gmra.mrb[0].mxu0 %vm499_vm0, %v446_v62  ;;  %6501 = vmatmul.mubr.msk.f32.vlgmr.msra.gmra.mrb[0].mxu1 %vm499_vm0, %v5403_v63  ;;  %v1578_v59 = vpop.permute.xlu1 %1577 }
  0xab   : > { %6451 = vmatprep.mubr.msk.f32.mxu0 %vm499_vm0, %v447_v0  ;;  %6503 = vmatprep.mubr.msk.f32.mxu1 %vm499_vm0, %v5404_v1  ;;  %v1583_v60 = vpop.permute.xlu0 %1582 }
  0xac   : > { %7455 = vmatpush3.bf16.msra.mxu0 %v7452_v42  ;;  %7463 = vmatpush3.bf16.msra.mxu1 %v7452_v42  ;;  %v5517_v42 = vld [vmem:[%s10131_s1 + $0x218] sm:$0xff] }
  0xad   : > { %7457 = vmatprep.subr.bf16.mxu0 %v7456_v2  ;;  %7465 = vmatprep.subr.bf16.mxu1 %v7456_v2 }
  0xae   : > { %6452 = vmatmul.mubr.msk.f32.gmra.mrb[2].mxu0 %vm499_vm0, %v448_v7  ;;  %6504 = vmatmul.mubr.msk.f32.gmra.mrb[2].mxu1 %vm499_vm0, %v5405_v8  ;;  %v1588_v61 = vpop.permute.xlu1 %1587 }
  0xaf   : > { %6454 = vmatprep.mubr.msk.f32.mxu0 %vm499_vm0, %v449_v9  ;;  %6506 = vmatprep.mubr.msk.f32.mxu1 %vm499_vm0, %v5406_v10  ;;  %v1593_v62 = vpop.permute.xlu0 %1592 }
  0xb0   : > { %7459 = vmatpush3.bf16.msra.mxu0 %v7456_v2  ;;  %7467 = vmatpush3.bf16.msra.mxu1 %v7456_v2 }
  0xb1   : > { %7469 = vmatprep.subr.bf16.mxu0 %v7468_v11  ;;  %7479 = vmatprep.subr.bf16.mxu1 %v7478_v12 }
  0xb2   : > { %6455 = vmatmul.mubr.msk.f32.gmra.mrb[4].mxu0 %vm499_vm0, %v450_v13  ;;  %6507 = vmatmul.mubr.msk.f32.gmra.mrb[4].mxu1 %vm499_vm0, %v5407_v14  ;;  %v1598_v14 = vpop.permute.xlu1 %1597 }
  0xb3   : > { %6457 = vmatprep.mubr.msk.f32.mxu0 %vm499_vm0, %v451_v15  ;;  %6509 = vmatprep.mubr.msk.f32.mxu1 %vm499_vm0, %v5408_v16  ;;  %v1603_v15 = vpop.permute.xlu0 %1602 }
  0xb6   : > { %6458 = vmatmul.mubr.msk.f32.gmra.mrb[6].mxu0 %vm499_vm0, %v452_v17  ;;  %6510 = vmatmul.mubr.msk.f32.gmra.mrb[6].mxu1 %vm499_vm0, %v5409_v18 }
  0xb7   : > { %6460 = vmatprep.mubr.msk.f32.mxu0 %vm499_vm0, %v453_v19  ;;  %6512 = vmatprep.mubr.msk.f32.mxu1 %vm499_vm0, %v5410_v20 }
  0xba   : > { %6461 = vmatmul.mubr.msk.f32.gmra.mrb[8].mxu0 %vm499_vm0, %v454_v21  ;;  %6513 = vmatmul.mubr.msk.f32.gmra.mrb[8].mxu1 %vm499_vm0, %v5411_v22 }
  0xbb   : > { %6463 = vmatprep.mubr.msk.f32.mxu0 %vm499_vm0, %v455_v23  ;;  %6515 = vmatprep.mubr.msk.f32.mxu1 %vm499_vm0, %v5412_v24 }
  0xbe   : > { %6464 = vmatmul.mubr.msk.f32.gmra.mrb[10].mxu0 %vm499_vm0, %v456_v25  ;;  %6516 = vmatmul.mubr.msk.f32.gmra.mrb[10].mxu1 %vm499_vm0, %v5413_v26 }
  0xbf   : > { %6526 = vmatprep.mubr.msk.f32.mxu0 %vm499_vm0, %v5486_v27  ;;  %6552 = vmatprep.mubr.msk.f32.mxu1 %vm499_vm0, %v5510_v28 }
  0xc2   : > { %6527 = vmatmul.mubr.msk.f32.vlgmr.msra.gmra.mrb[0].mxu0 %vm499_vm0, %v5487_v29  ;;  %6553 = vmatmul.mubr.msk.f32.vlgmr.msra.gmra.mrb[0].mxu1 %vm499_vm0, %v5511_v30 }
  0xc3   : > { %6529 = vmatprep.mubr.msk.f32.mxu0 %vm499_vm0, %v5488_v31  ;;  %6555 = vmatprep.mubr.msk.f32.mxu1 %vm499_vm0, %v5512_v32 }
  0xc4   : > { %7471 = vmatpush3.bf16.msra.mxu0 %v7468_v11  ;;  %7481 = vmatpush3.bf16.msra.mxu1 %v7478_v12 }
  0xc5   : > { %7474 = vmatprep.subr.msk.bf16.mxu0 %vm7473_vm3, %v7472_v54  ;;  %7484 = vmatprep.subr.msk.bf16.mxu1 %vm7473_vm3, %v7482_v56 }
  0xc6   : > { %6530 = vmatmul.mubr.msk.f32.gmra.mrb[2].mxu0 %vm499_vm0, %v5489_v33  ;;  %6556 = vmatmul.mubr.msk.f32.gmra.mrb[2].mxu1 %vm499_vm0, %v5513_v34 }
  0xc7   : > { %6532 = vmatprep.mubr.msk.f32.mxu0 %vm499_vm0, %v5490_v35  ;;  %6558 = vmatprep.mubr.msk.f32.mxu1 %vm499_vm0, %v5514_v36  ;;  %v1608_v36 = vpop.permute.xlu1 %1607 }
  0xc8   : > { %7477 = vmatpush3.bf16.msk.msra.mxu0 %vm7473_vm3, %v7472_v54  ;;  %7487 = vmatpush3.bf16.msk.msra.mxu1 %vm7473_vm3, %v7482_v56 }
  0xca   : > { %6533 = vmatmul.mubr.msk.f32.gmra.mrb[4].mxu0 %vm499_vm0, %v5491_v37  ;;  %6559 = vmatmul.mubr.msk.f32.gmra.mrb[4].mxu1 %vm499_vm0, %v5515_v38  ;;  %v1613_v37 = vpop.permute.xlu0 %1612 }
  0xcb   : > { %6535 = vmatprep.mubr.msk.f32.mxu0 %vm499_vm0, %v5492_v39  ;;  %6561 = vmatprep.mubr.msk.f32.mxu1 %vm499_vm0, %v5516_v40 }
  0xce   : > { %6536 = vmatmul.mubr.msk.f32.gmra.mrb[6].mxu0 %vm499_vm0, %v5493_v41  ;;  %6562 = vmatmul.mubr.msk.f32.gmra.mrb[6].mxu1 %vm499_vm0, %v5517_v42  ;;  %v1623_v56 = vpop.permute.xlu0 %1622 }
  0xcf   : > { %6538 = vmatprep.mubr.msk.f32.mxu0 %vm499_vm0, %v5494_v43  ;;  %6564 = vmatprep.mubr.msk.f32.mxu1 %vm499_vm0, %v5518_v44 }
  0xd2   : > { %6539 = vmatmul.mubr.msk.f32.gmra.mrb[8].mxu0 %vm499_vm0, %v5495_v45  ;;  %6565 = vmatmul.mubr.msk.f32.gmra.mrb[8].mxu1 %vm499_vm0, %v5519_v46 }
  0xd3   : > { %6541 = vmatprep.mubr.msk.f32.mxu0 %vm499_vm0, %v5496_v47  ;;  %6567 = vmatprep.mubr.msk.f32.mxu1 %vm499_vm0, %v5520_v48 }
  0xd6   : > { %6542 = vmatmul.mubr.msk.f32.gmra.mrb[10].mxu0 %vm499_vm0, %v5497_v49  ;;  %6568 = vmatmul.mubr.msk.f32.gmra.mrb[10].mxu1 %vm499_vm0, %v5521_v50  ;;  %vm5334_vm0 = vcmask 7168  }
 0x195   : > { %v6528_v63 = vpop.f32.mrb[0].mxu0  ;;  %v6554_v0 = vpop.f32.mrb[0].mxu1 }
 0x196   : > { %v1542_v1 = vmax.f32 %v6528_v63, %v6554_v0  ;;  %v1284_v2 = vpop.f32.mrb[1].mxu0  ;;  %v1470_v3 = vpop.f32.mrb[1].mxu1 }
 0x197   : > { %v1541_v4 = vmax.f32 %v1284_v2, %v1470_v3 }
 0x198   : > { %v1626_v5 = vadd.f32 %v1573_v57, %v1542_v1 }
 0x199   : > { %v1625_v6 = vadd.f32 %v1568_v58, %v1541_v4  ;;  %v6531_v7 = vpop.f32.mrb[2].mxu0  ;;  %v6557_v8 = vpop.f32.mrb[2].mxu1 }
 0x19a   : > { %v1544_v9 = vmax.f32 %v6531_v7, %v6557_v8  ;;  %v1294_v10 = vpop.f32.mrb[3].mxu0  ;;  %v1480_v11 = vpop.f32.mrb[3].mxu1  ;;  %v1638_v16 = vmax.f32 %v1626_v5, 0.0 }
 0x19b   : > { %v1637_v12 = vmax.f32 %v1625_v6, 0.0  ;;  %v1543_v13 = vmax.f32 %v1294_v10, %v1480_v11 }
 0x19c   : > { %v1628_v17 = vadd.f32 %v1583_v60, %v1544_v9 }
 0x19d   : > { %v1627_v18 = vadd.f32 %v1578_v59, %v1543_v13  ;;  %v6534_v19 = vpop.f32.mrb[4].mxu0  ;;  %v6560_v20 = vpop.f32.mrb[4].mxu1  ;;  %6578 = vmatprep.mubr.msk.f32.mxu0 %vm1653_vm4, %v1637_v12  ;;  %6604 = vmatprep.mubr.msk.f32.mxu1 %vm1653_vm4, %v1637_v12 }
 0x19e   : > { %v1546_v21 = vmax.f32 %v6534_v19, %v6560_v20  ;;  %v1304_v22 = vpop.f32.mrb[5].mxu0  ;;  %v1490_v23 = vpop.f32.mrb[5].mxu1  ;;  %6579 = vmatmul.mubr.msk.f32.vlgmr.msra.gmra.mrb[12].mxu0 %vm1653_vm4, %v1638_v16  ;;  %6605 = vmatmul.mubr.msk.f32.vlgmr.msra.gmra.mrb[12].mxu1 %vm1653_vm4, %v1638_v16  ;;  %v1640_v26 = vmax.f32 %v1628_v17, 0.0 }
 0x19f   : > { %v1639_v24 = vmax.f32 %v1627_v18, 0.0  ;;  %v1545_v25 = vmax.f32 %v1304_v22, %v1490_v23  ;;  %v1618_v59 = vpop.permute.xlu1 %1617 }
 0x1a0   : > { %v1630_v27 = vadd.f32 %v1593_v62, %v1546_v21 }
 0x1a1   : > { %v1629_v28 = vadd.f32 %v1588_v61, %v1545_v25  ;;  %v6537_v29 = vpop.f32.mrb[6].mxu0  ;;  %v6563_v30 = vpop.f32.mrb[6].mxu1  ;;  %6581 = vmatprep.mubr.msk.f32.mxu0 %vm1653_vm4, %v1639_v24  ;;  %6607 = vmatprep.mubr.msk.f32.mxu1 %vm1653_vm4, %v1639_v24 }
 0x1a2   : > { %v1548_v31 = vmax.f32 %v6537_v29, %v6563_v30  ;;  %v1314_v32 = vpop.f32.mrb[7].mxu0  ;;  %v1500_v33 = vpop.f32.mrb[7].mxu1  ;;  %6582 = vmatmul.mubr.msk.f32.gmra.mrb[14].mxu0 %vm1653_vm4, %v1640_v26  ;;  %6608 = vmatmul.mubr.msk.f32.gmra.mrb[14].mxu1 %vm1653_vm4, %v1640_v26  ;;  %v1642_v38 = vmax.f32 %v1630_v27, 0.0 }
 0x1a3   : > { %v1641_v34 = vmax.f32 %v1629_v28, 0.0  ;;  %v1547_v35 = vmax.f32 %v1314_v32, %v1500_v33 }
 0x1a4   : > { %v1632_v39 = vadd.f32 %v1603_v15, %v1548_v31 }
 0x1a5   : > { %v1631_v40 = vadd.f32 %v1598_v14, %v1547_v35  ;;  %v6540_v41 = vpop.f32.mrb[8].mxu0  ;;  %v6566_v42 = vpop.f32.mrb[8].mxu1  ;;  %6584 = vmatprep.mubr.msk.f32.mxu0 %vm1653_vm4, %v1641_v34  ;;  %6610 = vmatprep.mubr.msk.f32.mxu1 %vm1653_vm4, %v1641_v34 }
 0x1a6   : > { %v1550_v43 = vmax.f32 %v6540_v41, %v6566_v42  ;;  %v1324_v44 = vpop.f32.mrb[9].mxu0  ;;  %v1510_v45 = vpop.f32.mrb[9].mxu1  ;;  %6585 = vmatmul.mubr.msk.f32.gmra.mrb[16].mxu0 %vm1653_vm4, %v1642_v38  ;;  %6611 = vmatmul.mubr.msk.f32.gmra.mrb[16].mxu1 %vm1653_vm4, %v1642_v38  ;;  %v1644_v48 = vmax.f32 %v1632_v39, 0.0  ;;  %v5576_v39 = vld [vmem:[%s10134_s4 + $0x60] sm:$0xff] }
 0x1a7   : > { %v1643_v46 = vmax.f32 %v1631_v40, 0.0  ;;  %v1549_v47 = vmax.f32 %v1324_v44, %v1510_v45  ;;  %v5614_v40 = vld [vmem:[%s10134_s4 + $0x180] sm:$0xff] }
 0x1a8   : > { %v1634_v49 = vadd.f32 %v1613_v37, %v1550_v43 }
 0x1a9   : > { %v1633_v50 = vadd.f32 %v1608_v36, %v1549_v47  ;;  %v6543_v51 = vpop.f32.mrb[10].mxu0  ;;  %v6569_v52 = vpop.f32.mrb[10].mxu1  ;;  %6587 = vmatprep.mubr.msk.f32.mxu0 %vm1653_vm4, %v1643_v46  ;;  %6613 = vmatprep.mubr.msk.f32.mxu1 %vm1653_vm4, %v1643_v46 }
 0x1aa   : > { %v1552_v53 = vmax.f32 %v6543_v51, %v6569_v52  ;;  %v1334_v54 = vpop.f32.mrb[11].mxu0  ;;  %v1520_v55 = vpop.f32.mrb[11].mxu1  ;;  %6588 = vmatmul.mubr.msk.f32.gmra.mrb[18].mxu0 %vm1653_vm4, %v1644_v48  ;;  %6614 = vmatmul.mubr.msk.f32.gmra.mrb[18].mxu1 %vm1653_vm4, %v1644_v48  ;;  %v1646_v60 = vmax.f32 %v1634_v49, 0.0  ;;  %v3133_v51 = vld [vmem:[%s10135_s5] sm:$0xff]  ;;  %v3135_v52 = vld [vmem:[%s10135_s5 + $0x10] sm:$0xff] }
 0x1ab   : > { %v1645_v57 = vmax.f32 %v1633_v50, 0.0  ;;  %v1551_v58 = vmax.f32 %v1334_v54, %v1520_v55  ;;  %v3137_v54 = vld [vmem:[%s10135_s5 + $0x20] sm:$0xff]  ;;  %v3136_v55 = vld [vmem:[%s10135_s5 + $0x18] sm:$0xff] }
 0x1ac   : > { %v1636_v61 = vadd.f32 %v1623_v56, %v1552_v53  ;;  %v3134_v53 = vld [vmem:[%s10135_s5 + $0x8] sm:$0xff]  ;;  %v3139_v56 = vld [vmem:[%s10135_s5 + $0x30] sm:$0xff] }
 0x1ad   : > { %v1635_v62 = vadd.f32 %v1618_v59, %v1551_v58  ;;  %6590 = vmatprep.mubr.msk.f32.mxu0 %vm1653_vm4, %v1645_v57  ;;  %6616 = vmatprep.mubr.msk.f32.mxu1 %vm1653_vm4, %v1645_v57  ;;  %v3138_v57 = vld [vmem:[%s10135_s5 + $0x28] sm:$0xff]  ;;  %v3141_v58 = vld [vmem:[%s10135_s5 + $0x40] sm:$0xff]  ;;  %v3140_v59 = vld [vmem:[%s10135_s5 + $0x38] sm:$0xff] }
 0x1ae   : > { %6591 = vmatmul.mubr.msk.f32.gmra.mrb[20].mxu0 %vm1653_vm4, %v1646_v60  ;;  %6617 = vmatmul.mubr.msk.f32.gmra.mrb[20].mxu1 %vm1653_vm4, %v1646_v60  ;;  %v1648_v0 = vmax.f32 %v1636_v61, 0.0  ;;  %v3143_v60 = vld [vmem:[%s10135_s5 + $0x50] sm:$0xff]  ;;  %v3142_v61 = vld [vmem:[%s10135_s5 + $0x48] sm:$0xff] }
 0x1af   : > { %v1647_v63 = vmax.f32 %v1635_v62, 0.0  ;;  %v3144_v62 = vld [vmem:[%s10135_s5 + $0x58] sm:$0xff] }
 0x1b1   : > { %6593 = vmatprep.mubr.msk.f32.mxu0 %vm1653_vm4, %v1647_v63  ;;  %6619 = vmatprep.mubr.msk.f32.mxu1 %vm1653_vm4, %v1647_v63 }
 0x1b2   : > { %6594 = vmatmul.mubr.msk.f32.gmra.mrb[22].mxu0 %vm1653_vm4, %v1648_v0  ;;  %6620 = vmatmul.mubr.msk.f32.gmra.mrb[22].mxu1 %vm1653_vm4, %v1648_v0 }
 0x1b3   : > { %6646 = vmatprep.mubr.msk.f32.mxu0 %vm2049_vm5, %v5576_v39  ;;  %6730 = vmatprep.mubr.msk.f32.mxu1 %vm2049_vm5, %v5614_v40  ;;  %v5621_v39 = vld [vmem:[%s10134_s4 + $0x1b8] sm:$0xff]  ;;  %v5622_v40 = vld [vmem:[%s10134_s4 + $0x1c0] sm:$0xff] }
 0x271   : > { %v6580_v1 = vpop.f32.mrb[12].mxu0  ;;  %v6606_v2 = vpop.f32.mrb[12].mxu1 }
 0x272   : > { %v1953_v3 = vmax.f32 %v6580_v1, %v6606_v2  ;;  %v1760_v4 = vpop.f32.mrb[13].mxu0  ;;  %v1893_v5 = vpop.f32.mrb[13].mxu1 }
 0x273   : > { %v1952_v6 = vmax.f32 %v1760_v4, %v1893_v5 }
 0x275   : > { %v8804_v7 = vpack.c.bf16 %v1953_v3, %v1952_v6  ;;  %v6583_v8 = vpop.f32.mrb[14].mxu0  ;;  %v6609_v9 = vpop.f32.mrb[14].mxu1  ;;  %v8103_v10 = vpack.i.bf16 %v1953_v3, %v1952_v6 }
 0x276   : > { %v1955_v11 = vmax.f32 %v6583_v8, %v6609_v9  ;;  %v1770_v12 = vpop.f32.mrb[15].mxu0  ;;  %v1903_v13 = vpop.f32.mrb[15].mxu1 }
 0x277   : > { %v1954_v14 = vmax.f32 %v1770_v12, %v1903_v13  ;;  %8104 = vrot.lane.b32.xlu1 %v8103_v10, %s8321_s18 }
 0x279   : > { %v8807_v15 = vpack.c.bf16 %v1955_v11, %v1954_v14  ;;  %v6586_v16 = vpop.f32.mrb[16].mxu0  ;;  %v6612_v17 = vpop.f32.mrb[16].mxu1  ;;  %v8108_v18 = vpack.i.bf16 %v1955_v11, %v1954_v14 }
 0x27a   : > { %v1957_v19 = vmax.f32 %v6586_v16, %v6612_v17  ;;  %v1780_v20 = vpop.f32.mrb[17].mxu0  ;;  %v1913_v21 = vpop.f32.mrb[17].mxu1 }
 0x27b   : > { %v1956_v22 = vmax.f32 %v1780_v20, %v1913_v21  ;;  %8109 = vrot.lane.b32.xlu0 %v8108_v18, %s8321_s18 }
 0x27d   : > { %v8810_v23 = vpack.c.bf16 %v1957_v19, %v1956_v22  ;;  %v6589_v24 = vpop.f32.mrb[18].mxu0  ;;  %v6615_v25 = vpop.f32.mrb[18].mxu1  ;;  %v8113_v26 = vpack.i.bf16 %v1957_v19, %v1956_v22 }
 0x27e   : > { %v1959_v27 = vmax.f32 %v6589_v24, %v6615_v25  ;;  %v1790_v28 = vpop.f32.mrb[19].mxu0  ;;  %v1923_v29 = vpop.f32.mrb[19].mxu1  ;;  %v5679_v25 = vld [vmem:[%s10134_s4 + $0x1f0] sm:$0xff] }
 0x27f   : > { %v1958_v30 = vmax.f32 %v1790_v28, %v1923_v29  ;;  %8114 = vrot.lane.b32.xlu1 %v8113_v26, %s8321_s18  ;;  %v5615_v28 = vld [vmem:[%s10134_s4 + $0x188] sm:$0xff]  ;;  %v5578_v29 = vld [vmem:[%s10134_s4 + $0x70] sm:$0xff] }
 0x281   : > { %v8813_v31 = vpack.c.bf16 %v1959_v27, %v1958_v30  ;;  %v6592_v32 = vpop.f32.mrb[20].mxu0  ;;  %v6618_v33 = vpop.f32.mrb[20].mxu1  ;;  %v8118_v34 = vpack.i.bf16 %v1959_v27, %v1958_v30  ;;  %v5577_v27 = vld [vmem:[%s10134_s4 + $0x68] sm:$0xff]  ;;  %v5616_v30 = vld [vmem:[%s10134_s4 + $0x190] sm:$0xff] }
 0x282   : > { %v1961_v35 = vmax.f32 %v6592_v32, %v6618_v33  ;;  %v1800_v36 = vpop.f32.mrb[21].mxu0  ;;  %v1933_v37 = vpop.f32.mrb[21].mxu1  ;;  %v5579_v32 = vld [vmem:[%s10134_s4 + $0x78] sm:$0xff] }
 0x283   : > { %v1960_v38 = vmax.f32 %v1800_v36, %v1933_v37  ;;  %8119 = vrot.lane.b32.xlu0 %v8118_v34, %s8321_s18  ;;  %v5617_v33 = vld [vmem:[%s10134_s4 + $0x198] sm:$0xff]  ;;  %v5619_v36 = vld [vmem:[%s10134_s4 + $0x1a8] sm:$0xff]  ;;  %v5620_v37 = vld [vmem:[%s10134_s4 + $0x1b0] sm:$0xff] }
 0x285   : > { %v8822_v41 = vpack.c.bf16 %v1961_v35, %v1960_v38  ;;  %v6595_v42 = vpop.f32.mrb[22].mxu0  ;;  %v6621_v43 = vpop.f32.mrb[22].mxu1  ;;  %v8123_v44 = vpack.i.bf16 %v1961_v35, %v1960_v38  ;;  %v5581_v35 = vld [vmem:[%s10134_s4 + $0x88] sm:$0xff]  ;;  %v5583_v38 = vld [vmem:[%s10134_s4 + $0x98] sm:$0xff] }
 0x286   : > { %v1963_v45 = vmax.f32 %v6595_v42, %v6621_v43  ;;  %v1810_v46 = vpop.f32.mrb[23].mxu0  ;;  %v1943_v47 = vpop.f32.mrb[23].mxu1  ;;  %v5585_v43 = vld [vmem:[%s10134_s4 + $0xa8] sm:$0xff] }
 0x287   : > { %v1962_v48 = vmax.f32 %v1810_v46, %v1943_v47  ;;  %8124 = vrot.lane.b32.xlu1 %v8123_v44, %s8321_s18  ;;  %v5624_v47 = vld [vmem:[%s10134_s4 + $0x1d0] sm:$0xff] }
 0x289   : > { %v8827_v49 = vpack.c.bf16 %v1963_v45, %v1962_v48  ;;  %v8128_v50 = vpack.i.bf16 %v1963_v45, %v1962_v48 }
 0x28b   : > { %8134 = vrot.lane.b32.xlu1 %v8103_v10, %s8322_s19  ;;  %8129 = vrot.lane.b32.xlu0 %v8128_v50, %s8321_s18 }
 0x28f   : > { %8144 = vrot.lane.b32.xlu1 %v8113_v26, %s8322_s19  ;;  %8139 = vrot.lane.b32.xlu0 %v8108_v18, %s8322_s19 }
 0x293   : > { %8154 = vrot.lane.b32.xlu1 %v8123_v44, %s8322_s19  ;;  %8149 = vrot.lane.b32.xlu0 %v8118_v34, %s8322_s19  ;;  %v5618_v34 = vld [vmem:[%s10134_s4 + $0x1a0] sm:$0xff]  ;;  %v5623_v44 = vld [vmem:[%s10134_s4 + $0x1c8] sm:$0xff] }
 0x297   : > { %3147 = vperm.xlu1 %8102, %v3133_v51   ;;  %8159 = vrot.lane.b32.xlu0 %v8128_v50, %s8322_s19  ;;  %v5587_v50 = vld [vmem:[%s10134_s4 + $0xb8] sm:$0xff] }
 0x298   : > { %v5625_v51 = vld [vmem:[%s10134_s4 + $0x1d8] sm:$0xff] }
 0x29b   : > { %3157 = vperm.xlu1 %8102, %v3135_v52   ;;  %3152 = vperm.xlu0 %8101, %v3134_v53  }
 0x29f   : > { %3167 = vperm.xlu1 %8102, %v3137_v54   ;;  %3162 = vperm.xlu0 %8101, %v3136_v55   ;;  %v1964_v54 = vld [vmem:[%s10134_s4] sm:$0xff] }
 0x2a0   : > { %v5564_v55 = vld [vmem:[%s10134_s4 + $0x120] sm:$0xff] }
 0x2a3   : > { %3177 = vperm.xlu1 %8102, %v3139_v56   ;;  %3172 = vperm.xlu0 %8101, %v3138_v57   ;;  %v1965_v57 = vld [vmem:[%s10134_s4 + $0x8] sm:$0xff] }
 0x2a7   : > { %3187 = vperm.xlu1 %8102, %v3141_v58   ;;  %3182 = vperm.xlu0 %8101, %v3140_v59   ;;  %v5565_v58 = vld [vmem:[%s10134_s4 + $0x128] sm:$0xff] }
 0x2ab   : > { %3197 = vperm.xlu1 %8102, %v3143_v60   ;;  %3192 = vperm.xlu0 %8101, %v3142_v61  }
 0x2af   : > { %3202 = vperm.xlu0 %8101, %v3144_v62   ;;  %v5566_v62 = vld [vmem:[%s10134_s4 + $0x130] sm:$0xff] }
 0x2e9   : > { %v8105_v63 = vpop.permute.xlu1 %8104 }
 0x2ea   : > { %v8107_v0 = vunpack.i.h.bf16 %v8105_v63  ;;  %v8106_v1 = vunpack.i.l.bf16 %v8105_v63 }
 0x2ec   : > { %v7488_v2 = vpack.c.bf16 %v8107_v0, %v8106_v1  ;;  %v1967_v0 = vld [vmem:[%s10134_s4 + $0x18] sm:$0xff] }
 0x2ed   : > { %v8110_v3 = vpop.permute.xlu0 %8109  ;;  %v5567_v1 = vld [vmem:[%s10134_s4 + $0x138] sm:$0xff] }
 0x2ee   : > { %v8112_v4 = vunpack.i.h.bf16 %v8110_v3  ;;  %v8111_v5 = vunpack.i.l.bf16 %v8110_v3  ;;  %7489 = vmatprep.subr.bf16.mxu0 %v7488_v2  ;;  %7541 = vmatprep.subr.bf16.mxu1 %v7488_v2 }
 0x2ef   : > { %7491 = vmatpush3.bf16.msra.mxu0 %v7488_v2  ;;  %7543 = vmatpush3.bf16.msra.mxu1 %v7488_v2 }
 0x2f0   : > { %v7492_v6 = vpack.c.bf16 %v8112_v4, %v8111_v5  ;;  %v1968_v5 = vld [vmem:[%s10134_s4 + $0x20] sm:$0xff] }
 0x2f1   : > { %v8115_v8 = vpop.permute.xlu1 %8114 }
 0x2f2   : > { %v8117_v9 = vunpack.i.h.bf16 %v8115_v8  ;;  %v8116_v10 = vunpack.i.l.bf16 %v8115_v8  ;;  %7493 = vmatprep.subr.bf16.mxu0 %v7492_v6  ;;  %7545 = vmatprep.subr.bf16.mxu1 %v7492_v6 }
 0x2f3   : > { %7495 = vmatpush3.bf16.msra.mxu0 %v7492_v6  ;;  %7547 = vmatpush3.bf16.msra.mxu1 %v7492_v6  ;;  %v5568_v6 = vld [vmem:[%s10134_s4 + $0x140] sm:$0xff] }
 0x2f4   : > { %v7496_v11 = vpack.c.bf16 %v8117_v9, %v8116_v10  ;;  %v1969_v9 = vld [vmem:[%s10134_s4 + $0x28] sm:$0xff] }
 0x2f5   : > { %v8120_v12 = vpop.permute.xlu0 %8119  ;;  %v5569_v10 = vld [vmem:[%s10134_s4 + $0x148] sm:$0xff] }
 0x2f6   : > { %v8122_v13 = vunpack.i.h.bf16 %v8120_v12  ;;  %v8121_v14 = vunpack.i.l.bf16 %v8120_v12  ;;  %7497 = vmatprep.subr.bf16.mxu0 %v7496_v11  ;;  %7549 = vmatprep.subr.bf16.mxu1 %v7496_v11 }
 0x2f7   : > { %7499 = vmatpush3.bf16.msra.mxu0 %v7496_v11  ;;  %7551 = vmatpush3.bf16.msra.mxu1 %v7496_v11 }
 0x2f8   : > { %v7500_v16 = vpack.c.bf16 %v8122_v13, %v8121_v14  ;;  %v1970_v14 = vld [vmem:[%s10134_s4 + $0x30] sm:$0xff] }
 0x2f9   : > { %v8125_v17 = vpop.permute.xlu1 %8124 }
 0x2fa   : > { %v8127_v18 = vunpack.i.h.bf16 %v8125_v17  ;;  %v8126_v19 = vunpack.i.l.bf16 %v8125_v17  ;;  %7501 = vmatprep.subr.bf16.mxu0 %v7500_v16  ;;  %7553 = vmatprep.subr.bf16.mxu1 %v7500_v16 }
 0x2fb   : > { %7503 = vmatpush3.bf16.msra.mxu0 %v7500_v16  ;;  %7555 = vmatpush3.bf16.msra.mxu1 %v7500_v16  ;;  %v5570_v16 = vld [vmem:[%s10134_s4 + $0x150] sm:$0xff] }
 0x2fc   : > { %v7504_v20 = vpack.c.bf16 %v8127_v18, %v8126_v19  ;;  %v1971_v18 = vld [vmem:[%s10134_s4 + $0x38] sm:$0xff] }
 0x2fd   : > { %v8130_v21 = vpop.permute.xlu0 %8129  ;;  %v8135_v42 = vpop.permute.xlu1 %8134  ;;  %v5571_v19 = vld [vmem:[%s10134_s4 + $0x158] sm:$0xff] }
 0x2fe   : > { %v8132_v22 = vunpack.i.h.bf16 %v8130_v21  ;;  %v8131_v24 = vunpack.i.l.bf16 %v8130_v21  ;;  %7505 = vmatprep.subr.bf16.mxu0 %v7504_v20  ;;  %7557 = vmatprep.subr.bf16.mxu1 %v7504_v20  ;;  %v8137_v45 = vunpack.i.h.bf16 %v8135_v42  ;;  %v8136_v46 = vunpack.i.l.bf16 %v8135_v42  ;;  %v5653_v42 = vld [vmem:[%s10134_s4 + $0xc8] sm:$0xff] }
 0x2ff   : > { %7507 = vmatpush3.bf16.msra.mxu0 %v7504_v20  ;;  %7559 = vmatpush3.bf16.msra.mxu1 %v7504_v20 }
 0x300   : > { %v7508_v26 = vpack.c.bf16 %v8132_v22, %v8131_v24  ;;  %v1972_v24 = vld [vmem:[%s10134_s4 + $0x40] sm:$0xff] }
 0x301   : > { %v8140_v48 = vpop.permute.xlu0 %8139  ;;  %v8145_v56 = vpop.permute.xlu1 %8144 }
 0x302   : > { %7510 = vmatprep.subr.msk.bf16.mxu0 %vm8873_vm7, %v7508_v26  ;;  %7562 = vmatprep.subr.msk.bf16.mxu1 %vm8873_vm7, %v7508_v26  ;;  %v8142_v52 = vunpack.i.h.bf16 %v8140_v48  ;;  %v8141_v53 = vunpack.i.l.bf16 %v8140_v48  ;;  %v8147_v59 = vunpack.i.h.bf16 %v8145_v56  ;;  %v8146_v60 = vunpack.i.l.bf16 %v8145_v56  ;;  %v5657_v48 = vld [vmem:[%s10134_s4 + $0xe8] sm:$0xff] }
 0x303   : > { %7513 = vmatpush3.bf16.msk.msra.mxu0 %vm8873_vm7, %v7508_v26  ;;  %7565 = vmatpush3.bf16.msk.msra.mxu1 %vm8873_vm7, %v7508_v26  ;;  %v5572_v26 = vld [vmem:[%s10134_s4 + $0x160] sm:$0xff]  ;;  %v5661_v56 = vld [vmem:[%s10134_s4 + $0x108] sm:$0xff] }
 0x304   : > { %7515 = vmatprep.subr.bf16.mxu0 %v8804_v7  ;;  %7567 = vmatprep.subr.bf16.mxu1 %v8804_v7  ;;  %v7596_v61 = vpack.c.bf16 %v8142_v52, %v8141_v53  ;;  %v7600_v2 = vpack.c.bf16 %v8147_v59, %v8146_v60  ;;  %v5659_v52 = vld [vmem:[%s10134_s4 + $0xf8] sm:$0xff]  ;;  %v5687_v59 = vld [vmem:[%s10134_s4 + $0x230] sm:$0xff] }
 0x305   : > { %v8150_v63 = vpop.permute.xlu0 %8149  ;;  %v8155_v8 = vpop.permute.xlu1 %8154  ;;  %v5684_v53 = vld [vmem:[%s10134_s4 + $0x218] sm:$0xff] }
 0x306   : > { %6647 = vmatmul.mubr.msk.f32.vlgmr.msra.gmra.mrb[24].mxu0 %vm2049_vm5, %v5577_v27  ;;  %6731 = vmatmul.mubr.msk.f32.vlgmr.msra.gmra.mrb[24].mxu1 %vm2049_vm5, %v5615_v28  ;;  %v8152_v3 = vunpack.i.h.bf16 %v8150_v63  ;;  %v8151_v4 = vunpack.i.l.bf16 %v8150_v63  ;;  %v8157_v11 = vunpack.i.h.bf16 %v8155_v8  ;;  %v8156_v12 = vunpack.i.l.bf16 %v8155_v8  ;;  %v1973_v27 = vld [vmem:[%s10134_s4 + $0x48] sm:$0xff]  ;;  %v5663_v60 = vld [vmem:[%s10134_s4 + $0x118] sm:$0xff] }
 0x307   : > { %7517 = vmatpush3.bf16.msra.mxu0 %v8804_v7  ;;  %7569 = vmatpush3.bf16.msra.mxu1 %v8804_v7  ;;  %v5580_v7 = vld [vmem:[%s10134_s4 + $0x80] sm:$0xff]  ;;  %v5573_v28 = vld [vmem:[%s10134_s4 + $0x168] sm:$0xff] }
 0x308   : > { %7519 = vmatprep.subr.bf16.mxu0 %v8807_v15  ;;  %7571 = vmatprep.subr.bf16.mxu1 %v8807_v15  ;;  %v7604_v13 = vpack.c.bf16 %v8152_v3, %v8151_v4  ;;  %v7608_v20 = vpack.c.bf16 %v8157_v11, %v8156_v12 }
 0x309   : > { %6649 = vmatprep.mubr.msk.f32.mxu0 %vm2049_vm5, %v5578_v29  ;;  %6733 = vmatprep.mubr.msk.f32.mxu1 %vm2049_vm5, %v5616_v30  ;;  %v8160_v17 = vpop.permute.xlu0 %8159  ;;  %v1974_v29 = vld [vmem:[%s10134_s4 + $0x50] sm:$0xff] }
 0x30a   : > { %6650 = vmatmul.mubr.msk.f32.gmra.mrb[26].mxu0 %vm2049_vm5, %v5579_v32  ;;  %6734 = vmatmul.mubr.msk.f32.gmra.mrb[26].mxu1 %vm2049_vm5, %v5617_v33  ;;  %v8162_v21 = vunpack.i.h.bf16 %v8160_v17  ;;  %v8161_v22 = vunpack.i.l.bf16 %v8160_v17  ;;  %v5574_v30 = vld [vmem:[%s10134_s4 + $0x170] sm:$0xff]  ;;  %v3229_v32 = vld [vmem:[%s10136_s6] sm:$0xff] }
 0x30b   : > { %7521 = vmatpush3.bf16.msra.mxu0 %v8807_v15  ;;  %7573 = vmatpush3.bf16.msra.mxu1 %v8807_v15  ;;  %v5582_v15 = vld [vmem:[%s10134_s4 + $0x90] sm:$0xff] }
 0x30c   : > { %7523 = vmatprep.subr.bf16.mxu0 %v8810_v23  ;;  %7575 = vmatprep.subr.bf16.mxu1 %v8810_v23  ;;  %v7612_v33 = vpack.c.bf16 %v8162_v21, %v8161_v22 }
 0x30d   : > { %6652 = vmatprep.mubr.msk.f32.mxu0 %vm2049_vm5, %v5580_v7  ;;  %6736 = vmatprep.mubr.msk.f32.mxu1 %vm2049_vm5, %v5618_v34  ;;  %v3230_v7 = vld [vmem:[%s10136_s6 + $0x8] sm:$0xf]  ;;  %v5715_v34 = vld [vmem:[%s10136_s6 + $0x10] sm:$0xff] }
 0x30e   : > { %6653 = vmatmul.mubr.msk.f32.gmra.mrb[28].mxu0 %vm2049_vm5, %v5581_v35  ;;  %6737 = vmatmul.mubr.msk.f32.gmra.mrb[28].mxu1 %vm2049_vm5, %v5619_v36  ;;  %v5716_v35 = vld [vmem:[%s10136_s6 + $0x18] sm:$0xf] }
 0x30f   : > { %7525 = vmatpush3.bf16.msra.mxu0 %v8810_v23  ;;  %7577 = vmatpush3.bf16.msra.mxu1 %v8810_v23  ;;  %v5584_v23 = vld [vmem:[%s10134_s4 + $0xa0] sm:$0xff]  ;;  %v1975_v36 = vld [vmem:[%s10134_s4 + $0x58] sm:$0xff] }
 0x310   : > { %7527 = vmatprep.subr.bf16.mxu0 %v8813_v31  ;;  %7579 = vmatprep.subr.bf16.mxu1 %v8813_v31 }
 0x311   : > { %6655 = vmatprep.mubr.msk.f32.mxu0 %vm2049_vm5, %v5582_v15  ;;  %6739 = vmatprep.mubr.msk.f32.mxu1 %vm2049_vm5, %v5620_v37  ;;  %v5575_v15 = vld [vmem:[%s10134_s4 + $0x178] sm:$0xff]  ;;  %v5652_v37 = vld [vmem:[%s10134_s4 + $0xc0] sm:$0xff] }
 0x312   : > { %6656 = vmatmul.mubr.msk.f32.gmra.mrb[30].mxu0 %vm2049_vm5, %v5583_v38  ;;  %6740 = vmatmul.mubr.msk.f32.gmra.mrb[30].mxu1 %vm2049_vm5, %v5621_v39  ;;  %v5677_v38 = vld [vmem:[%s10134_s4 + $0x1e0] sm:$0xff]  ;;  %v7644_v39 = vpack.c.bf16 %v3230_v7, %v3229_v32 }
 0x313   : > { %7529 = vmatpush3.bf16.msra.mxu0 %v8813_v31  ;;  %7581 = vmatpush3.bf16.msra.mxu1 %v8813_v31  ;;  %v5586_v31 = vld [vmem:[%s10134_s4 + $0xb0] sm:$0xff] }
 0x314   : > { %7531 = vmatprep.subr.bf16.mxu0 %v8822_v41  ;;  %7583 = vmatprep.subr.bf16.mxu1 %v8822_v41 }
 0x315   : > { %6658 = vmatprep.mubr.msk.f32.mxu0 %vm2049_vm5, %v5584_v23  ;;  %6742 = vmatprep.mubr.msk.f32.mxu1 %vm2049_vm5, %v5622_v40  ;;  %v7650_v23 = vpack.c.bf16 %v5716_v35, %v5715_v34 }
 0x316   : > { %6659 = vmatmul.mubr.msk.f32.gmra.mrb[32].mxu0 %vm2049_vm5, %v5585_v43  ;;  %6743 = vmatmul.mubr.msk.f32.gmra.mrb[32].mxu1 %vm2049_vm5, %v5623_v44  ;;  %v5678_v43 = vld [vmem:[%s10134_s4 + $0x1e8] sm:$0xff]  ;;  %v5654_v44 = vld [vmem:[%s10134_s4 + $0xd0] sm:$0xff] }
 0x317   : > { %7533 = vmatpush3.bf16.msra.mxu0 %v8822_v41  ;;  %7585 = vmatpush3.bf16.msra.mxu1 %v8822_v41  ;;  %v7592_v41 = vpack.c.bf16 %v8137_v45, %v8136_v46  ;;  %v5655_v45 = vld [vmem:[%s10134_s4 + $0xd8] sm:$0xff] }
 0x318   : > { %7536 = vmatprep.subr.msk.bf16.mxu0 %vm8873_vm7, %v8827_v49  ;;  %7588 = vmatprep.subr.msk.bf16.mxu1 %vm8873_vm7, %v8827_v49  ;;  %v5680_v46 = vld [vmem:[%s10134_s4 + $0x1f8] sm:$0xff] }
 0x319   : > { %6661 = vmatprep.mubr.msk.f32.mxu0 %vm2049_vm5, %v5586_v31  ;;  %6745 = vmatprep.mubr.msk.f32.mxu1 %vm2049_vm5, %v5624_v47  ;;  %v5656_v31 = vld [vmem:[%s10134_s4 + $0xe0] sm:$0xff] }
 0x31a   : > { %6662 = vmatmul.mubr.msk.f32.gmra.mrb[34].mxu0 %vm2049_vm5, %v5587_v50  ;;  %6746 = vmatmul.mubr.msk.f32.gmra.mrb[34].mxu1 %vm2049_vm5, %v5625_v51  ;;  %v5681_v47 = vld [vmem:[%s10134_s4 + $0x200] sm:$0xff]  ;;  %v5682_v50 = vld [vmem:[%s10134_s4 + $0x208] sm:$0xff]  ;;  %v5658_v51 = vld [vmem:[%s10134_s4 + $0xf0] sm:$0xff] }
 0x31b   : > { %7539 = vmatpush3.bf16.msk.msra.mxu0 %vm8873_vm7, %v8827_v49  ;;  %7591 = vmatpush3.bf16.msk.msra.mxu1 %vm8873_vm7, %v8827_v49  ;;  %v1966_v49 = vld [vmem:[%s10134_s4 + $0x10] sm:$0xff] }
 0x31c   : > { %7593 = vmatprep.subr.bf16.mxu0 %v7592_v41  ;;  %7619 = vmatprep.subr.bf16.mxu1 %v7592_v41 }
 0x31d   : > { %6688 = vmatprep.mubr.msk.f32.mxu0 %vm2049_vm5, %v1964_v54  ;;  %6772 = vmatprep.mubr.msk.f32.mxu1 %vm2049_vm5, %v5564_v55  ;;  %v5660_v54 = vld [vmem:[%s10134_s4 + $0x100] sm:$0xff] }
 0x31e   : > { %6689 = vmatmul.mubr.msk.f32.vlgmr.msra.gmra.mrb[24].mxu0 %vm2049_vm5, %v1965_v57  ;;  %6773 = vmatmul.mubr.msk.f32.vlgmr.msra.gmra.mrb[24].mxu1 %vm2049_vm5, %v5565_v58  ;;  %v5685_v55 = vld [vmem:[%s10134_s4 + $0x220] sm:$0xff]  ;;  %v5686_v57 = vld [vmem:[%s10134_s4 + $0x228] sm:$0xff]  ;;  %v5662_v58 = vld [vmem:[%s10134_s4 + $0x110] sm:$0xff] }
 0x31f   : > { %7595 = vmatpush3.bf16.msra.mxu0 %v7592_v41  ;;  %7621 = vmatpush3.bf16.msra.mxu1 %v7592_v41  ;;  %v5683_v41 = vld [vmem:[%s10134_s4 + $0x210] sm:$0xff] }
 0x320   : > { %7597 = vmatprep.subr.bf16.mxu0 %v7596_v61  ;;  %7623 = vmatprep.subr.bf16.mxu1 %v7596_v61 }
 0x321   : > { %6691 = vmatprep.mubr.msk.f32.mxu0 %vm2049_vm5, %v1966_v49  ;;  %6775 = vmatprep.mubr.msk.f32.mxu1 %vm2049_vm5, %v5566_v62  ;;  %v3148_v49 = vpop.permute.xlu1 %3147  ;;  %v3153_v62 = vpop.permute.xlu0 %3152 }
 0x322   : > { %6692 = vmatmul.mubr.msk.f32.gmra.mrb[26].mxu0 %vm2049_vm5, %v1967_v0  ;;  %6776 = vmatmul.mubr.msk.f32.gmra.mrb[26].mxu1 %vm2049_vm5, %v5567_v1 }
 0x323   : > { %7599 = vmatpush3.bf16.msra.mxu0 %v7596_v61  ;;  %7625 = vmatpush3.bf16.msra.mxu1 %v7596_v61  ;;  %v5688_v61 = vld [vmem:[%s10134_s4 + $0x238] sm:$0xff] }
 0x324   : > { %7601 = vmatprep.subr.bf16.mxu0 %v7600_v2  ;;  %7627 = vmatprep.subr.bf16.mxu1 %v7600_v2 }
 0x325   : > { %6694 = vmatprep.mubr.msk.f32.mxu0 %vm2049_vm5, %v1968_v5  ;;  %6778 = vmatprep.mubr.msk.f32.mxu1 %vm2049_vm5, %v5568_v6  ;;  %v3158_v63 = vpop.permute.xlu1 %3157  ;;  %v3163_v0 = vpop.permute.xlu0 %3162 }
 0x326   : > { %6695 = vmatmul.mubr.msk.f32.gmra.mrb[28].mxu0 %vm2049_vm5, %v1969_v9  ;;  %6779 = vmatmul.mubr.msk.f32.gmra.mrb[28].mxu1 %vm2049_vm5, %v5569_v10 }
 0x327   : > { %7603 = vmatpush3.bf16.msra.mxu0 %v7600_v2  ;;  %7629 = vmatpush3.bf16.msra.mxu1 %v7600_v2 }
 0x328   : > { %7605 = vmatprep.subr.bf16.mxu0 %v7604_v13  ;;  %7631 = vmatprep.subr.bf16.mxu1 %v7604_v13 }
 0x329   : > { %6697 = vmatprep.mubr.msk.f32.mxu0 %vm2049_vm5, %v1970_v14  ;;  %6781 = vmatprep.mubr.msk.f32.mxu1 %vm2049_vm5, %v5570_v16  ;;  %v3168_v1 = vpop.permute.xlu1 %3167  ;;  %v3173_v2 = vpop.permute.xlu0 %3172 }
 0x32a   : > { %6698 = vmatmul.mubr.msk.f32.gmra.mrb[30].mxu0 %vm2049_vm5, %v1971_v18  ;;  %6782 = vmatmul.mubr.msk.f32.gmra.mrb[30].mxu1 %vm2049_vm5, %v5571_v19 }
 0x32b   : > { %7607 = vmatpush3.bf16.msra.mxu0 %v7604_v13  ;;  %7633 = vmatpush3.bf16.msra.mxu1 %v7604_v13 }
 0x32c   : > { %7609 = vmatprep.subr.bf16.mxu0 %v7608_v20  ;;  %7635 = vmatprep.subr.bf16.mxu1 %v7608_v20 }
 0x32d   : > { %6700 = vmatprep.mubr.msk.f32.mxu0 %vm2049_vm5, %v1972_v24  ;;  %6784 = vmatprep.mubr.msk.f32.mxu1 %vm2049_vm5, %v5572_v26  ;;  %v3183_v21 = vpop.permute.xlu0 %3182 }
 0x32e   : > { %6701 = vmatmul.mubr.msk.f32.gmra.mrb[32].mxu0 %vm2049_vm5, %v1973_v27  ;;  %6785 = vmatmul.mubr.msk.f32.gmra.mrb[32].mxu1 %vm2049_vm5, %v5573_v28 }
 0x32f   : > { %7611 = vmatpush3.bf16.msra.mxu0 %v7608_v20  ;;  %7637 = vmatpush3.bf16.msra.mxu1 %v7608_v20  ;;  %v3178_v20 = vpop.permute.xlu1 %3177 }
 0x330   : > { %7614 = vmatprep.subr.msk.bf16.mxu0 %vm8873_vm7, %v7612_v33  ;;  %7640 = vmatprep.subr.msk.bf16.mxu1 %vm8873_vm7, %v7612_v33 }
 0x331   : > { %6703 = vmatprep.mubr.msk.f32.mxu0 %vm2049_vm5, %v1974_v29  ;;  %6787 = vmatprep.mubr.msk.f32.mxu1 %vm2049_vm5, %v5574_v30 }
 0x332   : > { %6704 = vmatmul.mubr.msk.f32.gmra.mrb[34].mxu0 %vm2049_vm5, %v1975_v36  ;;  %6788 = vmatmul.mubr.msk.f32.gmra.mrb[34].mxu1 %vm2049_vm5, %v5575_v15 }
 0x333   : > { %7617 = vmatpush3.bf16.msk.msra.mxu0 %vm8873_vm7, %v7612_v33  ;;  %7643 = vmatpush3.bf16.msk.msra.mxu1 %vm8873_vm7, %v7612_v33 }
 0x334   : > { %6814 = vmatprep.mubr.msk.f32.mxu0 %vm2049_vm5, %v5652_v37  ;;  %6856 = vmatprep.mubr.msk.f32.mxu1 %vm2049_vm5, %v5677_v38 }
 0x335   : > { %7646 = vmatprep.subr.msk.bf16.mxu0 %vm9125_vm9, %v7644_v39  ;;  %7652 = vmatprep.subr.msk.bf16.mxu1 %vm9125_vm9, %v7650_v23 }
 0x336   : > { %6815 = vmatmul.mubr.msk.f32.vlgmr.msra.gmra.mrb[24].mxu0 %vm2049_vm5, %v5653_v42  ;;  %6857 = vmatmul.mubr.msk.f32.vlgmr.msra.gmra.mrb[24].mxu1 %vm2049_vm5, %v5678_v43  ;;  %v3188_v43 = vpop.permute.xlu1 %3187 }
 0x337   : > { %6817 = vmatprep.mubr.msk.f32.mxu0 %vm2049_vm5, %v5654_v44  ;;  %6859 = vmatprep.mubr.msk.f32.mxu1 %vm2049_vm5, %v5679_v25  ;;  %v3193_v44 = vpop.permute.xlu0 %3192 }
 0x338   : > { %7649 = vmatpush3.bf16.msk.msra.mxu0 %vm9125_vm9, %v7644_v39  ;;  %7655 = vmatpush3.bf16.msk.msra.mxu1 %vm9125_vm9, %v7650_v23 }
 0x33a   : > { %6818 = vmatmul.mubr.msk.f32.gmra.mrb[26].mxu0 %vm2049_vm5, %v5655_v45  ;;  %6860 = vmatmul.mubr.msk.f32.gmra.mrb[26].mxu1 %vm2049_vm5, %v5680_v46 }
 0x33b   : > { %6820 = vmatprep.mubr.msk.f32.mxu0 %vm2049_vm5, %v5656_v31  ;;  %6862 = vmatprep.mubr.msk.f32.mxu1 %vm2049_vm5, %v5681_v47 }
 0x33e   : > { %6821 = vmatmul.mubr.msk.f32.gmra.mrb[28].mxu0 %vm2049_vm5, %v5657_v48  ;;  %6863 = vmatmul.mubr.msk.f32.gmra.mrb[28].mxu1 %vm2049_vm5, %v5682_v50 }
 0x33f   : > { %6823 = vmatprep.mubr.msk.f32.mxu0 %vm2049_vm5, %v5658_v51  ;;  %6865 = vmatprep.mubr.msk.f32.mxu1 %vm2049_vm5, %v5683_v41 }
 0x342   : > { %6824 = vmatmul.mubr.msk.f32.gmra.mrb[30].mxu0 %vm2049_vm5, %v5659_v52  ;;  %6866 = vmatmul.mubr.msk.f32.gmra.mrb[30].mxu1 %vm2049_vm5, %v5684_v53 }
 0x343   : > { %6826 = vmatprep.mubr.msk.f32.mxu0 %vm2049_vm5, %v5660_v54  ;;  %6868 = vmatprep.mubr.msk.f32.mxu1 %vm2049_vm5, %v5685_v55 }
 0x346   : > { %6827 = vmatmul.mubr.msk.f32.gmra.mrb[32].mxu0 %vm2049_vm5, %v5661_v56  ;;  %6869 = vmatmul.mubr.msk.f32.gmra.mrb[32].mxu1 %vm2049_vm5, %v5686_v57 }
 0x347   : > { %6829 = vmatprep.mubr.msk.f32.mxu0 %vm2049_vm5, %v5662_v58  ;;  %6871 = vmatprep.mubr.msk.f32.mxu1 %vm2049_vm5, %v5687_v59 }
 0x34a   : > { %6830 = vmatmul.mubr.msk.f32.gmra.mrb[34].mxu0 %vm2049_vm5, %v5663_v60  ;;  %6872 = vmatmul.mubr.msk.f32.gmra.mrb[34].mxu1 %vm2049_vm5, %v5688_v61  ;;  %v3203_v61 = vpop.permute.xlu0 %3202 }
 0x409   : > { %v6816_v3 = vpop.f32.mrb[24].mxu0  ;;  %v6858_v4 = vpop.f32.mrb[24].mxu1 }
 0x40a   : > { %v3122_v5 = vmax.f32 %v6816_v3, %v6858_v4  ;;  %v2864_v6 = vpop.f32.mrb[25].mxu0  ;;  %v3050_v8 = vpop.f32.mrb[25].mxu1 }
 0x40b   : > { %v3121_v9 = vmax.f32 %v2864_v6, %v3050_v8 }
 0x40c   : > { %v3206_v10 = vadd.f32 %v3153_v62, %v3122_v5  ;;  %v8325_v5 = vmov 0.0|0.0  }
 0x40d   : > { %v3205_v11 = vadd.f32 %v3148_v49, %v3121_v9  ;;  %v6819_v12 = vpop.f32.mrb[26].mxu0  ;;  %v6861_v13 = vpop.f32.mrb[26].mxu1  ;;  %7656 = vmatprep.subr.bf16.mxu1 %v8325_v5  ;;  %7692 = vmatprep.subr.bf16.mxu0 %v8325_v5 }
 0x40e   : > { %v3124_v14 = vmax.f32 %v6819_v12, %v6861_v13  ;;  %v2874_v16 = vpop.f32.mrb[27].mxu0  ;;  %v3060_v17 = vpop.f32.mrb[27].mxu1  ;;  %v3218_v22 = vmax.f32 %v3206_v10, 0.0 }
 0x40f   : > { %v3217_v18 = vmax.f32 %v3205_v11, 0.0  ;;  %v3123_v19 = vmax.f32 %v2874_v16, %v3060_v17 }
 0x410   : > { %v3208_v24 = vadd.f32 %v3163_v0, %v3124_v14 }
 0x411   : > { %v3207_v26 = vadd.f32 %v3158_v63, %v3123_v19  ;;  %v6822_v27 = vpop.f32.mrb[28].mxu0  ;;  %v6864_v28 = vpop.f32.mrb[28].mxu1  ;;  %6878 = vmatprep.mubr.msk.f32.mxu0 %vm3231_vm10, %v3217_v18  ;;  %6900 = vmatprep.mubr.msk.f32.mxu1 %vm3231_vm10, %v3217_v18  ;;  %v8327_v18 = vmov 0.0  }
 0x412   : > { %v3126_v29 = vmax.f32 %v6822_v27, %v6864_v28  ;;  %v2884_v30 = vpop.f32.mrb[29].mxu0  ;;  %v3070_v32 = vpop.f32.mrb[29].mxu1  ;;  %6879 = vmatmul.mubr.msk.f32.vlgmr.msra.gmra.mrb[36].mxu0 %vm3231_vm10, %v3218_v22  ;;  %6901 = vmatmul.mubr.msk.f32.vlgmr.msra.gmra.mrb[36].mxu1 %vm3231_vm10, %v3218_v22  ;;  %v3220_v34 = vmax.f32 %v3208_v24, 0.0 }
 0x413   : > { %v3219_v33 = vmax.f32 %v3207_v26, 0.0  ;;  %v3125_v7 = vmax.f32 %v2884_v30, %v3070_v32  ;;  %v3198_v63 = vpop.permute.xlu1 %3197 }
 0x414   : > { %v3210_v35 = vadd.f32 %v3173_v2, %v3126_v29 }
 0x415   : > { %v3209_v36 = vadd.f32 %v3168_v1, %v3125_v7  ;;  %v6825_v15 = vpop.f32.mrb[30].mxu0  ;;  %v6867_v37 = vpop.f32.mrb[30].mxu1  ;;  %6881 = vmatprep.mubr.msk.f32.mxu0 %vm3231_vm10, %v3219_v33  ;;  %6903 = vmatprep.mubr.msk.f32.mxu1 %vm3231_vm10, %v3219_v33 }
 0x416   : > { %v3128_v38 = vmax.f32 %v6825_v15, %v6867_v37  ;;  %v2894_v39 = vpop.f32.mrb[31].mxu0  ;;  %v3080_v23 = vpop.f32.mrb[31].mxu1  ;;  %6882 = vmatmul.mubr.msk.f32.gmra.mrb[38].mxu0 %vm3231_vm10, %v3220_v34  ;;  %6904 = vmatmul.mubr.msk.f32.gmra.mrb[38].mxu1 %vm3231_vm10, %v3220_v34  ;;  %v3222_v25 = vmax.f32 %v3210_v35, 0.0 }
 0x417   : > { %v3221_v40 = vmax.f32 %v3209_v36, 0.0  ;;  %v3127_v42 = vmax.f32 %v2894_v39, %v3080_v23 }
 0x418   : > { %v3212_v45 = vadd.f32 %v3183_v21, %v3128_v38 }
 0x419   : > { %v3211_v46 = vadd.f32 %v3178_v20, %v3127_v42  ;;  %v6828_v31 = vpop.f32.mrb[32].mxu0  ;;  %v6870_v47 = vpop.f32.mrb[32].mxu1  ;;  %6884 = vmatprep.mubr.msk.f32.mxu0 %vm3231_vm10, %v3221_v40  ;;  %6906 = vmatprep.mubr.msk.f32.mxu1 %vm3231_vm10, %v3221_v40 }
 0x41a   : > { %v3130_v48 = vmax.f32 %v6828_v31, %v6870_v47  ;;  %v2904_v50 = vpop.f32.mrb[33].mxu0  ;;  %v3090_v51 = vpop.f32.mrb[33].mxu1  ;;  %6885 = vmatmul.mubr.msk.f32.gmra.mrb[40].mxu0 %vm3231_vm10, %v3222_v25  ;;  %6907 = vmatmul.mubr.msk.f32.gmra.mrb[40].mxu1 %vm3231_vm10, %v3222_v25  ;;  %v3224_v53 = vmax.f32 %v3212_v45, 0.0 }
 0x41b   : > { %v3223_v41 = vmax.f32 %v3211_v46, 0.0  ;;  %v3129_v52 = vmax.f32 %v2904_v50, %v3090_v51 }
 0x41c   : > { %v3214_v54 = vadd.f32 %v3193_v44, %v3130_v48 }
 0x41d   : > { %v3213_v55 = vadd.f32 %v3188_v43, %v3129_v52  ;;  %v6831_v56 = vpop.f32.mrb[34].mxu0  ;;  %v6873_v57 = vpop.f32.mrb[34].mxu1  ;;  %6887 = vmatprep.mubr.msk.f32.mxu0 %vm3231_vm10, %v3223_v41  ;;  %6909 = vmatprep.mubr.msk.f32.mxu1 %vm3231_vm10, %v3223_v41 }
 0x41e   : > { %v3132_v58 = vmax.f32 %v6831_v56, %v6873_v57  ;;  %v2914_v59 = vpop.f32.mrb[35].mxu0  ;;  %v3100_v60 = vpop.f32.mrb[35].mxu1  ;;  %6888 = vmatmul.mubr.msk.f32.gmra.mrb[42].mxu0 %vm3231_vm10, %v3224_v53  ;;  %6910 = vmatmul.mubr.msk.f32.gmra.mrb[42].mxu1 %vm3231_vm10, %v3224_v53  ;;  %v3226_v0 = vmax.f32 %v3214_v54, 0.0  ;;  %v3555_v56 = vld [vmem:[%s10137_s7] sm:$0xff]  ;;  %v3556_v57 = vld [vmem:[%s10137_s7 + $0x8] sm:$0xff] }
 0x41f   : > { %v3225_v49 = vmax.f32 %v3213_v55, 0.0  ;;  %v3131_v62 = vmax.f32 %v2914_v59, %v3100_v60  ;;  %v3558_v59 = vld [vmem:[%s10137_s7 + $0x18] sm:$0xff]  ;;  %v3559_v60 = vld [vmem:[%s10137_s7 + $0x20] sm:$0xff] }
 0x420   : > { %v3216_v1 = vadd.f32 %v3203_v61, %v3132_v58  ;;  %v3557_v58 = vld [vmem:[%s10137_s7 + $0x10] sm:$0xff]  ;;  %v3560_v61 = vld [vmem:[%s10137_s7 + $0x28] sm:$0xff] }
 0x421   : > { %v3215_v2 = vadd.f32 %v3198_v63, %v3131_v62  ;;  %6890 = vmatprep.mubr.msk.f32.mxu0 %vm3231_vm10, %v3225_v49  ;;  %6912 = vmatprep.mubr.msk.f32.mxu1 %vm3231_vm10, %v3225_v49  ;;  %v3561_v49 = vld [vmem:[%s10137_s7 + $0x30] sm:$0xff]  ;;  %v3562_v62 = vld [vmem:[%s10137_s7 + $0x38] sm:$0xff]  ;;  %v3563_v63 = vld [vmem:[%s10137_s7 + $0x40] sm:$0xff] }
 0x422   : > { %6891 = vmatmul.mubr.msk.f32.gmra.mrb[44].mxu0 %vm3231_vm10, %v3226_v0  ;;  %6913 = vmatmul.mubr.msk.f32.gmra.mrb[44].mxu1 %vm3231_vm10, %v3226_v0  ;;  %v3228_v4 = vmax.f32 %v3216_v1, 0.0  ;;  %v3564_v0 = vld [vmem:[%s10137_s7 + $0x48] sm:$0xff]  ;;  %v3565_v1 = vld [vmem:[%s10137_s7 + $0x50] sm:$0xff] }
 0x423   : > { %v3227_v3 = vmax.f32 %v3215_v2, 0.0  ;;  %v3566_v2 = vld [vmem:[%s10137_s7 + $0x58] sm:$0xff] }
 0x425   : > { %6893 = vmatprep.mubr.msk.f32.mxu0 %vm3231_vm10, %v3227_v3  ;;  %6915 = vmatprep.mubr.msk.f32.mxu1 %vm3231_vm10, %v3227_v3  ;;  %v3567_v3 = vld [vmem:[%s10137_s7 + $0x60] sm:$0xff] }
 0x426   : > { %6894 = vmatmul.mubr.msk.f32.gmra.mrb[46].mxu0 %vm3231_vm10, %v3228_v4  ;;  %6916 = vmatmul.mubr.msk.f32.gmra.mrb[46].mxu1 %vm3231_vm10, %v3228_v4  ;;  %v3568_v4 = vld [vmem:[%s10137_s7 + $0x68] sm:$0xff] }
 0x427   : > { %6942 = vmatprep.mubr.msk.f32.mxu1 %vm8326_vm11, %v8327_v18  ;;  %7080 = vmatprep.mubr.msk.f32.mxu0 %vm8326_vm11, %v8327_v18 }
 0x4e5   : > { %v6880_v6 = vpop.f32.mrb[36].mxu0  ;;  %v6902_v8 = vpop.f32.mrb[36].mxu1 }
 0x4e6   : > { %v3529_v9 = vmax.f32 %v6880_v6, %v6902_v8  ;;  %v3338_v10 = vpop.f32.mrb[37].mxu0  ;;  %v3469_v11 = vpop.f32.mrb[37].mxu1  ;;  %v3569_v6 = vld [vmem:[%s10137_s7 + $0x70] sm:$0xff] }
 0x4e7   : > { %v3528_v12 = vmax.f32 %v3338_v10, %v3469_v11 }
 0x4e9   : > { %v6883_v13 = vpop.f32.mrb[38].mxu0  ;;  %v6905_v14 = vpop.f32.mrb[38].mxu1  ;;  %v9257_v16 = vpack.i.bf16 %v3529_v9, %v3528_v12  ;;  %v7657_v17 = vpack.c.bf16 %v3529_v9, %v3528_v12 }
 0x4ea   : > { %v3531_v19 = vmax.f32 %v6883_v13, %v6905_v14  ;;  %v3348_v20 = vpop.f32.mrb[39].mxu0  ;;  %v3479_v21 = vpop.f32.mrb[39].mxu1 }
 0x4eb   : > { %v3530_v22 = vmax.f32 %v3348_v20, %v3479_v21  ;;  %8164 = vrot.lane.b32.xlu1 %v9257_v16, %s8322_s19  ;;  %7658 = vmatpush3.bf16.msra.mxu1 %v7657_v17 }
 0x4ec   : > { %7659 = vmatprep.subr.bf16.mxu1 %v8325_v5 }
 0x4ed   : > { %v6886_v24 = vpop.f32.mrb[40].mxu0  ;;  %v6908_v26 = vpop.f32.mrb[40].mxu1  ;;  %v9266_v27 = vpack.i.bf16 %v3531_v19, %v3530_v22  ;;  %v7660_v28 = vpack.c.bf16 %v3531_v19, %v3530_v22 }
 0x4ee   : > { %v3533_v29 = vmax.f32 %v6886_v24, %v6908_v26  ;;  %v3358_v30 = vpop.f32.mrb[41].mxu0  ;;  %v3489_v32 = vpop.f32.mrb[41].mxu1 }
 0x4ef   : > { %v3532_v33 = vmax.f32 %v3358_v30, %v3489_v32  ;;  %8169 = vrot.lane.b32.xlu0 %v9266_v27, %s8322_s19  ;;  %7661 = vmatpush3.bf16.msra.mxu1 %v7660_v28 }
 0x4f0   : > { %7662 = vmatprep.subr.bf16.mxu1 %v8325_v5 }
 0x4f1   : > { %v6889_v7 = vpop.f32.mrb[42].mxu0  ;;  %v6911_v34 = vpop.f32.mrb[42].mxu1  ;;  %v9271_v35 = vpack.i.bf16 %v3533_v29, %v3532_v33  ;;  %v7663_v36 = vpack.c.bf16 %v3533_v29, %v3532_v33 }
 0x4f2   : > { %v3535_v15 = vmax.f32 %v6889_v7, %v6911_v34  ;;  %v3368_v37 = vpop.f32.mrb[43].mxu0  ;;  %v3499_v38 = vpop.f32.mrb[43].mxu1 }
 0x4f3   : > { %v3534_v39 = vmax.f32 %v3368_v37, %v3499_v38  ;;  %8174 = vrot.lane.b32.xlu1 %v9271_v35, %s8322_s19  ;;  %7664 = vmatpush3.bf16.msra.mxu1 %v7663_v36 }
 0x4f4   : > { %7665 = vmatprep.subr.bf16.mxu1 %v8325_v5 }
 0x4f5   : > { %v6892_v23 = vpop.f32.mrb[44].mxu0  ;;  %v6914_v40 = vpop.f32.mrb[44].mxu1  ;;  %v9276_v42 = vpack.i.bf16 %v3535_v15, %v3534_v39  ;;  %v7666_v43 = vpack.c.bf16 %v3535_v15, %v3534_v39 }
 0x4f6   : > { %v3537_v44 = vmax.f32 %v6892_v23, %v6914_v40  ;;  %v3378_v25 = vpop.f32.mrb[45].mxu0  ;;  %v3509_v45 = vpop.f32.mrb[45].mxu1  ;;  %v5775_v23 = vld [vmem:[%s10137_s7 + $0xf0] sm:$0xff] }
 0x4f7   : > { %v3536_v46 = vmax.f32 %v3378_v25, %v3509_v45  ;;  %8179 = vrot.lane.b32.xlu0 %v9276_v42, %s8322_s19  ;;  %7667 = vmatpush3.bf16.msra.mxu1 %v7666_v43  ;;  %v5776_v45 = vld [vmem:[%s10137_s7 + $0xf8] sm:$0xff] }
 0x4f8   : > { %7668 = vmatprep.subr.bf16.mxu1 %v8325_v5 }
 0x4f9   : > { %v6895_v31 = vpop.f32.mrb[46].mxu0  ;;  %v6917_v47 = vpop.f32.mrb[46].mxu1  ;;  %v9281_v48 = vpack.i.bf16 %v3537_v44, %v3536_v46  ;;  %v7669_v50 = vpack.c.bf16 %v3537_v44, %v3536_v46 }
 0x4fa   : > { %v3539_v51 = vmax.f32 %v6895_v31, %v6917_v47  ;;  %v3388_v41 = vpop.f32.mrb[47].mxu0  ;;  %v3519_v52 = vpop.f32.mrb[47].mxu1 }
 0x4fb   : > { %v3538_v53 = vmax.f32 %v3388_v41, %v3519_v52  ;;  %8184 = vrot.lane.b32.xlu1 %v9281_v48, %s8322_s19  ;;  %7670 = vmatpush3.bf16.msra.mxu1 %v7669_v50 }
 0x4fc   : > { %7671 = vmatprep.subr.bf16.mxu1 %v8325_v5 }
 0x4fd   : > { %v9286_v54 = vpack.i.bf16 %v3539_v51, %v3538_v53  ;;  %v7672_v55 = vpack.c.bf16 %v3539_v51, %v3538_v53  ;;  %v5777_v51 = vld [vmem:[%s10137_s7 + $0x100] sm:$0xff] }
 0x4ff   : > { %8194 = vrot.lane.b32.xlu1 %v9257_v16, %s8328_s27  ;;  %8189 = vrot.lane.b32.xlu0 %v9286_v54, %s8322_s19 }
 0x500   : > { %7673 = vmatpush3.bf16.msra.mxu1 %v7672_v55 }
 0x501   : > { %7674 = vmatprep.subr.bf16.mxu1 %v8325_v5 }
 0x503   : > { %8204 = vrot.lane.b32.xlu1 %v9271_v35, %s8328_s27  ;;  %8199 = vrot.lane.b32.xlu0 %v9266_v27, %s8328_s27 }
 0x504   : > { %6943 = vmatmul.mubr.msk.f32.vlgmr.msra.gmra.mrb[48].mxu1 %vm3570_vm12, %v3555_v56  ;;  %v5778_v56 = vld [vmem:[%s10137_s7 + $0x108] sm:$0xff] }
 0x505   : > { %6945 = vmatprep.mubr.msk.f32.mxu1 %vm8326_vm11, %v8327_v18 }
 0x507   : > { %8214 = vrot.lane.b32.xlu1 %v9281_v48, %s8328_s27  ;;  %8209 = vrot.lane.b32.xlu0 %v9276_v42, %s8328_s27 }
 0x508   : > { %6946 = vmatmul.mubr.msk.f32.gmra.mrb[50].mxu1 %vm3570_vm12, %v3556_v57 }
 0x509   : > { %6948 = vmatprep.mubr.msk.f32.mxu1 %vm8326_vm11, %v8327_v18 }
 0x50b   : > { %8224 = vrot.lane.b32.xlu1 %v9257_v16, %s8329_s16  ;;  %8219 = vrot.lane.b32.xlu0 %v9286_v54, %s8328_s27 }
 0x50c   : > { %6949 = vmatmul.mubr.msk.f32.gmra.mrb[52].mxu1 %vm3570_vm12, %v3557_v58 }
 0x50d   : > { %6951 = vmatprep.mubr.msk.f32.mxu1 %vm8326_vm11, %v8327_v18 }
 0x50f   : > { %8234 = vrot.lane.b32.xlu1 %v9271_v35, %s8329_s16  ;;  %8229 = vrot.lane.b32.xlu0 %v9266_v27, %s8329_s16 }
 0x510   : > { %6952 = vmatmul.mubr.msk.f32.gmra.mrb[54].mxu1 %vm3570_vm12, %v3558_v59 }
 0x511   : > { %6954 = vmatprep.mubr.msk.f32.mxu1 %vm8326_vm11, %v8327_v18 }
 0x513   : > { %8244 = vrot.lane.b32.xlu1 %v9281_v48, %s8329_s16  ;;  %8239 = vrot.lane.b32.xlu0 %v9276_v42, %s8329_s16 }
 0x514   : > { %6955 = vmatmul.mubr.msk.f32.gmra.mrb[56].mxu1 %vm3570_vm12, %v3559_v60 }
 0x515   : > { %6957 = vmatprep.mubr.msk.f32.mxu1 %vm8326_vm11, %v8327_v18 }
 0x517   : > { %8254 = vrot.lane.b32.xlu1 %v9257_v16, %s8321_s18  ;;  %8249 = vrot.lane.b32.xlu0 %v9286_v54, %s8329_s16  ;;  %s5912_s16 = sshll.u32 %s10149_s26, 4 }
 0x518   : > { %6958 = vmatmul.mubr.msk.f32.gmra.mrb[58].mxu1 %vm3570_vm12, %v3560_v61  ;;  %s440_s24 = scalar_lea.vmem %s10143_s13, %s5912_s16 }
 0x519   : > { %6960 = vmatprep.mubr.msk.f32.mxu1 %vm8326_vm11, %v8327_v18 }
 0x51b   : > { %8264 = vrot.lane.b32.xlu1 %v9271_v35, %s8321_s18  ;;  %8259 = vrot.lane.b32.xlu0 %v9266_v27, %s8321_s18 }
 0x51c   : > { %6961 = vmatmul.mubr.msk.f32.gmra.mrb[60].mxu1 %vm3570_vm12, %v3561_v49  ;;  %v5779_v49 = vld [vmem:[%s10137_s7 + $0x110] sm:$0xff] }
 0x51d   : > { %6963 = vmatprep.mubr.msk.f32.mxu1 %vm8326_vm11, %v8327_v18 }
 0x51f   : > { %8274 = vrot.lane.b32.xlu1 %v9281_v48, %s8321_s18  ;;  %8269 = vrot.lane.b32.xlu0 %v9276_v42, %s8321_s18 }
 0x520   : > { %6964 = vmatmul.mubr.msk.f32.gmra.mrb[62].mxu1 %vm3570_vm12, %v3562_v62 }
 0x521   : > { %6966 = vmatprep.mubr.msk.f32.mxu1 %vm8326_vm11, %v8327_v18 }
 0x523   : > { %8284 = vrot.lane.b32.xlu1 %v9257_v16, %s8330_s15  ;;  %8279 = vrot.lane.b32.xlu0 %v9286_v54, %s8321_s18 }
 0x524   : > { %6967 = vmatmul.mubr.msk.f32.gmra.mrb[64].mxu1 %vm3570_vm12, %v3563_v63 }
 0x525   : > { %6969 = vmatprep.mubr.msk.f32.mxu1 %vm8326_vm11, %v8327_v18 }
 0x527   : > { %8294 = vrot.lane.b32.xlu1 %v9271_v35, %s8330_s15  ;;  %8289 = vrot.lane.b32.xlu0 %v9266_v27, %s8330_s15 }
 0x528   : > { %6970 = vmatmul.mubr.msk.f32.gmra.mrb[66].mxu1 %vm3570_vm12, %v3564_v0 }
 0x529   : > { %6972 = vmatprep.mubr.msk.f32.mxu1 %vm8326_vm11, %v8327_v18 }
 0x52b   : > { %8304 = vrot.lane.b32.xlu1 %v9281_v48, %s8330_s15  ;;  %8299 = vrot.lane.b32.xlu0 %v9276_v42, %s8330_s15 }
 0x52c   : > { %6973 = vmatmul.mubr.msk.f32.gmra.mrb[68].mxu1 %vm3570_vm12, %v3565_v1 }
 0x52d   : > { %6975 = vmatprep.mubr.msk.f32.mxu1 %vm8326_vm11, %v8327_v18 }
 0x52f   : > { %8309 = vrot.lane.b32.xlu0 %v9286_v54, %s8330_s15 }
 0x530   : > { %6976 = vmatmul.mubr.msk.f32.gmra.mrb[70].mxu1 %vm3570_vm12, %v3566_v2 }
 0x531   : > { %6978 = vmatprep.mubr.msk.f32.mxu1 %vm8326_vm11, %v8327_v18 }
 0x534   : > { %6979 = vmatmul.mubr.msk.f32.gmra.mrb[72].mxu1 %vm3570_vm12, %v3567_v3 }
 0x535   : > { %6981 = vmatprep.mubr.msk.f32.mxu1 %vm8326_vm11, %v8327_v18 }
 0x538   : > { %6982 = vmatmul.mubr.msk.f32.gmra.mrb[74].mxu1 %vm3570_vm12, %v3568_v4 }
 0x539   : > { %6984 = vmatprep.mubr.msk.f32.mxu1 %vm8326_vm11, %v8327_v18 }
 0x53c   : > { %6985 = vmatmul.mubr.msk.f32.gmra.mrb[76].mxu1 %vm3570_vm12, %v3569_v6  ;;  %v5780_v6 = vld [vmem:[%s10137_s7 + $0x118] sm:$0xff] }
 0x53d   : > { %7011 = vmatprep.mubr.msk.f32.mxu1 %vm8326_vm11, %v8327_v18 }
 0x55d   : > { %v8165_v8 = vpop.permute.xlu1 %8164 }
 0x55e   : > { %v8167_v9 = vunpack.i.h.bf16 %v8165_v8  ;;  %v8166_v10 = vunpack.i.l.bf16 %v8165_v8 }
 0x560   : > { %v9411_v11 = vpack.c.bf16 %v8167_v9, %v8166_v10 }
 0x561   : > { %v8170_v12 = vpop.permute.xlu0 %8169 }
 0x562   : > { %v8172_v13 = vunpack.i.h.bf16 %v8170_v12  ;;  %v8171_v14 = vunpack.i.l.bf16 %v8170_v12  ;;  %7694 = vmatpush3.bf16.msra.mxu0 %v9411_v11 }
 0x563   : > { %7695 = vmatprep.subr.bf16.mxu0 %v8325_v5 }
 0x564   : > { %v9415_v16 = vpack.c.bf16 %v8172_v13, %v8171_v14 }
 0x565   : > { %v8175_v17 = vpop.permute.xlu1 %8174 }
 0x566   : > { %v8177_v19 = vunpack.i.h.bf16 %v8175_v17  ;;  %v8176_v20 = vunpack.i.l.bf16 %v8175_v17  ;;  %7697 = vmatpush3.bf16.msra.mxu0 %v9415_v16 }
 0x567   : > { %7698 = vmatprep.subr.bf16.mxu0 %v8325_v5 }
 0x568   : > { %v9419_v21 = vpack.c.bf16 %v8177_v19, %v8176_v20  ;;  %v5805_v20 = vld [vmem:[%s10137_s7 + $0x168] sm:$0xff] }
 0x569   : > { %v8180_v22 = vpop.permute.xlu0 %8179 }
 0x56a   : > { %v8182_v24 = vunpack.i.h.bf16 %v8180_v22  ;;  %v8181_v26 = vunpack.i.l.bf16 %v8180_v22  ;;  %7700 = vmatpush3.bf16.msra.mxu0 %v9419_v21 }
 0x56b   : > { %7701 = vmatprep.subr.bf16.mxu0 %v8325_v5 }
 0x56c   : > { %v9423_v27 = vpack.c.bf16 %v8182_v24, %v8181_v26 }
 0x56d   : > { %v8185_v28 = vpop.permute.xlu1 %8184 }
 0x56e   : > { %v8187_v29 = vunpack.i.h.bf16 %v8185_v28  ;;  %v8186_v30 = vunpack.i.l.bf16 %v8185_v28  ;;  %7703 = vmatpush3.bf16.msra.mxu0 %v9423_v27 }
 0x56f   : > { %7704 = vmatprep.subr.bf16.mxu0 %v8325_v5 }
 0x570   : > { %v9427_v32 = vpack.c.bf16 %v8187_v29, %v8186_v30 }
 0x571   : > { %v8195_v33 = vpop.permute.xlu1 %8194  ;;  %v8190_v7 = vpop.permute.xlu0 %8189 }
 0x572   : > { %v8192_v34 = vunpack.i.h.bf16 %v8190_v7  ;;  %v8191_v35 = vunpack.i.l.bf16 %v8190_v7  ;;  %7706 = vmatpush3.bf16.msra.mxu0 %v9427_v32  ;;  %v8197_v36 = vunpack.i.h.bf16 %v8195_v33  ;;  %v8196_v15 = vunpack.i.l.bf16 %v8195_v33  ;;  %v5806_v7 = vld [vmem:[%s10137_s7 + $0x170] sm:$0xff] }
 0x573   : > { %7707 = vmatprep.subr.bf16.mxu0 %v8325_v5 }
 0x574   : > { %v9431_v37 = vpack.c.bf16 %v8192_v34, %v8191_v35  ;;  %v7711_v40 = vpack.c.bf16 %v8197_v36, %v8196_v15 }
 0x575   : > { %v8205_v38 = vpop.permute.xlu1 %8204  ;;  %v8200_v39 = vpop.permute.xlu0 %8199 }
 0x576   : > { %7709 = vmatpush3.bf16.msra.mxu0 %v9431_v37  ;;  %v8202_v42 = vunpack.i.h.bf16 %v8200_v39  ;;  %v8201_v43 = vunpack.i.l.bf16 %v8200_v39  ;;  %v8207_v46 = vunpack.i.h.bf16 %v8205_v38  ;;  %v8206_v31 = vunpack.i.l.bf16 %v8205_v38 }
 0x577   : > { %7710 = vmatprep.subr.bf16.mxu0 %v8325_v5 }
 0x578   : > { %v7714_v47 = vpack.c.bf16 %v8202_v42, %v8201_v43  ;;  %v7717_v41 = vpack.c.bf16 %v8207_v46, %v8206_v31 }
 0x579   : > { %v8215_v44 = vpop.permute.xlu1 %8214  ;;  %v8210_v25 = vpop.permute.xlu0 %8209  ;;  %7081 = vmatmul.mubr.msk.f32.vlgmr.msra.gmra.mrb[48].mxu0 %vm3570_vm12, %v5775_v23 }
 0x57a   : > { %7712 = vmatpush3.bf16.msra.mxu0 %v7711_v40  ;;  %7083 = vmatprep.mubr.msk.f32.mxu0 %vm8326_vm11, %v8327_v18  ;;  %v8212_v52 = vunpack.i.h.bf16 %v8210_v25  ;;  %v8211_v53 = vunpack.i.l.bf16 %v8210_v25  ;;  %v8217_v57 = vunpack.i.h.bf16 %v8215_v44  ;;  %v8216_v58 = vunpack.i.l.bf16 %v8215_v44  ;;  %v5807_v40 = vld [vmem:[%s10137_s7 + $0x178] sm:$0xff] }
 0x57b   : > { %7713 = vmatprep.subr.bf16.mxu0 %v8325_v5 }
 0x57c   : > { %v7720_v59 = vpack.c.bf16 %v8212_v52, %v8211_v53  ;;  %v7723_v62 = vpack.c.bf16 %v8217_v57, %v8216_v58 }
 0x57d   : > { %v8225_v48 = vpop.permute.xlu1 %8224  ;;  %v8220_v50 = vpop.permute.xlu0 %8219  ;;  %7084 = vmatmul.mubr.msk.f32.gmra.mrb[50].mxu0 %vm3570_vm12, %v5776_v45 }
 0x57e   : > { %7715 = vmatpush3.bf16.msra.mxu0 %v7714_v47  ;;  %7086 = vmatprep.mubr.msk.f32.mxu0 %vm8326_vm11, %v8327_v18  ;;  %v8222_v63 = vunpack.i.h.bf16 %v8220_v50  ;;  %v8221_v0 = vunpack.i.l.bf16 %v8220_v50  ;;  %v8227_v8 = vunpack.i.h.bf16 %v8225_v48  ;;  %v8226_v9 = vunpack.i.l.bf16 %v8225_v48  ;;  %v5808_v47 = vld [vmem:[%s10137_s7 + $0x180] sm:$0xff] }
 0x57f   : > { %7716 = vmatprep.subr.bf16.mxu0 %v8325_v5 }
 0x580   : > { %v7726_v10 = vpack.c.bf16 %v8222_v63, %v8221_v0  ;;  %v7729_v22 = vpack.c.bf16 %v8227_v8, %v8226_v9  ;;  %v5812_v63 = vld [vmem:[%s10137_s7 + $0x1a0] sm:$0xff]  ;;  %v5813_v0 = vld [vmem:[%s10137_s7 + $0x1a8] sm:$0xff]  ;;  %v5818_v8 = vld [vmem:[%s10137_s7 + $0x1d0] sm:$0xff] }
 0x581   : > { %v9452_v54 = vpop.permute.xlu1 %8234  ;;  %v8230_v55 = vpop.permute.xlu0 %8229  ;;  %7087 = vmatmul.mubr.msk.f32.gmra.mrb[52].mxu0 %vm3570_vm12, %v5777_v51 }
 0x582   : > { %7718 = vmatpush3.bf16.msra.mxu0 %v7717_v41  ;;  %7089 = vmatprep.mubr.msk.f32.mxu0 %vm8326_vm11, %v8327_v18  ;;  %v8232_v24 = vunpack.i.h.bf16 %v8230_v55  ;;  %v8231_v26 = vunpack.i.l.bf16 %v8230_v55  ;;  %v8237_v34 = vunpack.i.h.bf16 %v9452_v54  ;;  %v8236_v35 = vunpack.i.l.bf16 %v9452_v54  ;;  %v5809_v54 = vld [vmem:[%s10137_s7 + $0x188] sm:$0xff] }
 0x583   : > { %7719 = vmatprep.subr.bf16.mxu0 %v8325_v5 }
 0x584   : > { %v7732_v36 = vpack.c.bf16 %v8232_v24, %v8231_v26  ;;  %v7735_v42 = vpack.c.bf16 %v8237_v34, %v8236_v35 }
 0x585   : > { %v9461_v60 = vpop.permute.xlu1 %8244  ;;  %v9463_v61 = vpop.permute.xlu0 %8239  ;;  %7090 = vmatmul.mubr.msk.f32.gmra.mrb[54].mxu0 %vm3570_vm12, %v5778_v56 }
 0x586   : > { %7721 = vmatpush3.bf16.msra.mxu0 %v7720_v59  ;;  %7092 = vmatprep.mubr.msk.f32.mxu0 %vm8326_vm11, %v8327_v18  ;;  %v8242_v43 = vunpack.i.h.bf16 %v9463_v61  ;;  %v8241_v44 = vunpack.i.l.bf16 %v9463_v61  ;;  %v8247_v48 = vunpack.i.h.bf16 %v9461_v60  ;;  %v8246_v50 = vunpack.i.l.bf16 %v9461_v60  ;;  %v5745_v59 = vld [vmem:[%s10137_s7 + $0x78] sm:$0xff]  ;;  %v5810_v60 = vld [vmem:[%s10137_s7 + $0x190] sm:$0xff] }
 0x587   : > { %7722 = vmatprep.subr.bf16.mxu0 %v8325_v5 }
 0x588   : > { %v7738_v51 = vpack.c.bf16 %v8242_v43, %v8241_v44  ;;  %v7741_v55 = vpack.c.bf16 %v8247_v48, %v8246_v50  ;;  %v5838_v43 = vld [vmem:[%s10137_s7 + $0x1f8] sm:$0xff] }
 0x589   : > { %v8255_v1 = vpop.permute.xlu1 %8254  ;;  %v9472_v2 = vpop.permute.xlu0 %8249  ;;  %7093 = vmatmul.mubr.msk.f32.gmra.mrb[56].mxu0 %vm3570_vm12, %v5779_v49  ;;  %v5746_v49 = vld [vmem:[%s10137_s7 + $0x80] sm:$0xff] }
 0x58a   : > { %v8257_v3 = vunpack.i.h.bf16 %v8255_v1  ;;  %v8256_v4 = vunpack.i.l.bf16 %v8255_v1  ;;  %7724 = vmatpush3.bf16.msra.mxu0 %v7723_v62  ;;  %7095 = vmatprep.mubr.msk.f32.mxu0 %vm8326_vm11, %v8327_v18  ;;  %v8252_v56 = vunpack.i.h.bf16 %v9472_v2  ;;  %v8251_v57 = vunpack.i.l.bf16 %v9472_v2  ;;  %v5811_v62 = vld [vmem:[%s10137_s7 + $0x198] sm:$0xff]  ;;  %v5814_v1 = vld [vmem:[%s10137_s7 + $0x1b0] sm:$0xff] }
 0x58b   : > { %7725 = vmatprep.subr.bf16.mxu0 %v8325_v5  ;;  %v5815_v2 = vld [vmem:[%s10137_s7 + $0x1b8] sm:$0xff] }
 0x58c   : > { %v7675_v12 = vpack.c.bf16 %v8257_v3, %v8256_v4  ;;  %v7744_v61 = vpack.c.bf16 %v8252_v56, %v8251_v57  ;;  %v5816_v3 = vld [vmem:[%s10137_s7 + $0x1c0] sm:$0xff]  ;;  %v5817_v4 = vld [vmem:[%s10137_s7 + $0x1c8] sm:$0xff]  ;;  %v5783_v56 = vld [vmem:[%s10137_s7 + $0x130] sm:$0xff] }
 0x58d   : > { %v8265_v13 = vpop.permute.xlu1 %8264  ;;  %v8260_v14 = vpop.permute.xlu0 %8259  ;;  %7096 = vmatmul.mubr.msk.f32.gmra.mrb[58].mxu0 %vm3570_vm12, %v5780_v6  ;;  %v5753_v6 = vld [vmem:[%s10137_s7 + $0xb8] sm:$0xff] }
 0x58e   : > { %v8262_v17 = vunpack.i.h.bf16 %v8260_v14  ;;  %v8261_v19 = vunpack.i.l.bf16 %v8260_v14  ;;  %7676 = vmatpush3.bf16.msra.mxu1 %v7675_v12  ;;  %7727 = vmatpush3.bf16.msra.mxu0 %v7726_v10  ;;  %v8267_v28 = vunpack.i.h.bf16 %v8265_v13  ;;  %v8266_v29 = vunpack.i.l.bf16 %v8265_v13  ;;  %v5754_v10 = vld [vmem:[%s10137_s7 + $0xc0] sm:$0xff]  ;;  %v5819_v12 = vld [vmem:[%s10137_s7 + $0x1d8] sm:$0xff] }
 0x58f   : > { %7149 = vmatprep.mubr.msk.f32.mxu0 %vm8326_vm11, %v8327_v18  ;;  %7677 = vmatprep.subr.bf16.mxu1 %v8325_v5  ;;  %v5842_v57 = vld [vmem:[%s10137_s7 + $0x218] sm:$0xff] }
 0x590   : > { %v7678_v30 = vpack.c.bf16 %v8262_v17, %v8261_v19  ;;  %7728 = vmatprep.subr.bf16.mxu0 %v8325_v5  ;;  %v7681_v15 = vpack.c.bf16 %v8267_v28, %v8266_v29  ;;  %v5755_v19 = vld [vmem:[%s10137_s7 + $0xc8] sm:$0xff]  ;;  %v5756_v29 = vld [vmem:[%s10137_s7 + $0xd0] sm:$0xff] }
 0x591   : > { %v8270_v33 = vpop.permute.xlu0 %8269  ;;  %7150 = vmatmul.mubr.msk.f32.vlgmr.msra.gmra.mrb[48].mxu0 %vm3570_vm12, %v5805_v20  ;;  %v8275_v23 = vpop.permute.xlu1 %8274  ;;  %v5835_v20 = vld [vmem:[%s10137_s7 + $0x1e0] sm:$0xff] }
 0x592   : > { %7679 = vmatpush3.bf16.msra.mxu1 %v7678_v30  ;;  %7730 = vmatpush3.bf16.msra.mxu0 %v7729_v22  ;;  %v8272_v38 = vunpack.i.h.bf16 %v8270_v33  ;;  %v8271_v39 = vunpack.i.l.bf16 %v8270_v33  ;;  %v8277_v25 = vunpack.i.h.bf16 %v8275_v23  ;;  %v8276_v45 = vunpack.i.l.bf16 %v8275_v23  ;;  %v5836_v30 = vld [vmem:[%s10137_s7 + $0x1e8] sm:$0xff] }
 0x593   : > { %7152 = vmatprep.mubr.msk.f32.mxu0 %vm8326_vm11, %v8327_v18  ;;  %7680 = vmatprep.subr.bf16.mxu1 %v8325_v5 }
 0x594   : > { %7731 = vmatprep.subr.bf16.mxu0 %v8325_v5  ;;  %v7684_v46 = vpack.c.bf16 %v8272_v38, %v8271_v39  ;;  %v7687_v41 = vpack.c.bf16 %v8277_v25, %v8276_v45 }
 0x595   : > { %7153 = vmatmul.mubr.msk.f32.gmra.mrb[50].mxu0 %vm3570_vm12, %v5806_v7  ;;  %v8280_v31 = vpop.permute.xlu0 %8279  ;;  %v8285_v9 = vpop.permute.xlu1 %8284 }
 0x596   : > { %7682 = vmatpush3.bf16.msra.mxu1 %v7681_v15  ;;  %7733 = vmatpush3.bf16.msra.mxu0 %v7732_v36  ;;  %v8282_v52 = vunpack.i.h.bf16 %v8280_v31  ;;  %v8281_v53 = vunpack.i.l.bf16 %v8280_v31  ;;  %v8287_v13 = vunpack.i.h.bf16 %v8285_v9  ;;  %v8286_v14 = vunpack.i.l.bf16 %v8285_v9  ;;  %v5757_v36 = vld [vmem:[%s10137_s7 + $0xd8] sm:$0xff]  ;;  %v5837_v15 = vld [vmem:[%s10137_s7 + $0x1f0] sm:$0xff]  ;;  %v5759_v31 = vld [vmem:[%s10137_s7 + $0xe8] sm:$0xff] }
 0x597   : > { %7155 = vmatprep.mubr.msk.f32.mxu0 %vm8326_vm11, %v8327_v18  ;;  %7683 = vmatprep.subr.bf16.mxu1 %v8325_v5  ;;  %v5872_v9 = vld [vmem:[%s10137_s7 + $0x290] sm:$0xff] }
 0x598   : > { %7734 = vmatprep.subr.bf16.mxu0 %v8325_v5  ;;  %v7690_v58 = vpack.c.bf16 %v8282_v52, %v8281_v53  ;;  %v7747_v22 = vpack.c.bf16 %v8287_v13, %v8286_v14  ;;  %v5840_v52 = vld [vmem:[%s10137_s7 + $0x208] sm:$0xff]  ;;  %v5876_v14 = vld [vmem:[%s10137_s7 + $0x2b0] sm:$0xff] }
 0x599   : > { %7156 = vmatmul.mubr.msk.f32.gmra.mrb[52].mxu0 %vm3570_vm12, %v5807_v40  ;;  %v8290_v17 = vpop.permute.xlu0 %8289  ;;  %v8295_v28 = vpop.permute.xlu1 %8294  ;;  %v5875_v13 = vld [vmem:[%s10137_s7 + $0x2a8] sm:$0xff] }
 0x59a   : > { %7685 = vmatpush3.bf16.msra.mxu1 %v7684_v46  ;;  %7736 = vmatpush3.bf16.msra.mxu0 %v7735_v42  ;;  %v8292_v24 = vunpack.i.h.bf16 %v8290_v17  ;;  %v8291_v26 = vunpack.i.l.bf16 %v8290_v17  ;;  %v8297_v33 = vunpack.i.h.bf16 %v8295_v28  ;;  %v8296_v7 = vunpack.i.l.bf16 %v8295_v28  ;;  %v5758_v42 = vld [vmem:[%s10137_s7 + $0xe0] sm:$0xff]  ;;  %v5877_v17 = vld [vmem:[%s10137_s7 + $0x2b8] sm:$0xff] }
 0x59b   : > { %7158 = vmatprep.mubr.msk.f32.mxu0 %vm8326_vm11, %v8327_v18  ;;  %7686 = vmatprep.subr.bf16.mxu1 %v8325_v5 }
 0x59c   : > { %7737 = vmatprep.subr.bf16.mxu0 %v8325_v5  ;;  %v7750_v34 = vpack.c.bf16 %v8292_v24, %v8291_v26  ;;  %v7753_v38 = vpack.c.bf16 %v8297_v33, %v8296_v7 }
 0x59d   : > { %7159 = vmatmul.mubr.msk.f32.gmra.mrb[54].mxu0 %vm3570_vm12, %v5808_v47  ;;  %v8300_v35 = vpop.permute.xlu0 %8299  ;;  %v8305_v40 = vpop.permute.xlu1 %8304  ;;  %v5839_v47 = vld [vmem:[%s10137_s7 + $0x200] sm:$0xff] }
 0x59e   : > { %7688 = vmatpush3.bf16.msra.mxu1 %v7687_v41  ;;  %7739 = vmatpush3.bf16.msra.mxu0 %v7738_v51  ;;  %v8302_v39 = vunpack.i.h.bf16 %v8300_v35  ;;  %v8301_v23 = vunpack.i.l.bf16 %v8300_v35  ;;  %v8307_v44 = vunpack.i.h.bf16 %v8305_v40  ;;  %v8306_v25 = vunpack.i.l.bf16 %v8305_v40  ;;  %v5781_v41 = vld [vmem:[%s10137_s7 + $0x120] sm:$0xff] }
 0x59f   : > { %7161 = vmatprep.mubr.msk.f32.mxu0 %vm8326_vm11, %v8327_v18  ;;  %7689 = vmatprep.subr.bf16.mxu1 %v8325_v5 }
 0x5a0   : > { %7740 = vmatprep.subr.bf16.mxu0 %v8325_v5  ;;  %v7756_v45 = vpack.c.bf16 %v8302_v39, %v8301_v23  ;;  %v7759_v48 = vpack.c.bf16 %v8307_v44, %v8306_v25 }
 0x5a1   : > { %7162 = vmatmul.mubr.msk.f32.gmra.mrb[56].mxu0 %vm3570_vm12, %v5809_v54  ;;  %v8310_v46 = vpop.permute.xlu0 %8309  ;;  %v5782_v54 = vld [vmem:[%s10137_s7 + $0x128] sm:$0xff] }
 0x5a2   : > { %7691 = vmatpush3.bf16.msra.mxu1 %v7690_v58  ;;  %7742 = vmatpush3.bf16.msra.mxu0 %v7741_v55  ;;  %v8312_v50 = vunpack.i.h.bf16 %v8310_v46  ;;  %v8311_v51 = vunpack.i.l.bf16 %v8310_v46  ;;  %v5841_v55 = vld [vmem:[%s10137_s7 + $0x210] sm:$0xff]  ;;  %v5784_v58 = vld [vmem:[%s10137_s7 + $0x138] sm:$0xff] }
 0x5a3   : > { %7164 = vmatprep.mubr.msk.f32.mxu0 %vm8326_vm11, %v8327_v18  ;;  %7805 = vmatprep.subr.bf16.mxu1 %v8325_v5 }
 0x5a4   : > { %7743 = vmatprep.subr.bf16.mxu0 %v8325_v5  ;;  %v7762_v53 = vpack.c.bf16 %v8312_v50, %v8311_v51 }
 0x5a5   : > { %7012 = vmatmul.mubr.msk.f32.vlgmr.msra.gmra.mrb[48].mxu1 %vm3570_vm12, %v5745_v59  ;;  %7165 = vmatmul.mubr.msk.f32.gmra.mrb[58].mxu0 %vm3570_vm12, %v5810_v60  ;;  %v5843_v59 = vld [vmem:[%s10137_s7 + $0x220] sm:$0xff] }
 0x5a6   : > { %7811 = vmatpush3.bf16.msra.mxu1 %v9411_v11  ;;  %7745 = vmatpush3.bf16.msra.mxu0 %v7744_v61  ;;  %v5747_v11 = vld [vmem:[%s10137_s7 + $0x88] sm:$0xff]  ;;  %v5785_v60 = vld [vmem:[%s10137_s7 + $0x140] sm:$0xff] }
 0x5a7   : > { %7014 = vmatprep.mubr.msk.f32.mxu1 %vm8326_vm11, %v8327_v18  ;;  %7167 = vmatprep.mubr.msk.f32.mxu0 %vm8326_vm11, %v8327_v18  ;;  %v5844_v61 = vld [vmem:[%s10137_s7 + $0x228] sm:$0xff] }
 0x5a8   : > { %7806 = vmatprep.subr.bf16.mxu1 %v8325_v5  ;;  %7746 = vmatprep.subr.bf16.mxu0 %v8325_v5 }
 0x5a9   : > { %7015 = vmatmul.mubr.msk.f32.gmra.mrb[50].mxu1 %vm3570_vm12, %v5746_v49  ;;  %7168 = vmatmul.mubr.msk.f32.gmra.mrb[60].mxu0 %vm3570_vm12, %v5811_v62  ;;  %v5786_v49 = vld [vmem:[%s10137_s7 + $0x148] sm:$0xff]  ;;  %v5845_v62 = vld [vmem:[%s10137_s7 + $0x230] sm:$0xff] }
 0x5aa   : > { %7812 = vmatpush3.bf16.msra.mxu1 %v9415_v16  ;;  %7017 = vmatprep.mubr.msk.f32.mxu1 %vm8326_vm11, %v8327_v18  ;;  %v5748_v16 = vld [vmem:[%s10137_s7 + $0x90] sm:$0xff] }
 0x5ab   : > { %7170 = vmatprep.mubr.msk.f32.mxu0 %vm8326_vm11, %v8327_v18  ;;  %7807 = vmatprep.subr.bf16.mxu1 %v8325_v5 }
 0x5ad   : > { %7018 = vmatmul.mubr.msk.f32.gmra.mrb[52].mxu1 %vm3570_vm12, %v5747_v11  ;;  %7171 = vmatmul.mubr.msk.f32.gmra.mrb[62].mxu0 %vm3570_vm12, %v5812_v63  ;;  %v5787_v11 = vld [vmem:[%s10137_s7 + $0x150] sm:$0xff]  ;;  %v5846_v63 = vld [vmem:[%s10137_s7 + $0x238] sm:$0xff] }
 0x5ae   : > { %7813 = vmatpush3.bf16.msra.mxu1 %v9419_v21  ;;  %7020 = vmatprep.mubr.msk.f32.mxu1 %vm8326_vm11, %v8327_v18  ;;  %v5749_v21 = vld [vmem:[%s10137_s7 + $0x98] sm:$0xff] }
 0x5af   : > { %7173 = vmatprep.mubr.msk.f32.mxu0 %vm8326_vm11, %v8327_v18  ;;  %7808 = vmatprep.subr.bf16.mxu1 %v8325_v5 }
 0x5b1   : > { %7021 = vmatmul.mubr.msk.f32.gmra.mrb[54].mxu1 %vm3570_vm12, %v5748_v16  ;;  %7174 = vmatmul.mubr.msk.f32.gmra.mrb[64].mxu0 %vm3570_vm12, %v5813_v0  ;;  %v5788_v16 = vld [vmem:[%s10137_s7 + $0x158] sm:$0xff]  ;;  %v5847_v0 = vld [vmem:[%s10137_s7 + $0x240] sm:$0xff] }
 0x5b2   : > { %7814 = vmatpush3.bf16.msra.mxu1 %v9423_v27  ;;  %7023 = vmatprep.mubr.msk.f32.mxu1 %vm8326_vm11, %v8327_v18  ;;  %v5750_v27 = vld [vmem:[%s10137_s7 + $0xa0] sm:$0xff] }
 0x5b3   : > { %7176 = vmatprep.mubr.msk.f32.mxu0 %vm8326_vm11, %v8327_v18  ;;  %7809 = vmatprep.subr.bf16.mxu1 %v8325_v5 }
 0x5b5   : > { %7024 = vmatmul.mubr.msk.f32.gmra.mrb[56].mxu1 %vm3570_vm12, %v5749_v21  ;;  %7177 = vmatmul.mubr.msk.f32.gmra.mrb[66].mxu0 %vm3570_vm12, %v5814_v1  ;;  %v5789_v21 = vld [vmem:[%s10137_s7 + $0x160] sm:$0xff]  ;;  %v5848_v1 = vld [vmem:[%s10137_s7 + $0x248] sm:$0xff] }
 0x5b6   : > { %7815 = vmatpush3.bf16.msra.mxu1 %v9427_v32  ;;  %7026 = vmatprep.mubr.msk.f32.mxu1 %vm8326_vm11, %v8327_v18  ;;  %v5751_v32 = vld [vmem:[%s10137_s7 + $0xa8] sm:$0xff] }
 0x5b7   : > { %7179 = vmatprep.mubr.msk.f32.mxu0 %vm8326_vm11, %v8327_v18  ;;  %7810 = vmatprep.subr.bf16.mxu1 %v8325_v5 }
 0x5b9   : > { %7027 = vmatmul.mubr.msk.f32.gmra.mrb[58].mxu1 %vm3570_vm12, %v5750_v27  ;;  %7180 = vmatmul.mubr.msk.f32.gmra.mrb[68].mxu0 %vm3570_vm12, %v5815_v2  ;;  %v5849_v27 = vld [vmem:[%s10137_s7 + $0x250] sm:$0xff]  ;;  %v5865_v2 = vld [vmem:[%s10137_s7 + $0x258] sm:$0xff] }
 0x5ba   : > { %7816 = vmatpush3.bf16.msra.mxu1 %v9431_v37  ;;  %7029 = vmatprep.mubr.msk.f32.mxu1 %vm8326_vm11, %v8327_v18  ;;  %v5752_v37 = vld [vmem:[%s10137_s7 + $0xb0] sm:$0xff] }
 0x5bb   : > { %7182 = vmatprep.mubr.msk.f32.mxu0 %vm8326_vm11, %v8327_v18  ;;  %7764 = vmatprep.subr.bf16.mxu1 %v8325_v5 }
 0x5bd   : > { %7030 = vmatmul.mubr.msk.f32.gmra.mrb[60].mxu1 %vm3570_vm12, %v5751_v32  ;;  %7183 = vmatmul.mubr.msk.f32.gmra.mrb[70].mxu0 %vm3570_vm12, %v5816_v3  ;;  %v5866_v32 = vld [vmem:[%s10137_s7 + $0x260] sm:$0xff]  ;;  %v5867_v3 = vld [vmem:[%s10137_s7 + $0x268] sm:$0xff] }
 0x5be   : > { %7032 = vmatprep.mubr.msk.f32.mxu1 %vm8326_vm11, %v8327_v18  ;;  %7185 = vmatprep.mubr.msk.f32.mxu0 %vm8326_vm11, %v8327_v18 }
 0x5c1   : > { %7033 = vmatmul.mubr.msk.f32.gmra.mrb[62].mxu1 %vm3570_vm12, %v5752_v37  ;;  %7186 = vmatmul.mubr.msk.f32.gmra.mrb[72].mxu0 %vm3570_vm12, %v5817_v4  ;;  %v5868_v37 = vld [vmem:[%s10137_s7 + $0x270] sm:$0xff]  ;;  %v5869_v4 = vld [vmem:[%s10137_s7 + $0x278] sm:$0xff] }
 0x5c2   : > { %7035 = vmatprep.mubr.msk.f32.mxu1 %vm8326_vm11, %v8327_v18  ;;  %7188 = vmatprep.mubr.msk.f32.mxu0 %vm8326_vm11, %v8327_v18 }
 0x5c5   : > { %7036 = vmatmul.mubr.msk.f32.gmra.mrb[64].mxu1 %vm3570_vm12, %v5753_v6  ;;  %7189 = vmatmul.mubr.msk.f32.gmra.mrb[74].mxu0 %vm3570_vm12, %v5818_v8  ;;  %v5870_v6 = vld [vmem:[%s10137_s7 + $0x280] sm:$0xff]  ;;  %v5871_v8 = vld [vmem:[%s10137_s7 + $0x288] sm:$0xff] }
 0x5c6   : > { %7038 = vmatprep.mubr.msk.f32.mxu1 %vm8326_vm11, %v8327_v18  ;;  %7191 = vmatprep.mubr.msk.f32.mxu0 %vm8326_vm11, %v8327_v18 }
 0x5c9   : > { %7039 = vmatmul.mubr.msk.f32.gmra.mrb[66].mxu1 %vm3570_vm12, %v5754_v10  ;;  %7192 = vmatmul.mubr.msk.f32.gmra.mrb[76].mxu0 %vm3570_vm12, %v5819_v12  ;;  %v5873_v10 = vld [vmem:[%s10137_s7 + $0x298] sm:$0xff]  ;;  %v5874_v12 = vld [vmem:[%s10137_s7 + $0x2a0] sm:$0xff] }
 0x5ca   : > { %7041 = vmatprep.mubr.msk.f32.mxu1 %vm8326_vm11, %v8327_v18  ;;  %7218 = vmatprep.mubr.msk.f32.mxu0 %vm8326_vm11, %v8327_v18 }
 0x5cd   : > { %7042 = vmatmul.mubr.msk.f32.gmra.mrb[68].mxu1 %vm3570_vm12, %v5755_v19  ;;  %7219 = vmatmul.mubr.msk.f32.vlgmr.msra.gmra.mrb[48].mxu0 %vm3570_vm12, %v5835_v20  ;;  %v5878_v19 = vld [vmem:[%s10137_s7 + $0x2c0] sm:$0xff]  ;;  %v5879_v20 = vld [vmem:[%s10137_s7 + $0x2c8] sm:$0xff] }
 0x5ce   : > { %7748 = vmatpush3.bf16.msra.mxu0 %v7747_v22  ;;  %7044 = vmatprep.mubr.msk.f32.mxu1 %vm8326_vm11, %v8327_v18 }
 0x5cf   : > { %7221 = vmatprep.mubr.msk.f32.mxu0 %vm8326_vm11, %v8327_v18  ;;  %7749 = vmatprep.subr.bf16.mxu0 %v8325_v5 }
 0x5d1   : > { %7045 = vmatmul.mubr.msk.f32.gmra.mrb[70].mxu1 %vm3570_vm12, %v5756_v29  ;;  %7222 = vmatmul.mubr.msk.f32.gmra.mrb[50].mxu0 %vm3570_vm12, %v5836_v30 }
 0x5d2   : > { %7751 = vmatpush3.bf16.msra.mxu0 %v7750_v34  ;;  %7047 = vmatprep.mubr.msk.f32.mxu1 %vm8326_vm11, %v8327_v18 }
 0x5d3   : > { %7224 = vmatprep.mubr.msk.f32.mxu0 %vm8326_vm11, %v8327_v18  ;;  %7752 = vmatprep.subr.bf16.mxu0 %v8325_v5 }
 0x5d5   : > { %7048 = vmatmul.mubr.msk.f32.gmra.mrb[72].mxu1 %vm3570_vm12, %v5757_v36  ;;  %7225 = vmatmul.mubr.msk.f32.gmra.mrb[52].mxu0 %vm3570_vm12, %v5837_v15 }
 0x5d6   : > { %7754 = vmatpush3.bf16.msra.mxu0 %v7753_v38  ;;  %7050 = vmatprep.mubr.msk.f32.mxu1 %vm8326_vm11, %v8327_v18 }
 0x5d7   : > { %7227 = vmatprep.mubr.msk.f32.mxu0 %vm8326_vm11, %v8327_v18  ;;  %7755 = vmatprep.subr.bf16.mxu0 %v8325_v5 }
 0x5d9   : > { %7051 = vmatmul.mubr.msk.f32.gmra.mrb[74].mxu1 %vm3570_vm12, %v5758_v42  ;;  %7228 = vmatmul.mubr.msk.f32.gmra.mrb[54].mxu0 %vm3570_vm12, %v5838_v43 }
 0x5da   : > { %7757 = vmatpush3.bf16.msra.mxu0 %v7756_v45  ;;  %7053 = vmatprep.mubr.msk.f32.mxu1 %vm8326_vm11, %v8327_v18 }
 0x5db   : > { %7230 = vmatprep.mubr.msk.f32.mxu0 %vm8326_vm11, %v8327_v18  ;;  %7758 = vmatprep.subr.bf16.mxu0 %v8325_v5 }
 0x5dd   : > { %7054 = vmatmul.mubr.msk.f32.gmra.mrb[76].mxu1 %vm3570_vm12, %v5759_v31  ;;  %7231 = vmatmul.mubr.msk.f32.gmra.mrb[56].mxu0 %vm3570_vm12, %v5839_v47 }
 0x5de   : > { %7760 = vmatpush3.bf16.msra.mxu0 %v7759_v48  ;;  %7098 = vmatprep.mubr.msk.f32.mxu1 %vm8326_vm11, %v8327_v18 }
 0x5df   : > { %7233 = vmatprep.mubr.msk.f32.mxu0 %vm8326_vm11, %v8327_v18  ;;  %7761 = vmatprep.subr.bf16.mxu0 %v8325_v5 }
 0x5e1   : > { %7099 = vmatmul.mubr.msk.f32.vlgmr.msra.gmra.mrb[60].mxu1 %vm3570_vm12, %v5781_v41  ;;  %7234 = vmatmul.mubr.msk.f32.gmra.mrb[58].mxu0 %vm3570_vm12, %v5840_v52 }
 0x5e2   : > { %7763 = vmatpush3.bf16.msra.mxu0 %v7762_v53  ;;  %7101 = vmatprep.mubr.msk.f32.mxu1 %vm8326_vm11, %v8327_v18 }
 0x5e3   : > { %7236 = vmatprep.mubr.msk.f32.mxu0 %vm8326_vm11, %v8327_v18 }
 0x5e5   : > { %7102 = vmatmul.mubr.msk.f32.gmra.mrb[62].mxu1 %vm3570_vm12, %v5782_v54  ;;  %7237 = vmatmul.mubr.msk.f32.gmra.mrb[60].mxu0 %vm3570_vm12, %v5841_v55  ;;  %v3540_v54 = vld [vmem:[%s10138_s8] sm:$0xff] }
 0x5e6   : > { %7104 = vmatprep.mubr.msk.f32.mxu1 %vm8326_vm11, %v8327_v18  ;;  %7239 = vmatprep.mubr.msk.f32.mxu0 %vm8326_vm11, %v8327_v18 }
 0x5e9   : > { %7105 = vmatmul.mubr.msk.f32.gmra.mrb[64].mxu1 %vm3570_vm12, %v5783_v56  ;;  %7240 = vmatmul.mubr.msk.f32.gmra.mrb[62].mxu0 %vm3570_vm12, %v5842_v57  ;;  %v3541_v56 = vld [vmem:[%s10138_s8 + $0x8] sm:$0xff] }
 0x5ea   : > { %7107 = vmatprep.mubr.msk.f32.mxu1 %vm8326_vm11, %v8327_v18  ;;  %7242 = vmatprep.mubr.msk.f32.mxu0 %vm8326_vm11, %v8327_v18 }
 0x5ed   : > { %7108 = vmatmul.mubr.msk.f32.gmra.mrb[66].mxu1 %vm3570_vm12, %v5784_v58  ;;  %7243 = vmatmul.mubr.msk.f32.gmra.mrb[64].mxu0 %vm3570_vm12, %v5843_v59 }
 0x5ee   : > { %7110 = vmatprep.mubr.msk.f32.mxu1 %vm8326_vm11, %v8327_v18  ;;  %7245 = vmatprep.mubr.msk.f32.mxu0 %vm8326_vm11, %v8327_v18 }
 0x5f1   : > { %7111 = vmatmul.mubr.msk.f32.gmra.mrb[68].mxu1 %vm3570_vm12, %v5785_v60  ;;  %7246 = vmatmul.mubr.msk.f32.gmra.mrb[66].mxu0 %vm3570_vm12, %v5844_v61  ;;  %v3542_v61 = vld [vmem:[%s10138_s8 + $0x10] sm:$0xff] }
 0x5f2   : > { %7113 = vmatprep.mubr.msk.f32.mxu1 %vm8326_vm11, %v8327_v18  ;;  %7248 = vmatprep.mubr.msk.f32.mxu0 %vm8326_vm11, %v8327_v18 }
 0x5f5   : > { %7114 = vmatmul.mubr.msk.f32.gmra.mrb[70].mxu1 %vm3570_vm12, %v5786_v49  ;;  %7249 = vmatmul.mubr.msk.f32.gmra.mrb[68].mxu0 %vm3570_vm12, %v5845_v62 }
 0x5f6   : > { %7116 = vmatprep.mubr.msk.f32.mxu1 %vm8326_vm11, %v8327_v18  ;;  %7251 = vmatprep.mubr.msk.f32.mxu0 %vm8326_vm11, %v8327_v18 }
 0x5f9   : > { %7117 = vmatmul.mubr.msk.f32.gmra.mrb[72].mxu1 %vm3570_vm12, %v5787_v11  ;;  %7252 = vmatmul.mubr.msk.f32.gmra.mrb[70].mxu0 %vm3570_vm12, %v5846_v63 }
 0x5fa   : > { %7119 = vmatprep.mubr.msk.f32.mxu1 %vm8326_vm11, %v8327_v18  ;;  %7254 = vmatprep.mubr.msk.f32.mxu0 %vm8326_vm11, %v8327_v18 }
 0x5fd   : > { %7120 = vmatmul.mubr.msk.f32.gmra.mrb[74].mxu1 %vm3570_vm12, %v5788_v16  ;;  %7255 = vmatmul.mubr.msk.f32.gmra.mrb[72].mxu0 %vm3570_vm12, %v5847_v0 }
 0x5fe   : > { %7122 = vmatprep.mubr.msk.f32.mxu1 %vm8326_vm11, %v8327_v18  ;;  %7257 = vmatprep.mubr.msk.f32.mxu0 %vm8326_vm11, %v8327_v18 }
 0x601   : > { %7123 = vmatmul.mubr.msk.f32.gmra.mrb[76].mxu1 %vm3570_vm12, %v5789_v21  ;;  %7258 = vmatmul.mubr.msk.f32.gmra.mrb[74].mxu0 %vm3570_vm12, %v5848_v1  ;;  %v3543_v21 = vld [vmem:[%s10138_s8 + $0x18] sm:$0xff] }
 0x602   : > { %7260 = vmatprep.mubr.msk.f32.mxu0 %vm8326_vm11, %v8327_v18  ;;  %7362 = vmatprep.mubr.msk.f32.mxu1 %vm8326_vm11, %v8327_v18 }
 0x605   : > { %7261 = vmatmul.mubr.msk.f32.gmra.mrb[76].mxu0 %vm3570_vm12, %v5849_v27 }
 0x606   : > { %7287 = vmatprep.mubr.msk.f32.mxu0 %vm8326_vm11, %v8327_v18 }
 0x609   : > { %7288 = vmatmul.mubr.msk.f32.vlgmr.msra.gmra.mrb[48].mxu0 %vm3570_vm12, %v5865_v2 }
 0x60a   : > { %7290 = vmatprep.mubr.msk.f32.mxu0 %vm8326_vm11, %v8327_v18 }
 0x60d   : > { %7291 = vmatmul.mubr.msk.f32.gmra.mrb[50].mxu0 %vm3570_vm12, %v5866_v32 }
 0x60e   : > { %7293 = vmatprep.mubr.msk.f32.mxu0 %vm8326_vm11, %v8327_v18 }
 0x611   : > { %7294 = vmatmul.mubr.msk.f32.gmra.mrb[52].mxu0 %vm3570_vm12, %v5867_v3 }
 0x612   : > { %7296 = vmatprep.mubr.msk.f32.mxu0 %vm8326_vm11, %v8327_v18 }
 0x615   : > { %7297 = vmatmul.mubr.msk.f32.gmra.mrb[54].mxu0 %vm3570_vm12, %v5868_v37  ;;  %v3544_v37 = vld [vmem:[%s10138_s8 + $0x20] sm:$0xff] }
 0x616   : > { %7299 = vmatprep.mubr.msk.f32.mxu0 %vm8326_vm11, %v8327_v18 }
 0x619   : > { %7300 = vmatmul.mubr.msk.f32.gmra.mrb[56].mxu0 %vm3570_vm12, %v5869_v4 }
 0x61a   : > { %7302 = vmatprep.mubr.msk.f32.mxu0 %vm8326_vm11, %v8327_v18 }
 0x61d   : > { %7303 = vmatmul.mubr.msk.f32.gmra.mrb[58].mxu0 %vm3570_vm12, %v5870_v6 }
 0x61e   : > { %7305 = vmatprep.mubr.msk.f32.mxu0 %vm8326_vm11, %v8327_v18 }
 0x621   : > { %7306 = vmatmul.mubr.msk.f32.gmra.mrb[60].mxu0 %vm3570_vm12, %v5871_v8 }
 0x622   : > { %7308 = vmatprep.mubr.msk.f32.mxu0 %vm8326_vm11, %v8327_v18 }
 0x625   : > { %7309 = vmatmul.mubr.msk.f32.gmra.mrb[62].mxu0 %vm3570_vm12, %v5872_v9 }
 0x626   : > { %7311 = vmatprep.mubr.msk.f32.mxu0 %vm8326_vm11, %v8327_v18 }
 0x629   : > { %7312 = vmatmul.mubr.msk.f32.gmra.mrb[64].mxu0 %vm3570_vm12, %v5873_v10 }
 0x62a   : > { %7314 = vmatprep.mubr.msk.f32.mxu0 %vm8326_vm11, %v8327_v18 }
 0x62d   : > { %7315 = vmatmul.mubr.msk.f32.gmra.mrb[66].mxu0 %vm3570_vm12, %v5874_v12 }
 0x62e   : > { %7317 = vmatprep.mubr.msk.f32.mxu0 %vm8326_vm11, %v8327_v18 }
 0x631   : > { %7318 = vmatmul.mubr.msk.f32.gmra.mrb[68].mxu0 %vm3570_vm12, %v5875_v13  ;;  %v3545_v13 = vld [vmem:[%s10138_s8 + $0x28] sm:$0xff] }
 0x632   : > { %7320 = vmatprep.mubr.msk.f32.mxu0 %vm8326_vm11, %v8327_v18 }
 0x635   : > { %7321 = vmatmul.mubr.msk.f32.gmra.mrb[70].mxu0 %vm3570_vm12, %v5876_v14 }
 0x636   : > { %7323 = vmatprep.mubr.msk.f32.mxu0 %vm8326_vm11, %v8327_v18 }
 0x639   : > { %7324 = vmatmul.mubr.msk.f32.gmra.mrb[72].mxu0 %vm3570_vm12, %v5877_v17 }
 0x63a   : > { %7326 = vmatprep.mubr.msk.f32.mxu0 %vm8326_vm11, %v8327_v18 }
 0x63d   : > { %7327 = vmatmul.mubr.msk.f32.gmra.mrb[74].mxu0 %vm3570_vm12, %v5878_v19 }
 0x63e   : > { %7329 = vmatprep.mubr.msk.f32.mxu0 %vm8326_vm11, %v8327_v18 }
 0x641   : > { %7330 = vmatmul.mubr.msk.f32.gmra.mrb[76].mxu0 %vm3570_vm12, %v5879_v20 }
 0x678   : > { %v3946_v22 = vpop.f32.mrb[48].mxu1 }
 0x679   : > { %v7013_v24 = vpop.f32.mrb[49].mxu1  ;;  %v7817_v55 = vadd.f32 %v3946_v22, %v3540_v54 }
 0x67a   : > { %v3546_v24 = vld [vmem:[%s10138_s8 + $0x30] sm:$0xff] }
 0x67c   : > { %v3951_v26 = vpop.f32.mrb[50].mxu1 }
 0x67d   : > { %v7016_v28 = vpop.f32.mrb[51].mxu1  ;;  %v7819_v60 = vadd.f32 %v3951_v26, %v3541_v56 }
 0x680   : > { %v3956_v29 = vpop.f32.mrb[52].mxu1 }
 0x681   : > { %v7019_v30 = vpop.f32.mrb[53].mxu1  ;;  %v7821_v63 = vadd.f32 %v3956_v29, %v3542_v61 }
 0x684   : > { %v3961_v33 = vpop.f32.mrb[54].mxu1 }
 0x685   : > { %v7022_v7 = vpop.f32.mrb[55].mxu1  ;;  %v7823_v3 = vadd.f32 %v3961_v33, %v3543_v21 }
 0x688   : > { %v3966_v34 = vpop.f32.mrb[56].mxu1 }
 0x689   : > { %v7025_v35 = vpop.f32.mrb[57].mxu1  ;;  %v7825_v9 = vadd.f32 %v3966_v34, %v3544_v37  ;;  %v3547_v34 = vld [vmem:[%s10138_s8 + $0x38] sm:$0xff] }
 0x68c   : > { %v3971_v36 = vpop.f32.mrb[58].mxu1 }
 0x68d   : > { %v7028_v15 = vpop.f32.mrb[59].mxu1  ;;  %v7827_v22 = vadd.f32 %v3971_v36, %v3545_v13 }
 0x6b4   : > { %v4228_v38 = vpop.f32.mrb[60].mxu1 }
 0x6b5   : > { %v7100_v39 = vpop.f32.mrb[61].mxu1  ;;  %v7829_v30 = vadd.f32 %v4228_v38, %v3546_v24 }
 0x6b8   : > { %v9934_v23 = vpop.f32.mrb[62].mxu1 }
 0x6b9   : > { %v7103_v40 = vpop.f32.mrb[63].mxu1 }
 0x6ba   : > { %v7831_v40 = vadd.f32 %v9934_v23, %v3547_v34  ;;  %v5064_v34 = vld [vmem:[%s10139_s9 + $0x30] sm:$0xff] }
 0x6bc   : > { %v9936_v42 = vpop.f32.mrb[64].mxu1 }
 0x6bd   : > { %v7106_v43 = vpop.f32.mrb[65].mxu1 }
 0x6be   : > { %v3548_v43 = vld [vmem:[%s10138_s8 + $0x40] sm:$0xff] }
 0x6c0   : > { %v9938_v44 = vpop.f32.mrb[66].mxu1 }
 0x6c1   : > { %v7109_v25 = vpop.f32.mrb[67].mxu1 }
 0x6c4   : > { %v9940_v45 = vpop.f32.mrb[68].mxu1 }
 0x6c5   : > { %v7112_v46 = vpop.f32.mrb[69].mxu1 }
 0x6c8   : > { %v9942_v31 = vpop.f32.mrb[70].mxu1 }
 0x6c9   : > { %v7115_v47 = vpop.f32.mrb[71].mxu1 }
 0x6ca   : > { %v7833_v47 = vadd.f32 %v9936_v42, %v3548_v43  ;;  %v5069_v43 = vld [vmem:[%s10140_s10] sm:$0xff] }
 0x6cc   : > { %v9944_v48 = vpop.f32.mrb[72].mxu1 }
 0x6cd   : > { %v7118_v50 = vpop.f32.mrb[73].mxu1 }
 0x6d0   : > { %v9946_v51 = vpop.f32.mrb[74].mxu1 }
 0x6d1   : > { %v7121_v41 = vpop.f32.mrb[75].mxu1 }
 0x6d4   : > { %v9948_v52 = vpop.f32.mrb[76].mxu1 }
 0x6d5   : > { %v7124_v53 = vpop.f32.mrb[77].mxu1 }
 0x6d6   : > { %v3549_v53 = vld [vmem:[%s10138_s8 + $0x48] sm:$0xff] }
 0x6dc   : > { %v4954_v57 = vpop.f32.mrb[48].mxu0 }
 0x6dd   : > { %v7818_v58 = vadd.f32 %v7817_v55, %v4954_v57  ;;  %v7289_v59 = vpop.f32.mrb[49].mxu0  ;;  %v7835_v57 = vadd.f32 %v9938_v44, %v3549_v53 }
 0x6df   : > { %v5043_v16 = vmax.f32 %v7818_v58, 0.0  ;;  %v3550_v58 = vld [vmem:[%s10138_s8 + $0x50] sm:$0xff] }
 0x6e0   : > { %v4959_v49 = vpop.f32.mrb[50].mxu0  ;;  %v7837_v61 = vadd.f32 %v9940_v45, %v3550_v58  ;;  %v5072_v58 = vld [vmem:[%s10140_s10 + $0x18] sm:$0xff] }
 0x6e1   : > { %v7820_v62 = vadd.f32 %v7819_v60, %v4959_v49  ;;  %v7292_v11 = vpop.f32.mrb[51].mxu0 }
 0x6e2   : > { %v3551_v11 = vld [vmem:[%s10138_s8 + $0x58] sm:$0xff] }
 0x6e3   : > { %v5044_v0 = vmax.f32 %v7820_v62, 0.0  ;;  %v7839_v21 = vadd.f32 %v9942_v31, %v3551_v11  ;;  %v5073_v11 = vld [vmem:[%s10140_s10 + $0x20] sm:$0xff] }
 0x6e4   : > { %v4964_v1 = vpop.f32.mrb[52].mxu0 }
 0x6e5   : > { %v7765_v27 = vpack.c.bf16 %v5044_v0, %v5043_v16  ;;  %v7822_v2 = vadd.f32 %v7821_v63, %v4964_v1  ;;  %v7295_v32 = vpop.f32.mrb[53].mxu0  ;;  %v3552_v1 = vld [vmem:[%s10138_s8 + $0x60] sm:$0xff] }
 0x6e6   : > { %v7841_v32 = vadd.f32 %v9944_v48, %v3552_v1 }
 0x6e7   : > { %7766 = vmatpush3.bf16.msra.mxu1 %v7765_v27  ;;  %v5045_v10 = vmax.f32 %v7822_v2, 0.0 }
 0x6e8   : > { %v4969_v4 = vpop.f32.mrb[54].mxu0  ;;  %7767 = vmatprep.subr.bf16.mxu1 %v8325_v5 }
 0x6e9   : > { %v7824_v6 = vadd.f32 %v7823_v3, %v4969_v4  ;;  %v7298_v8 = vpop.f32.mrb[55].mxu0  ;;  %v3553_v4 = vld [vmem:[%s10138_s8 + $0x68] sm:$0xff] }
 0x6eb   : > { %v5046_v12 = vmax.f32 %v7824_v6, 0.0 }
 0x6ec   : > { %v4974_v14 = vpop.f32.mrb[56].mxu0 }
 0x6ed   : > { %v7768_v17 = vpack.c.bf16 %v5046_v12, %v5045_v10  ;;  %v7826_v19 = vadd.f32 %v7825_v9, %v4974_v14  ;;  %v7301_v20 = vpop.f32.mrb[57].mxu0  ;;  %v7843_v10 = vadd.f32 %v9946_v51, %v3553_v4  ;;  %v3554_v12 = vld [vmem:[%s10138_s8 + $0x70] sm:$0xff] }
 0x6ef   : > { %7769 = vmatpush3.bf16.msra.mxu1 %v7768_v17  ;;  %v5047_v33 = vmax.f32 %v7826_v19, 0.0  ;;  %v7845_v17 = vadd.f32 %v9948_v52, %v3554_v12  ;;  %v5060_v52 = vld [vmem:[%s10139_s9 + $0x10] sm:$0xff] }
 0x6f0   : > { %v4979_v26 = vpop.f32.mrb[58].mxu0  ;;  %7770 = vmatprep.subr.bf16.mxu1 %v8325_v5 }
 0x6f1   : > { %v7828_v28 = vadd.f32 %v7827_v22, %v4979_v26  ;;  %v7304_v29 = vpop.f32.mrb[59].mxu0 }
 0x6f2   : > { %v5058_v29 = vld [vmem:[%s10139_s9] sm:$0xff] }
 0x6f3   : > { %v5048_v7 = vmax.f32 %v7828_v28, 0.0 }
 0x6f4   : > { %v4984_v35 = vpop.f32.mrb[60].mxu0 }
 0x6f5   : > { %v7771_v15 = vpack.c.bf16 %v5048_v7, %v5047_v33  ;;  %v7830_v36 = vadd.f32 %v7829_v30, %v4984_v35  ;;  %v7307_v39 = vpop.f32.mrb[61].mxu0  ;;  %v5061_v30 = vld [vmem:[%s10139_s9 + $0x18] sm:$0xff]  ;;  %v5062_v33 = vld [vmem:[%s10139_s9 + $0x20] sm:$0xff]  ;;  %v5063_v7 = vld [vmem:[%s10139_s9 + $0x28] sm:$0xff] }
 0x6f6   : > { %v5065_v35 = vld [vmem:[%s10139_s9 + $0x38] sm:$0xff]  ;;  %v5068_v39 = vld [vmem:[%s10139_s9 + $0x50] sm:$0xf] }
 0x6f7   : > { %7772 = vmatpush3.bf16.msra.mxu1 %v7771_v15  ;;  %v5049_v50 = vmax.f32 %v7830_v36, 0.0  ;;  %v5066_v15 = vld [vmem:[%s10139_s9 + $0x40] sm:$0xff]  ;;  %v5067_v36 = vld [vmem:[%s10139_s9 + $0x48] sm:$0xff] }
 0x6f8   : > { %v4989_v25 = vpop.f32.mrb[62].mxu0  ;;  %7773 = vmatprep.subr.bf16.mxu1 %v8325_v5 }
 0x6f9   : > { %v7832_v38 = vadd.f32 %v7831_v40, %v4989_v25  ;;  %v7310_v46 = vpop.f32.mrb[63].mxu0  ;;  %v5245_v40 = vld [vmem:[%s10141_s11] sm:$0xff] }
 0x6fb   : > { %v5050_v41 = vmax.f32 %v7832_v38, 0.0 }
 0x6fc   : > { %v4994_v54 = vpop.f32.mrb[64].mxu0 }
 0x6fd   : > { %v7774_v23 = vpack.c.bf16 %v5050_v41, %v5049_v50  ;;  %v7834_v55 = vadd.f32 %v7833_v47, %v4994_v54  ;;  %v7313_v56 = vpop.f32.mrb[65].mxu0 }
 0x6ff   : > { %7775 = vmatpush3.bf16.msra.mxu1 %v7774_v23  ;;  %v5051_v49 = vmax.f32 %v7834_v55, 0.0  ;;  %v5071_v23 = vld [vmem:[%s10140_s10 + $0x10] sm:$0xff] }
 0x700   : > { %v4999_v59 = vpop.f32.mrb[66].mxu0  ;;  %7776 = vmatprep.subr.bf16.mxu1 %v8325_v5 }
 0x701   : > { %v7836_v42 = vadd.f32 %v7835_v57, %v4999_v59  ;;  %v7316_v60 = vpop.f32.mrb[67].mxu0 }
 0x703   : > { %v5052_v62 = vmax.f32 %v7836_v42, 0.0 }
 0x704   : > { %v5004_v63 = vpop.f32.mrb[68].mxu0 }
 0x705   : > { %v7777_v44 = vpack.c.bf16 %v5052_v62, %v5051_v49  ;;  %v7838_v16 = vadd.f32 %v7837_v61, %v5004_v63  ;;  %v7319_v0 = vpop.f32.mrb[69].mxu0 }
 0x706   : > { %v5074_v0 = vld [vmem:[%s10140_s10 + $0x28] sm:$0xff] }
 0x707   : > { %7778 = vmatpush3.bf16.msra.mxu1 %v7777_v44  ;;  %v5053_v3 = vmax.f32 %v7838_v16, 0.0 }
 0x708   : > { %v5009_v27 = vpop.f32.mrb[70].mxu0  ;;  %7779 = vmatprep.subr.bf16.mxu1 %v8325_v5 }
 0x709   : > { %v7840_v45 = vadd.f32 %v7839_v21, %v5009_v27  ;;  %v7322_v2 = vpop.f32.mrb[71].mxu0 }
 0x70b   : > { %v5054_v37 = vmax.f32 %v7840_v45, 0.0 }
 0x70c   : > { %v5014_v6 = vpop.f32.mrb[72].mxu0 }
 0x70d   : > { %v7780_v31 = vpack.c.bf16 %v5054_v37, %v5053_v3  ;;  %v7842_v8 = vadd.f32 %v7841_v32, %v5014_v6  ;;  %v7325_v9 = vpop.f32.mrb[73].mxu0  ;;  %v5075_v3 = vld [vmem:[%s10140_s10 + $0x30] sm:$0xff] }
 0x70f   : > { %7781 = vmatpush3.bf16.msra.mxu1 %v7780_v31  ;;  %v5055_v19 = vmax.f32 %v7842_v8, 0.0  ;;  %v5076_v31 = vld [vmem:[%s10140_s10 + $0x38] sm:$0xff] }
 0x710   : > { %v5019_v13 = vpop.f32.mrb[74].mxu0  ;;  %7782 = vmatprep.subr.bf16.mxu1 %v8325_v5  ;;  %v5059_v5 = vld [vmem:[%s10139_s9 + $0x8] sm:$0xff] }
 0x711   : > { %v7844_v48 = vadd.f32 %v7843_v10, %v5019_v13  ;;  %v7328_v14 = vpop.f32.mrb[75].mxu0 }
 0x712   : > { %v5077_v14 = vld [vmem:[%s10140_s10 + $0x40] sm:$0xff] }
 0x713   : > { %v5056_v20 = vmax.f32 %v7844_v48, 0.0 }
 0x714   : > { %v5024_v22 = vpop.f32.mrb[76].mxu0 }
 0x715   : > { %v7783_v24 = vpack.c.bf16 %v5056_v20, %v5055_v19  ;;  %v7846_v26 = vadd.f32 %v7845_v17, %v5024_v22  ;;  %v7331_v28 = vpop.f32.mrb[77].mxu0  ;;  %v5078_v22 = vld [vmem:[%s10140_s10 + $0x48] sm:$0xff] }
 0x717   : > { %7784 = vmatpush3.bf16.msra.mxu1 %v7783_v24  ;;  %v5057_v51 = vmax.f32 %v7846_v26, 0.0 }
 0x718   : > { %7360 = vmatprep.subr.mxu1 %v8327_v18 }
 0x71b   : > { %7361 = vmatpush3.msra.mxu1 %v5057_v51 }
 0x71c   : > { %7363 = vmatmul.mubr.msk.f32.vlgmr.msra.gmra.mrb[78].mxu1 %vm5080_vm13, %v5058_v29  ;;  %v5079_v29 = vld [vmem:[%s10140_s10 + $0x50] sm:$0xf] }
 0x71d   : > { %7365 = vmatprep.mubr.msk.f32.mxu1 %vm8326_vm11, %v8327_v18 }
 0x720   : > { %7366 = vmatmul.mubr.msk.f32.gmra.mrb[80].mxu1 %vm5080_vm13, %v5059_v5 }
 0x721   : > { %7368 = vmatprep.mubr.msk.f32.mxu1 %vm8326_vm11, %v8327_v18 }
 0x724   : > { %7369 = vmatmul.mubr.msk.f32.gmra.mrb[82].mxu1 %vm5080_vm13, %v5060_v52 }
 0x725   : > { %7371 = vmatprep.mubr.msk.f32.mxu1 %vm8326_vm11, %v8327_v18 }
 0x728   : > { %7372 = vmatmul.mubr.msk.f32.gmra.mrb[84].mxu1 %vm5080_vm13, %v5061_v30 }
 0x729   : > { %7374 = vmatprep.mubr.msk.f32.mxu1 %vm8326_vm11, %v8327_v18 }
 0x72c   : > { %7375 = vmatmul.mubr.msk.f32.gmra.mrb[86].mxu1 %vm5080_vm13, %v5062_v33 }
 0x72d   : > { %7377 = vmatprep.mubr.msk.f32.mxu1 %vm8326_vm11, %v8327_v18 }
 0x730   : > { %7378 = vmatmul.mubr.msk.f32.gmra.mrb[88].mxu1 %vm5080_vm13, %v5063_v7 }
 0x731   : > { %7380 = vmatprep.mubr.msk.f32.mxu1 %vm8326_vm11, %v8327_v18 }
 0x734   : > { %7381 = vmatmul.mubr.msk.f32.gmra.mrb[90].mxu1 %vm5080_vm13, %v5064_v34 }
 0x735   : > { %7383 = vmatprep.mubr.msk.f32.mxu1 %vm8326_vm11, %v8327_v18 }
 0x738   : > { %7384 = vmatmul.mubr.msk.f32.gmra.mrb[92].mxu1 %vm5080_vm13, %v5065_v35 }
 0x739   : > { %7386 = vmatprep.mubr.msk.f32.mxu1 %vm8326_vm11, %v8327_v18 }
 0x73c   : > { %7387 = vmatmul.mubr.msk.f32.gmra.mrb[94].mxu1 %vm5080_vm13, %v5066_v15  ;;  %v5246_v15 = vld [vmem:[%s10141_s11 + $0x8] sm:$0x3] }
 0x73d   : > { %7389 = vmatprep.mubr.msk.f32.mxu1 %vm8326_vm11, %v8327_v18 }
 0x740   : > { %7390 = vmatmul.mubr.msk.f32.gmra.mrb[96].mxu1 %vm5080_vm13, %v5067_v36  ;;  %v5248_v36 = vld [vmem:[%s10142_s12 + $0x8] sm:$0x3] }
 0x741   : > { %7392 = vmatprep.mubr.msk.f32.mxu1 %vm8326_vm11, %v8327_v18  ;;  %v5070_v18 = vld [vmem:[%s10140_s10 + $0x8] sm:$0xff] }
 0x744   : > { %7393 = vmatmul.mubr.msk.f32.gmra.mrb[98].mxu1 %vm5080_vm13, %v5068_v39  ;;  %v5247_v39 = vld [vmem:[%s10142_s12] sm:$0xff] }
 0x745   : > { %7417 = vmatprep.mubr.msk.f32.mxu1 %vm5249_vm14, %v5245_v40 }
 0x7ef   : > { %v5180_v25 = vpop.f32.mrb[78].mxu1 }
 0x7f0   : > { %v7364_v38 = vpop.f32.mrb[79].mxu1  ;;  %v5181_v46 = vadd.f32 %v5180_v25, %v5069_v43 }
 0x7f2   : > { %v5234_v53 = vmax.f32 %v5181_v46, 0.0 }
 0x7f3   : > { %v5185_v47 = vpop.f32.mrb[80].mxu1 }
 0x7f4   : > { %v5186_v50 = vadd.f32 %v5185_v47, %v5070_v18  ;;  %v7367_v41 = vpop.f32.mrb[81].mxu1 }
 0x7f6   : > { %v5235_v54 = vmax.f32 %v5186_v50, 0.0 }
 0x7f7   : > { %v5190_v55 = vpop.f32.mrb[82].mxu1 }
 0x7f8   : > { %v7785_v56 = vpack.c.bf16 %v5235_v54, %v5234_v53  ;;  %v7370_v57 = vpop.f32.mrb[83].mxu1  ;;  %v5191_v59 = vadd.f32 %v5190_v55, %v5071_v23 }
 0x7fa   : > { %7786 = vmatprep.subr.bf16.mxu1 %v7785_v56  ;;  %v5236_v49 = vmax.f32 %v5191_v59, 0.0 }
 0x7fb   : > { %v5195_v42 = vpop.f32.mrb[84].mxu1  ;;  %7788 = vmatpush3.bf16.msra.mxu1 %v7785_v56 }
 0x7fc   : > { %v5196_v60 = vadd.f32 %v5195_v42, %v5072_v58  ;;  %v7373_v61 = vpop.f32.mrb[85].mxu1 }
 0x7fe   : > { %v5237_v62 = vmax.f32 %v5196_v60, 0.0 }
 0x7ff   : > { %v5200_v63 = vpop.f32.mrb[86].mxu1 }
 0x800   : > { %v7789_v44 = vpack.c.bf16 %v5237_v62, %v5236_v49  ;;  %v7376_v16 = vpop.f32.mrb[87].mxu1  ;;  %v5201_v21 = vadd.f32 %v5200_v63, %v5073_v11 }
 0x802   : > { %7790 = vmatprep.subr.bf16.mxu1 %v7789_v44  ;;  %v5238_v2 = vmax.f32 %v5201_v21, 0.0 }
 0x803   : > { %v5205_v1 = vpop.f32.mrb[88].mxu1  ;;  %7792 = vmatpush3.bf16.msra.mxu1 %v7789_v44 }
 0x804   : > { %v5206_v27 = vadd.f32 %v5205_v1, %v5074_v0  ;;  %v7379_v45 = vpop.f32.mrb[89].mxu1 }
 0x806   : > { %v5239_v32 = vmax.f32 %v5206_v27, 0.0 }
 0x807   : > { %v5210_v37 = vpop.f32.mrb[90].mxu1 }
 0x808   : > { %v7793_v4 = vpack.c.bf16 %v5239_v32, %v5238_v2  ;;  %v7382_v6 = vpop.f32.mrb[91].mxu1  ;;  %v5211_v8 = vadd.f32 %v5210_v37, %v5075_v3 }
 0x80a   : > { %7794 = vmatprep.subr.bf16.mxu1 %v7793_v4  ;;  %v5240_v13 = vmax.f32 %v5211_v8, 0.0 }
 0x80b   : > { %v5215_v9 = vpop.f32.mrb[92].mxu1  ;;  %7796 = vmatpush3.bf16.msra.mxu1 %v7793_v4 }
 0x80c   : > { %v5216_v10 = vadd.f32 %v5215_v9, %v5076_v31  ;;  %v7385_v12 = vpop.f32.mrb[93].mxu1 }
 0x80e   : > { %v5241_v48 = vmax.f32 %v5216_v10, 0.0 }
 0x80f   : > { %v5220_v17 = vpop.f32.mrb[94].mxu1 }
 0x810   : > { %v7797_v19 = vpack.c.bf16 %v5241_v48, %v5240_v13  ;;  %v7388_v20 = vpop.f32.mrb[95].mxu1  ;;  %v5221_v24 = vadd.f32 %v5220_v17, %v5077_v14 }
 0x812   : > { %7798 = vmatprep.subr.bf16.mxu1 %v7797_v19  ;;  %v5242_v5 = vmax.f32 %v5221_v24, 0.0 }
 0x813   : > { %v5225_v26 = vpop.f32.mrb[96].mxu1  ;;  %7800 = vmatpush3.bf16.msra.mxu1 %v7797_v19 }
 0x814   : > { %v5226_v28 = vadd.f32 %v5225_v26, %v5078_v22  ;;  %v7391_v51 = vpop.f32.mrb[97].mxu1 }
 0x816   : > { %v5243_v52 = vmax.f32 %v5226_v28, 0.0 }
 0x817   : > { %v5230_v30 = vpop.f32.mrb[98].mxu1 }
 0x818   : > { %v7801_v33 = vpack.c.bf16 %v5243_v52, %v5242_v5  ;;  %v5231_v7 = vadd.f32 %v5230_v30, %v5079_v29  ;;  %v7394_v34 = vpop.f32.mrb[99].mxu1 }
 0x81a   : > { %7802 = vmatprep.subr.bf16.mxu1 %v7801_v33  ;;  %v5244_v35 = vmax.f32 %v5231_v7, 0.0 }
 0x81b   : > { %7804 = vmatpush3.bf16.msra.mxu1 %v7801_v33 }
 0x81c   : > { %7415 = vmatprep.subr.msk.mxu1 %vm3268_vm8, %v5244_v35 }
 0x81f   : > { %7416 = vmatpush3.msk.msra.mxu1 %vm3268_vm8, %v5244_v35 }
 0x820   : > { %7418 = vmatmul.mubr.msk.f32.vlgmr.msra.gmra.mrb[100].mxu1 %vm5249_vm14, %v5246_v15 }
 0x8f3   : > { %v7419_v40 = vpop.f32.mrb[100].mxu1 }
 0x8f4   : > { %v5331_v43 = vadd.f32 %v7419_v40, %v5248_v36  ;;  %v5325_v25 = vpop.f32.mrb[101].mxu1 }
 0x8f5   : > { %v5326_v38 = vadd.f32 %v5325_v25, %v5247_v39 }
 0x8f6   : > { %5337 = vst.msk [vmem:[%s440_s24 + $0x8] sm:$0x3] %vm5336_vm15, %v5331_v43 }
 0x8f7   : > { %5335 = vst.msk [vmem:[%s440_s24] sm:$0xff] %vm5334_vm0, %v5326_v38 }
 0x8f8 PF: > { %s23_s25 = sadd.s32 1, %s8319_s25  }
 0x8f9   : > { %p20_p4 = scmp.ge.s32.totalorder %s23_s25, 4  }
 0x8fb   :  { %22 = sbr.rel (!%p20_p4) target bundleno = 1 (0x1), region = 119 }

</bundles_post_ra>
